<compile_context>
chip_gen: v6e
topology: v6e:2x2x1
jax: 0.10.0
libtpu: 0.0.40
codegen_flags: <defaults>
</compile_context>

<pallas_src>
import math

import jax
import jax.numpy as jnp
from jax.experimental import pallas as pl
from jax.experimental.pallas import tpu as pltpu

# ---------------- config (scaled-down BERT) ----------------
VOCAB = 100
TYPE_VOCAB = 2
MAX_POS = 32
HIDDEN = 64
N_HEADS = 4
HEAD_DIM = HIDDEN // N_HEADS
N_LAYERS = 3           # hidden_states = [emb, h1, h2, h3]; [-1]=h3, [-3]=h1
INTERMEDIATE = 128
LN_EPS = 1e-12
LEAKY_SLOPE = 0.01     # nn.LeakyReLU default
OUT_PAD = 128          # lane-dense padded logits width (real width = 2)
CROSS_BATCH_BIAS = -1e9


def _vmem():
    return pl.BlockSpec(memory_space=pltpu.MemorySpace.VMEM)


def _layer_norm(x, g, b):
    mean = jnp.mean(x, axis=-1, keepdims=True)
    var = jnp.mean(jnp.square(x - mean), axis=-1, keepdims=True)
    return (x - mean) * jax.lax.rsqrt(var + LN_EPS) * g + b


# ---------------- the single fused kernel ----------------

def _fused_forward_kernel(
        emb_ref, bias_ref,
        emb_ln_g_ref, emb_ln_b_ref,
        wqkv_ref, bqkv_ref, wo_ref, bo_ref,
        ln1_g_ref, ln1_b_ref,
        wf1_ref, bf1_ref, wf2_ref, bf2_ref,
        ln2_g_ref, ln2_b_ref,
        w1a_ref, w1b_ref, b1_ref, w2_ref, b2_ref,
        out_ref):
    scale = 1.0 / math.sqrt(HEAD_DIM)
    # (B*S, B*S) additive bias: key padding mask inside each example, -1e9 across
    # examples -> attention over the flattened token axis is exactly per-batch attention.
    bias = bias_ref[...]

    # embedding LayerNorm
    x = _layer_norm(emb_ref[...], emb_ln_g_ref[...], emb_ln_b_ref[...])   # (B*S, H)

    hiddens = [x]
    for l in range(N_LAYERS):
        # ---- fused QKV projection: one MXU pass, lane-dense (B*S, 3H) ----
        qkv = jnp.dot(x, wqkv_ref[l], preferred_element_type=jnp.float32) + bqkv_ref[l]

        # ---- attention: per-head static lane slices over ALL B*S rows at once ----
        wo = wo_ref[l]
        attn = None
        for h in range(N_HEADS):
            c0 = h * HEAD_DIM
            qh = qkv[:, c0:c0 + HEAD_DIM]                                  # (B*S, D)
            kh = qkv[:, HIDDEN + c0:HIDDEN + c0 + HEAD_DIM]                # (B*S, D)
            vh = qkv[:, 2 * HIDDEN + c0:2 * HIDDEN + c0 + HEAD_DIM]        # (B*S, D)

            s = jax.lax.dot_general(qh, kh, (((1,), (1,)), ((), ())),
                                    preferred_element_type=jnp.float32)    # (B*S, B*S)
            s = s * scale + bias
            m = jnp.max(s, axis=-1, keepdims=True)
            p = jnp.exp(s - m)
            p = p * pl.reciprocal(jnp.sum(p, axis=-1, keepdims=True), approx=True)
            ch = jnp.dot(p, vh, preferred_element_type=jnp.float32)        # (B*S, D)
            # output projection folded per head -> no head concat needed
            part = jnp.dot(ch, wo[c0:c0 + HEAD_DIM, :],
                           preferred_element_type=jnp.float32)             # (B*S, H)
            attn = part if attn is None else attn + part
        attn_out = attn + bo_ref[l]                                        # (B*S, H)

        x = _layer_norm(x + attn_out, ln1_g_ref[l], ln1_b_ref[l])

        # ---- FFN: matmul + bias + gelu + matmul + bias, fused with residual LN ----
        # TODO(synk): HF BERT uses exact erf-gelu; tanh approx kept for robust Mosaic lowering.
        ffn = jnp.dot(x, wf1_ref[l], preferred_element_type=jnp.float32) + bf1_ref[l]
        ffn = jax.nn.gelu(ffn, approximate=True)
        ffn = jnp.dot(ffn, wf2_ref[l], preferred_element_type=jnp.float32) + bf2_ref[l]
        x = _layer_norm(x + ffn, ln2_g_ref[l], ln2_b_ref[l])
        hiddens.append(x)

    # ---- QA head: concat replaced by split-weight matmuls; dropout = identity (eval) ----
    h_last = hiddens[-1]
    h_m3 = hiddens[-3]
    y = (jnp.dot(h_last, w1a_ref[...], preferred_element_type=jnp.float32)
         + jnp.dot(h_m3, w1b_ref[...], preferred_element_type=jnp.float32)
         + b1_ref[...])
    y = jnp.where(y > 0, y, LEAKY_SLOPE * y)               # LeakyReLU
    # lane-dense (B*S, 128) store; wrapper slices the 2 real logit columns
    out_ref[...] = (jnp.dot(y, w2_ref[...], preferred_element_type=jnp.float32)
                    + b2_ref[...])


# ---------------- wrapper (plain JAX: embeddings gather + weight packing) ----------------

def _pack_params(params):
    ls = params["layers"]
    return dict(
        emb_ln_g=params["emb_ln_g"].reshape(1, HIDDEN),
        emb_ln_b=params["emb_ln_b"].reshape(1, HIDDEN),
        wqkv=jnp.stack([jnp.concatenate([p["wq"], p["wk"], p["wv"]], axis=1) for p in ls]),
        bqkv=jnp.stack([jnp.concatenate([p["bq"], p["bk"], p["bv"]]).reshape(1, 3 * HIDDEN)
                        for p in ls]),
        wo=jnp.stack([p["wo"] for p in ls]),
        bo=jnp.stack([p["bo"].reshape(1, HIDDEN) for p in ls]),
        ln1_g=jnp.stack([p["ln1_g"].reshape(1, HIDDEN) for p in ls]),
        ln1_b=jnp.stack([p["ln1_b"].reshape(1, HIDDEN) for p in ls]),
        wf1=jnp.stack([p["w_ffn1"] for p in ls]),
        bf1=jnp.stack([p["b_ffn1"].reshape(1, INTERMEDIATE) for p in ls]),
        wf2=jnp.stack([p["w_ffn2"] for p in ls]),
        bf2=jnp.stack([p["b_ffn2"].reshape(1, HIDDEN) for p in ls]),
        ln2_g=jnp.stack([p["ln2_g"].reshape(1, HIDDEN) for p in ls]),
        ln2_b=jnp.stack([p["ln2_b"].reshape(1, HIDDEN) for p in ls]),
        w1a=params["w1"][:HIDDEN, :],
        w1b=params["w1"][HIDDEN:, :],
        b1=params["b1"].reshape(1, 2 * HIDDEN),
        w2=jnp.zeros((2 * HIDDEN, OUT_PAD), jnp.float32).at[:, :2].set(params["w2"]),
        b2=jnp.zeros((1, OUT_PAD), jnp.float32).at[:, :2].set(params["b2"]),
    )


@jax.jit
def transformer_qa_forward(params, input_ids, attention_mask, token_type_ids):
    B, S = input_ids.shape
    pk = _pack_params(params)

    pos_ids = jnp.arange(S)[None, :]
    emb = (params["word_emb"][input_ids]
           + params["pos_emb"][pos_ids]
           + params["type_emb"][token_type_ids]).reshape(B * S, HIDDEN)   # gather in plain JAX

    # Full (B*S, B*S) additive attention bias built once in the wrapper:
    #   same-example columns get the key-padding mask, cross-example columns get -1e9,
    # so the kernel can run attention over the flattened token axis with no batch loop.
    key_bias = ((1.0 - attention_mask.astype(jnp.float32)) * -10000.0).reshape(1, B * S)
    batch_idx = jnp.repeat(jnp.arange(B), S)
    same_batch = batch_idx[:, None] == batch_idx[None, :]
    full_bias = jnp.where(same_batch, key_bias, CROSS_BATCH_BIAS)         # (B*S, B*S)

    out_pad = pl.pallas_call(
        _fused_forward_kernel,
        out_shape=jax.ShapeDtypeStruct((B * S, OUT_PAD), jnp.float32),
        in_specs=[_vmem()] * 21,
        out_specs=_vmem(),
    )(emb, full_bias,
      pk["emb_ln_g"], pk["emb_ln_b"],
      pk["wqkv"], pk["bqkv"], pk["wo"], pk["bo"],
      pk["ln1_g"], pk["ln1_b"],
      pk["wf1"], pk["bf1"], pk["wf2"], pk["bf2"],
      pk["ln2_g"], pk["ln2_b"],
      pk["w1a"], pk["w1b"], pk["b1"], pk["w2"], pk["b2"])

    logits = out_pad[:, :2].reshape(B, S, 2)
    start_logits = logits[..., 0]    # torch .split(1, dim=-1) + squeeze(-1)
    end_logits = logits[..., 1]
    return start_logits, end_logits


# ---------------- deterministic parameter init ----------------

def init_params(key):
    keys = iter(jax.random.split(key, 64))

    def nrm(shape, scale=0.02):
        return (scale * jax.random.normal(next(keys), shape)).astype(jnp.float32)

    def zeros(*shape):
        return jnp.zeros(shape, jnp.float32)

    def ones(*shape):
        return jnp.ones(shape, jnp.float32)

    params = dict(
        word_emb=nrm((VOCAB, HIDDEN)),
        pos_emb=nrm((MAX_POS, HIDDEN)),
        type_emb=nrm((TYPE_VOCAB, HIDDEN)),
        emb_ln_g=ones(HIDDEN), emb_ln_b=zeros(HIDDEN),
        layers=[],
    )
    for _ in range(N_LAYERS):
        params["layers"].append(dict(
            wq=nrm((HIDDEN, HIDDEN)), bq=zeros(HIDDEN),
            wk=nrm((HIDDEN, HIDDEN)), bk=zeros(HIDDEN),
            wv=nrm((HIDDEN, HIDDEN)), bv=zeros(HIDDEN),
            wo=nrm((HIDDEN, HIDDEN)), bo=zeros(HIDDEN),
            ln1_g=ones(HIDDEN), ln1_b=zeros(HIDDEN),
            w_ffn1=nrm((HIDDEN, INTERMEDIATE)), b_ffn1=zeros(INTERMEDIATE),
            w_ffn2=nrm((INTERMEDIATE, HIDDEN)), b_ffn2=zeros(HIDDEN),
            ln2_g=ones(HIDDEN), ln2_b=zeros(HIDDEN),
        ))
    # QA head: Linear(2H, 2H) + LeakyReLU, Linear(2H, 2)
    params["w1"] = nrm((2 * HIDDEN, 2 * HIDDEN))
    params["b1"] = zeros(2 * HIDDEN)
    params["w2"] = nrm((2 * HIDDEN, 2))
    params["b2"] = zeros(2)
    return params


if __name__ == "__main__":
    key = jax.random.PRNGKey(0)
    pkey, ikey = jax.random.split(key)
    params = init_params(pkey)

    B, S = 2, 8
    input_ids = jax.random.randint(ikey, (B, S), 0, VOCAB, dtype=jnp.int32)
    attention_mask = jnp.ones((B, S), jnp.int32).at[1, 6:].set(0)
    token_type_ids = jnp.concatenate(
        [jnp.zeros((B, S // 2), jnp.int32), jnp.ones((B, S // 2), jnp.int32)], axis=-1)

    start_logits, end_logits = transformer_qa_forward(
        params, input_ids, attention_mask, token_type_ids)
    jax.block_until_ready((start_logits, end_logits))

    assert start_logits.shape == (B, S) and end_logits.shape == (B, S)
    assert start_logits.dtype == jnp.float32 and end_logits.dtype == jnp.float32
    assert bool(jnp.all(jnp.isfinite(start_logits))) and bool(jnp.all(jnp.isfinite(end_logits)))
    print("KERNEL_OK")
</pallas_src>

<mosaic_0001>
module attributes {stable_mosaic.version = 11 : i64} {
  func.func @_fused_forward_kernel(%arg0: memref<16x64xf32, #tpu.memory_space<vmem>>, %arg1: memref<16x16xf32, #tpu.memory_space<vmem>>, %arg2: memref<1x64xf32, #tpu.memory_space<vmem>>, %arg3: memref<1x64xf32, #tpu.memory_space<vmem>>, %arg4: memref<3x64x192xf32, #tpu.memory_space<vmem>>, %arg5: memref<3x1x192xf32, #tpu.memory_space<vmem>>, %arg6: memref<3x64x64xf32, #tpu.memory_space<vmem>>, %arg7: memref<3x1x64xf32, #tpu.memory_space<vmem>>, %arg8: memref<3x1x64xf32, #tpu.memory_space<vmem>>, %arg9: memref<3x1x64xf32, #tpu.memory_space<vmem>>, %arg10: memref<3x64x128xf32, #tpu.memory_space<vmem>>, %arg11: memref<3x1x128xf32, #tpu.memory_space<vmem>>, %arg12: memref<3x128x64xf32, #tpu.memory_space<vmem>>, %arg13: memref<3x1x64xf32, #tpu.memory_space<vmem>>, %arg14: memref<3x1x64xf32, #tpu.memory_space<vmem>>, %arg15: memref<3x1x64xf32, #tpu.memory_space<vmem>>, %arg16: memref<64x128xf32, #tpu.memory_space<vmem>>, %arg17: memref<64x128xf32, #tpu.memory_space<vmem>>, %arg18: memref<1x128xf32, #tpu.memory_space<vmem>>, %arg19: memref<128x128xf32, #tpu.memory_space<vmem>>, %arg20: memref<1x128xf32, #tpu.memory_space<vmem>>, %arg21: memref<16x128xf32, #tpu.memory_space<vmem>>) attributes {dimension_semantics = [], scalar_prefetch = 0 : i64, scratch_operands = 0 : i64, tpu.core_type = #tpu.core_type<tc>} {
    %c0 = arith.constant 0 : index
    %c0_0 = arith.constant 0 : index
    %0 = vector.load %arg1[%c0, %c0_0] : memref<16x16xf32, #tpu.memory_space<vmem>>, vector<16x16xf32>
    %c0_1 = arith.constant 0 : index
    %c0_2 = arith.constant 0 : index
    %1 = vector.load %arg0[%c0_1, %c0_2] : memref<16x64xf32, #tpu.memory_space<vmem>>, vector<16x64xf32>
    %c0_3 = arith.constant 0 : index
    %c0_4 = arith.constant 0 : index
    %2 = vector.load %arg2[%c0_3, %c0_4] : memref<1x64xf32, #tpu.memory_space<vmem>>, vector<1x64xf32>
    %c0_5 = arith.constant 0 : index
    %c0_6 = arith.constant 0 : index
    %3 = vector.load %arg3[%c0_5, %c0_6] : memref<1x64xf32, #tpu.memory_space<vmem>>, vector<1x64xf32>
    %cst = arith.constant dense<0.000000e+00> : vector<16xf32>
    %4 = vector.multi_reduction <add>, %1, %cst [1] : vector<16x64xf32> to vector<16xf32>
    %5 = vector.shape_cast %4 : vector<16xf32> to vector<16x1xf32>
    %cst_7 = arith.constant 6.400000e+01 : f32
    %6 = vector.broadcast %cst_7 : f32 to vector<16x1xf32>
    %7 = arith.divf %5, %6 : vector<16x1xf32>
    %8 = vector.broadcast %7 : vector<16x1xf32> to vector<16x64xf32>
    %9 = arith.subf %1, %8 : vector<16x64xf32>
    %10 = arith.mulf %9, %9 : vector<16x64xf32>
    %cst_8 = arith.constant dense<0.000000e+00> : vector<16xf32>
    %11 = vector.multi_reduction <add>, %10, %cst_8 [1] : vector<16x64xf32> to vector<16xf32>
    %12 = vector.shape_cast %11 : vector<16xf32> to vector<16x1xf32>
    %cst_9 = arith.constant 6.400000e+01 : f32
    %13 = vector.broadcast %cst_9 : f32 to vector<16x1xf32>
    %14 = arith.divf %12, %13 : vector<16x1xf32>
    %15 = vector.broadcast %7 : vector<16x1xf32> to vector<16x64xf32>
    %16 = arith.subf %1, %15 : vector<16x64xf32>
    %cst_10 = arith.constant 9.99999996E-13 : f32
    %17 = vector.broadcast %cst_10 : f32 to vector<16x1xf32>
    %18 = arith.addf %14, %17 : vector<16x1xf32>
    %19 = math.rsqrt %18 : vector<16x1xf32>
    %20 = vector.broadcast %19 : vector<16x1xf32> to vector<16x64xf32>
    %21 = arith.mulf %16, %20 : vector<16x64xf32>
    %22 = vector.broadcast %2 : vector<1x64xf32> to vector<16x64xf32>
    %23 = arith.mulf %21, %22 : vector<16x64xf32>
    %24 = vector.broadcast %3 : vector<1x64xf32> to vector<16x64xf32>
    %25 = arith.addf %23, %24 : vector<16x64xf32>
    %c0_11 = arith.constant 0 : index
    %c0_12 = arith.constant 0 : index
    %c0_13 = arith.constant 0 : index
    %26 = vector.load %arg4[%c0_11, %c0_12, %c0_13] : memref<3x64x192xf32, #tpu.memory_space<vmem>>, vector<1x64x192xf32>
    %27 = vector.shape_cast %26 : vector<1x64x192xf32> to vector<64x192xf32>
    %cst_14 = arith.constant dense<0.000000e+00> : vector<16x192xf32>
    %28 = tpu.matmul %25, %27, %cst_14 {dimension_numbers = #tpu.dot_dimension_numbers<[1], [0], [0], [1], [0, 0, 1, 1], [], []>} : vector<16x64xf32>, vector<64x192xf32>, vector<16x192xf32> -> vector<16x192xf32>
    %c0_15 = arith.constant 0 : index
    %c0_16 = arith.constant 0 : index
    %c0_17 = arith.constant 0 : index
    %29 = vector.load %arg5[%c0_15, %c0_16, %c0_17] : memref<3x1x192xf32, #tpu.memory_space<vmem>>, vector<1x1x192xf32>
    %30 = vector.shape_cast %29 : vector<1x1x192xf32> to vector<1x192xf32>
    %31 = vector.broadcast %30 : vector<1x192xf32> to vector<16x192xf32>
    %32 = arith.addf %28, %31 : vector<16x192xf32>
    %c0_18 = arith.constant 0 : index
    %c0_19 = arith.constant 0 : index
    %c0_20 = arith.constant 0 : index
    %33 = vector.load %arg6[%c0_18, %c0_19, %c0_20] : memref<3x64x64xf32, #tpu.memory_space<vmem>>, vector<1x64x64xf32>
    %34 = vector.shape_cast %33 : vector<1x64x64xf32> to vector<64x64xf32>
    %35 = vector.extract_strided_slice %32 {offsets = [0, 0], sizes = [16, 16], strides = [1, 1]} : vector<16x192xf32> to vector<16x16xf32>
    %36 = vector.extract_strided_slice %32 {offsets = [0, 64], sizes = [16, 16], strides = [1, 1]} : vector<16x192xf32> to vector<16x16xf32>
    %37 = vector.extract_strided_slice %32 {offsets = [0, 128], sizes = [16, 16], strides = [1, 1]} : vector<16x192xf32> to vector<16x16xf32>
    %cst_21 = arith.constant dense<0.000000e+00> : vector<16x16xf32>
    %38 = tpu.matmul %35, %36, %cst_21 {dimension_numbers = #tpu.dot_dimension_numbers<[1], [1], [0], [0], [0, 0, 1, 0], [], []>} : vector<16x16xf32>, vector<16x16xf32>, vector<16x16xf32> -> vector<16x16xf32>
    %cst_22 = arith.constant 2.500000e-01 : f32
    %39 = vector.broadcast %cst_22 : f32 to vector<16x16xf32>
    %40 = arith.mulf %38, %39 : vector<16x16xf32>
    %41 = arith.addf %40, %0 : vector<16x16xf32>
    %cst_23 = arith.constant dense<0xFF800000> : vector<16xf32>
    %42 = vector.multi_reduction <maximumf>, %41, %cst_23 [1] : vector<16x16xf32> to vector<16xf32>
    %43 = vector.shape_cast %42 : vector<16xf32> to vector<16x1xf32>
    %44 = vector.broadcast %43 : vector<16x1xf32> to vector<16x16xf32>
    %45 = arith.subf %41, %44 : vector<16x16xf32>
    %46 = math.exp %45 : vector<16x16xf32>
    %cst_24 = arith.constant dense<0.000000e+00> : vector<16xf32>
    %47 = vector.multi_reduction <add>, %46, %cst_24 [1] : vector<16x16xf32> to vector<16xf32>
    %48 = vector.shape_cast %47 : vector<16xf32> to vector<16x1xf32>
    %49 = tpu.reciprocal %48 {approx = true} : vector<16x1xf32> -> vector<16x1xf32>
    %50 = vector.broadcast %49 : vector<16x1xf32> to vector<16x16xf32>
    %51 = arith.mulf %46, %50 : vector<16x16xf32>
    %cst_25 = arith.constant dense<0.000000e+00> : vector<16x16xf32>
    %52 = tpu.matmul %51, %37, %cst_25 {dimension_numbers = #tpu.dot_dimension_numbers<[1], [0], [0], [1], [0, 0, 1, 1], [], []>} : vector<16x16xf32>, vector<16x16xf32>, vector<16x16xf32> -> vector<16x16xf32>
    %53 = vector.extract_strided_slice %34 {offsets = [0, 0], sizes = [16, 64], strides = [1, 1]} : vector<64x64xf32> to vector<16x64xf32>
    %cst_26 = arith.constant dense<0.000000e+00> : vector<16x64xf32>
    %54 = tpu.matmul %52, %53, %cst_26 {dimension_numbers = #tpu.dot_dimension_numbers<[1], [0], [0], [1], [0, 0, 1, 1], [], []>} : vector<16x16xf32>, vector<16x64xf32>, vector<16x64xf32> -> vector<16x64xf32>
    %55 = vector.extract_strided_slice %32 {offsets = [0, 16], sizes = [16, 16], strides = [1, 1]} : vector<16x192xf32> to vector<16x16xf32>
    %56 = vector.extract_strided_slice %32 {offsets = [0, 80], sizes = [16, 16], strides = [1, 1]} : vector<16x192xf32> to vector<16x16xf32>
    %57 = vector.extract_strided_slice %32 {offsets = [0, 144], sizes = [16, 16], strides = [1, 1]} : vector<16x192xf32> to vector<16x16xf32>
    %cst_27 = arith.constant dense<0.000000e+00> : vector<16x16xf32>
    %58 = tpu.matmul %55, %56, %cst_27 {dimension_numbers = #tpu.dot_dimension_numbers<[1], [1], [0], [0], [0, 0, 1, 0], [], []>} : vector<16x16xf32>, vector<16x16xf32>, vector<16x16xf32> -> vector<16x16xf32>
    %cst_28 = arith.constant 2.500000e-01 : f32
    %59 = vector.broadcast %cst_28 : f32 to vector<16x16xf32>
    %60 = arith.mulf %58, %59 : vector<16x16xf32>
    %61 = arith.addf %60, %0 : vector<16x16xf32>
    %cst_29 = arith.constant dense<0xFF800000> : vector<16xf32>
    %62 = vector.multi_reduction <maximumf>, %61, %cst_29 [1] : vector<16x16xf32> to vector<16xf32>
    %63 = vector.shape_cast %62 : vector<16xf32> to vector<16x1xf32>
    %64 = vector.broadcast %63 : vector<16x1xf32> to vector<16x16xf32>
    %65 = arith.subf %61, %64 : vector<16x16xf32>
    %66 = math.exp %65 : vector<16x16xf32>
    %cst_30 = arith.constant dense<0.000000e+00> : vector<16xf32>
    %67 = vector.multi_reduction <add>, %66, %cst_30 [1] : vector<16x16xf32> to vector<16xf32>
    %68 = vector.shape_cast %67 : vector<16xf32> to vector<16x1xf32>
    %69 = tpu.reciprocal %68 {approx = true} : vector<16x1xf32> -> vector<16x1xf32>
    %70 = vector.broadcast %69 : vector<16x1xf32> to vector<16x16xf32>
    %71 = arith.mulf %66, %70 : vector<16x16xf32>
    %cst_31 = arith.constant dense<0.000000e+00> : vector<16x16xf32>
    %72 = tpu.matmul %71, %57, %cst_31 {dimension_numbers = #tpu.dot_dimension_numbers<[1], [0], [0], [1], [0, 0, 1, 1], [], []>} : vector<16x16xf32>, vector<16x16xf32>, vector<16x16xf32> -> vector<16x16xf32>
    %73 = vector.extract_strided_slice %34 {offsets = [16, 0], sizes = [16, 64], strides = [1, 1]} : vector<64x64xf32> to vector<16x64xf32>
    %cst_32 = arith.constant dense<0.000000e+00> : vector<16x64xf32>
    %74 = tpu.matmul %72, %73, %cst_32 {dimension_numbers = #tpu.dot_dimension_numbers<[1], [0], [0], [1], [0, 0, 1, 1], [], []>} : vector<16x16xf32>, vector<16x64xf32>, vector<16x64xf32> -> vector<16x64xf32>
    %75 = arith.addf %54, %74 : vector<16x64xf32>
    %76 = vector.extract_strided_slice %32 {offsets = [0, 32], sizes = [16, 16], strides = [1, 1]} : vector<16x192xf32> to vector<16x16xf32>
    %77 = vector.extract_strided_slice %32 {offsets = [0, 96], sizes = [16, 16], strides = [1, 1]} : vector<16x192xf32> to vector<16x16xf32>
    %78 = vector.extract_strided_slice %32 {offsets = [0, 160], sizes = [16, 16], strides = [1, 1]} : vector<16x192xf32> to vector<16x16xf32>
    %cst_33 = arith.constant dense<0.000000e+00> : vector<16x16xf32>
    %79 = tpu.matmul %76, %77, %cst_33 {dimension_numbers = #tpu.dot_dimension_numbers<[1], [1], [0], [0], [0, 0, 1, 0], [], []>} : vector<16x16xf32>, vector<16x16xf32>, vector<16x16xf32> -> vector<16x16xf32>
    %cst_34 = arith.constant 2.500000e-01 : f32
    %80 = vector.broadcast %cst_34 : f32 to vector<16x16xf32>
    %81 = arith.mulf %79, %80 : vector<16x16xf32>
    %82 = arith.addf %81, %0 : vector<16x16xf32>
    %cst_35 = arith.constant dense<0xFF800000> : vector<16xf32>
    %83 = vector.multi_reduction <maximumf>, %82, %cst_35 [1] : vector<16x16xf32> to vector<16xf32>
    %84 = vector.shape_cast %83 : vector<16xf32> to vector<16x1xf32>
    %85 = vector.broadcast %84 : vector<16x1xf32> to vector<16x16xf32>
    %86 = arith.subf %82, %85 : vector<16x16xf32>
    %87 = math.exp %86 : vector<16x16xf32>
    %cst_36 = arith.constant dense<0.000000e+00> : vector<16xf32>
    %88 = vector.multi_reduction <add>, %87, %cst_36 [1] : vector<16x16xf32> to vector<16xf32>
    %89 = vector.shape_cast %88 : vector<16xf32> to vector<16x1xf32>
    %90 = tpu.reciprocal %89 {approx = true} : vector<16x1xf32> -> vector<16x1xf32>
    %91 = vector.broadcast %90 : vector<16x1xf32> to vector<16x16xf32>
    %92 = arith.mulf %87, %91 : vector<16x16xf32>
    %cst_37 = arith.constant dense<0.000000e+00> : vector<16x16xf32>
    %93 = tpu.matmul %92, %78, %cst_37 {dimension_numbers = #tpu.dot_dimension_numbers<[1], [0], [0], [1], [0, 0, 1, 1], [], []>} : vector<16x16xf32>, vector<16x16xf32>, vector<16x16xf32> -> vector<16x16xf32>
    %94 = vector.extract_strided_slice %34 {offsets = [32, 0], sizes = [16, 64], strides = [1, 1]} : vector<64x64xf32> to vector<16x64xf32>
    %cst_38 = arith.constant dense<0.000000e+00> : vector<16x64xf32>
    %95 = tpu.matmul %93, %94, %cst_38 {dimension_numbers = #tpu.dot_dimension_numbers<[1], [0], [0], [1], [0, 0, 1, 1], [], []>} : vector<16x16xf32>, vector<16x64xf32>, vector<16x64xf32> -> vector<16x64xf32>
    %96 = arith.addf %75, %95 : vector<16x64xf32>
    %97 = vector.extract_strided_slice %32 {offsets = [0, 48], sizes = [16, 16], strides = [1, 1]} : vector<16x192xf32> to vector<16x16xf32>
    %98 = vector.extract_strided_slice %32 {offsets = [0, 112], sizes = [16, 16], strides = [1, 1]} : vector<16x192xf32> to vector<16x16xf32>
    %99 = vector.extract_strided_slice %32 {offsets = [0, 176], sizes = [16, 16], strides = [1, 1]} : vector<16x192xf32> to vector<16x16xf32>
    %cst_39 = arith.constant dense<0.000000e+00> : vector<16x16xf32>
    %100 = tpu.matmul %97, %98, %cst_39 {dimension_numbers = #tpu.dot_dimension_numbers<[1], [1], [0], [0], [0, 0, 1, 0], [], []>} : vector<16x16xf32>, vector<16x16xf32>, vector<16x16xf32> -> vector<16x16xf32>
    %cst_40 = arith.constant 2.500000e-01 : f32
    %101 = vector.broadcast %cst_40 : f32 to vector<16x16xf32>
    %102 = arith.mulf %100, %101 : vector<16x16xf32>
    %103 = arith.addf %102, %0 : vector<16x16xf32>
    %cst_41 = arith.constant dense<0xFF800000> : vector<16xf32>
    %104 = vector.multi_reduction <maximumf>, %103, %cst_41 [1] : vector<16x16xf32> to vector<16xf32>
    %105 = vector.shape_cast %104 : vector<16xf32> to vector<16x1xf32>
    %106 = vector.broadcast %105 : vector<16x1xf32> to vector<16x16xf32>
    %107 = arith.subf %103, %106 : vector<16x16xf32>
    %108 = math.exp %107 : vector<16x16xf32>
    %cst_42 = arith.constant dense<0.000000e+00> : vector<16xf32>
    %109 = vector.multi_reduction <add>, %108, %cst_42 [1] : vector<16x16xf32> to vector<16xf32>
    %110 = vector.shape_cast %109 : vector<16xf32> to vector<16x1xf32>
    %111 = tpu.reciprocal %110 {approx = true} : vector<16x1xf32> -> vector<16x1xf32>
    %112 = vector.broadcast %111 : vector<16x1xf32> to vector<16x16xf32>
    %113 = arith.mulf %108, %112 : vector<16x16xf32>
    %cst_43 = arith.constant dense<0.000000e+00> : vector<16x16xf32>
    %114 = tpu.matmul %113, %99, %cst_43 {dimension_numbers = #tpu.dot_dimension_numbers<[1], [0], [0], [1], [0, 0, 1, 1], [], []>} : vector<16x16xf32>, vector<16x16xf32>, vector<16x16xf32> -> vector<16x16xf32>
    %115 = vector.extract_strided_slice %34 {offsets = [48, 0], sizes = [16, 64], strides = [1, 1]} : vector<64x64xf32> to vector<16x64xf32>
    %cst_44 = arith.constant dense<0.000000e+00> : vector<16x64xf32>
    %116 = tpu.matmul %114, %115, %cst_44 {dimension_numbers = #tpu.dot_dimension_numbers<[1], [0], [0], [1], [0, 0, 1, 1], [], []>} : vector<16x16xf32>, vector<16x64xf32>, vector<16x64xf32> -> vector<16x64xf32>
    %117 = arith.addf %96, %116 : vector<16x64xf32>
    %c0_45 = arith.constant 0 : index
    %c0_46 = arith.constant 0 : index
    %c0_47 = arith.constant 0 : index
    %118 = vector.load %arg7[%c0_45, %c0_46, %c0_47] : memref<3x1x64xf32, #tpu.memory_space<vmem>>, vector<1x1x64xf32>
    %119 = vector.shape_cast %118 : vector<1x1x64xf32> to vector<1x64xf32>
    %120 = vector.broadcast %119 : vector<1x64xf32> to vector<16x64xf32>
    %121 = arith.addf %117, %120 : vector<16x64xf32>
    %122 = arith.addf %25, %121 : vector<16x64xf32>
    %c0_48 = arith.constant 0 : index
    %c0_49 = arith.constant 0 : index
    %c0_50 = arith.constant 0 : index
    %123 = vector.load %arg8[%c0_48, %c0_49, %c0_50] : memref<3x1x64xf32, #tpu.memory_space<vmem>>, vector<1x1x64xf32>
    %124 = vector.shape_cast %123 : vector<1x1x64xf32> to vector<1x64xf32>
    %c0_51 = arith.constant 0 : index
    %c0_52 = arith.constant 0 : index
    %c0_53 = arith.constant 0 : index
    %125 = vector.load %arg9[%c0_51, %c0_52, %c0_53] : memref<3x1x64xf32, #tpu.memory_space<vmem>>, vector<1x1x64xf32>
    %126 = vector.shape_cast %125 : vector<1x1x64xf32> to vector<1x64xf32>
    %cst_54 = arith.constant dense<0.000000e+00> : vector<16xf32>
    %127 = vector.multi_reduction <add>, %122, %cst_54 [1] : vector<16x64xf32> to vector<16xf32>
    %128 = vector.shape_cast %127 : vector<16xf32> to vector<16x1xf32>
    %cst_55 = arith.constant 6.400000e+01 : f32
    %129 = vector.broadcast %cst_55 : f32 to vector<16x1xf32>
    %130 = arith.divf %128, %129 : vector<16x1xf32>
    %131 = vector.broadcast %130 : vector<16x1xf32> to vector<16x64xf32>
    %132 = arith.subf %122, %131 : vector<16x64xf32>
    %133 = arith.mulf %132, %132 : vector<16x64xf32>
    %cst_56 = arith.constant dense<0.000000e+00> : vector<16xf32>
    %134 = vector.multi_reduction <add>, %133, %cst_56 [1] : vector<16x64xf32> to vector<16xf32>
    %135 = vector.shape_cast %134 : vector<16xf32> to vector<16x1xf32>
    %cst_57 = arith.constant 6.400000e+01 : f32
    %136 = vector.broadcast %cst_57 : f32 to vector<16x1xf32>
    %137 = arith.divf %135, %136 : vector<16x1xf32>
    %138 = vector.broadcast %130 : vector<16x1xf32> to vector<16x64xf32>
    %139 = arith.subf %122, %138 : vector<16x64xf32>
    %cst_58 = arith.constant 9.99999996E-13 : f32
    %140 = vector.broadcast %cst_58 : f32 to vector<16x1xf32>
    %141 = arith.addf %137, %140 : vector<16x1xf32>
    %142 = math.rsqrt %141 : vector<16x1xf32>
    %143 = vector.broadcast %142 : vector<16x1xf32> to vector<16x64xf32>
    %144 = arith.mulf %139, %143 : vector<16x64xf32>
    %145 = vector.broadcast %124 : vector<1x64xf32> to vector<16x64xf32>
    %146 = arith.mulf %144, %145 : vector<16x64xf32>
    %147 = vector.broadcast %126 : vector<1x64xf32> to vector<16x64xf32>
    %148 = arith.addf %146, %147 : vector<16x64xf32>
    %c0_59 = arith.constant 0 : index
    %c0_60 = arith.constant 0 : index
    %c0_61 = arith.constant 0 : index
    %149 = vector.load %arg10[%c0_59, %c0_60, %c0_61] : memref<3x64x128xf32, #tpu.memory_space<vmem>>, vector<1x64x128xf32>
    %150 = vector.shape_cast %149 : vector<1x64x128xf32> to vector<64x128xf32>
    %cst_62 = arith.constant dense<0.000000e+00> : vector<16x128xf32>
    %151 = tpu.matmul %148, %150, %cst_62 {dimension_numbers = #tpu.dot_dimension_numbers<[1], [0], [0], [1], [0, 0, 1, 1], [], []>} : vector<16x64xf32>, vector<64x128xf32>, vector<16x128xf32> -> vector<16x128xf32>
    %c0_63 = arith.constant 0 : index
    %c0_64 = arith.constant 0 : index
    %c0_65 = arith.constant 0 : index
    %152 = vector.load %arg11[%c0_63, %c0_64, %c0_65] : memref<3x1x128xf32, #tpu.memory_space<vmem>>, vector<1x1x128xf32>
    %153 = vector.shape_cast %152 : vector<1x1x128xf32> to vector<1x128xf32>
    %154 = vector.broadcast %153 : vector<1x128xf32> to vector<16x128xf32>
    %155 = arith.addf %151, %154 : vector<16x128xf32>
    %156 = arith.mulf %155, %155 : vector<16x128xf32>
    %157 = arith.mulf %155, %156 : vector<16x128xf32>
    %cst_66 = arith.constant 4.471500e-02 : f32
    %158 = vector.broadcast %cst_66 : f32 to vector<16x128xf32>
    %159 = arith.mulf %158, %157 : vector<16x128xf32>
    %160 = arith.addf %155, %159 : vector<16x128xf32>
    %cst_67 = arith.constant 0.797884583 : f32
    %161 = vector.broadcast %cst_67 : f32 to vector<16x128xf32>
    %162 = arith.mulf %161, %160 : vector<16x128xf32>
    %163 = math.tanh %162 : vector<16x128xf32>
    %cst_68 = arith.constant 1.000000e+00 : f32
    %164 = vector.broadcast %cst_68 : f32 to vector<16x128xf32>
    %165 = arith.addf %164, %163 : vector<16x128xf32>
    %cst_69 = arith.constant 5.000000e-01 : f32
    %166 = vector.broadcast %cst_69 : f32 to vector<16x128xf32>
    %167 = arith.mulf %166, %165 : vector<16x128xf32>
    %168 = arith.mulf %155, %167 : vector<16x128xf32>
    %c0_70 = arith.constant 0 : index
    %c0_71 = arith.constant 0 : index
    %c0_72 = arith.constant 0 : index
    %169 = vector.load %arg12[%c0_70, %c0_71, %c0_72] : memref<3x128x64xf32, #tpu.memory_space<vmem>>, vector<1x128x64xf32>
    %170 = vector.shape_cast %169 : vector<1x128x64xf32> to vector<128x64xf32>
    %cst_73 = arith.constant dense<0.000000e+00> : vector<16x64xf32>
    %171 = tpu.matmul %168, %170, %cst_73 {dimension_numbers = #tpu.dot_dimension_numbers<[1], [0], [0], [1], [0, 0, 1, 1], [], []>} : vector<16x128xf32>, vector<128x64xf32>, vector<16x64xf32> -> vector<16x64xf32>
    %c0_74 = arith.constant 0 : index
    %c0_75 = arith.constant 0 : index
    %c0_76 = arith.constant 0 : index
    %172 = vector.load %arg13[%c0_74, %c0_75, %c0_76] : memref<3x1x64xf32, #tpu.memory_space<vmem>>, vector<1x1x64xf32>
    %173 = vector.shape_cast %172 : vector<1x1x64xf32> to vector<1x64xf32>
    %174 = vector.broadcast %173 : vector<1x64xf32> to vector<16x64xf32>
    %175 = arith.addf %171, %174 : vector<16x64xf32>
    %176 = arith.addf %148, %175 : vector<16x64xf32>
    %c0_77 = arith.constant 0 : index
    %c0_78 = arith.constant 0 : index
    %c0_79 = arith.constant 0 : index
    %177 = vector.load %arg14[%c0_77, %c0_78, %c0_79] : memref<3x1x64xf32, #tpu.memory_space<vmem>>, vector<1x1x64xf32>
    %178 = vector.shape_cast %177 : vector<1x1x64xf32> to vector<1x64xf32>
    %c0_80 = arith.constant 0 : index
    %c0_81 = arith.constant 0 : index
    %c0_82 = arith.constant 0 : index
    %179 = vector.load %arg15[%c0_80, %c0_81, %c0_82] : memref<3x1x64xf32, #tpu.memory_space<vmem>>, vector<1x1x64xf32>
    %180 = vector.shape_cast %179 : vector<1x1x64xf32> to vector<1x64xf32>
    %cst_83 = arith.constant dense<0.000000e+00> : vector<16xf32>
    %181 = vector.multi_reduction <add>, %176, %cst_83 [1] : vector<16x64xf32> to vector<16xf32>
    %182 = vector.shape_cast %181 : vector<16xf32> to vector<16x1xf32>
    %cst_84 = arith.constant 6.400000e+01 : f32
    %183 = vector.broadcast %cst_84 : f32 to vector<16x1xf32>
    %184 = arith.divf %182, %183 : vector<16x1xf32>
    %185 = vector.broadcast %184 : vector<16x1xf32> to vector<16x64xf32>
    %186 = arith.subf %176, %185 : vector<16x64xf32>
    %187 = arith.mulf %186, %186 : vector<16x64xf32>
    %cst_85 = arith.constant dense<0.000000e+00> : vector<16xf32>
    %188 = vector.multi_reduction <add>, %187, %cst_85 [1] : vector<16x64xf32> to vector<16xf32>
    %189 = vector.shape_cast %188 : vector<16xf32> to vector<16x1xf32>
    %cst_86 = arith.constant 6.400000e+01 : f32
    %190 = vector.broadcast %cst_86 : f32 to vector<16x1xf32>
    %191 = arith.divf %189, %190 : vector<16x1xf32>
    %192 = vector.broadcast %184 : vector<16x1xf32> to vector<16x64xf32>
    %193 = arith.subf %176, %192 : vector<16x64xf32>
    %cst_87 = arith.constant 9.99999996E-13 : f32
    %194 = vector.broadcast %cst_87 : f32 to vector<16x1xf32>
    %195 = arith.addf %191, %194 : vector<16x1xf32>
    %196 = math.rsqrt %195 : vector<16x1xf32>
    %197 = vector.broadcast %196 : vector<16x1xf32> to vector<16x64xf32>
    %198 = arith.mulf %193, %197 : vector<16x64xf32>
    %199 = vector.broadcast %178 : vector<1x64xf32> to vector<16x64xf32>
    %200 = arith.mulf %198, %199 : vector<16x64xf32>
    %201 = vector.broadcast %180 : vector<1x64xf32> to vector<16x64xf32>
    %202 = arith.addf %200, %201 : vector<16x64xf32>
    %c1 = arith.constant 1 : index
    %c0_88 = arith.constant 0 : index
    %c0_89 = arith.constant 0 : index
    %203 = vector.load %arg4[%c1, %c0_88, %c0_89] : memref<3x64x192xf32, #tpu.memory_space<vmem>>, vector<1x64x192xf32>
    %204 = vector.shape_cast %203 : vector<1x64x192xf32> to vector<64x192xf32>
    %cst_90 = arith.constant dense<0.000000e+00> : vector<16x192xf32>
    %205 = tpu.matmul %202, %204, %cst_90 {dimension_numbers = #tpu.dot_dimension_numbers<[1], [0], [0], [1], [0, 0, 1, 1], [], []>} : vector<16x64xf32>, vector<64x192xf32>, vector<16x192xf32> -> vector<16x192xf32>
    %c1_91 = arith.constant 1 : index
    %c0_92 = arith.constant 0 : index
    %c0_93 = arith.constant 0 : index
    %206 = vector.load %arg5[%c1_91, %c0_92, %c0_93] : memref<3x1x192xf32, #tpu.memory_space<vmem>>, vector<1x1x192xf32>
    %207 = vector.shape_cast %206 : vector<1x1x192xf32> to vector<1x192xf32>
    %208 = vector.broadcast %207 : vector<1x192xf32> to vector<16x192xf32>
    %209 = arith.addf %205, %208 : vector<16x192xf32>
    %c1_94 = arith.constant 1 : index
    %c0_95 = arith.constant 0 : index
    %c0_96 = arith.constant 0 : index
    %210 = vector.load %arg6[%c1_94, %c0_95, %c0_96] : memref<3x64x64xf32, #tpu.memory_space<vmem>>, vector<1x64x64xf32>
    %211 = vector.shape_cast %210 : vector<1x64x64xf32> to vector<64x64xf32>
    %212 = vector.extract_strided_slice %209 {offsets = [0, 0], sizes = [16, 16], strides = [1, 1]} : vector<16x192xf32> to vector<16x16xf32>
    %213 = vector.extract_strided_slice %209 {offsets = [0, 64], sizes = [16, 16], strides = [1, 1]} : vector<16x192xf32> to vector<16x16xf32>
    %214 = vector.extract_strided_slice %209 {offsets = [0, 128], sizes = [16, 16], strides = [1, 1]} : vector<16x192xf32> to vector<16x16xf32>
    %cst_97 = arith.constant dense<0.000000e+00> : vector<16x16xf32>
    %215 = tpu.matmul %212, %213, %cst_97 {dimension_numbers = #tpu.dot_dimension_numbers<[1], [1], [0], [0], [0, 0, 1, 0], [], []>} : vector<16x16xf32>, vector<16x16xf32>, vector<16x16xf32> -> vector<16x16xf32>
    %cst_98 = arith.constant 2.500000e-01 : f32
    %216 = vector.broadcast %cst_98 : f32 to vector<16x16xf32>
    %217 = arith.mulf %215, %216 : vector<16x16xf32>
    %218 = arith.addf %217, %0 : vector<16x16xf32>
    %cst_99 = arith.constant dense<0xFF800000> : vector<16xf32>
    %219 = vector.multi_reduction <maximumf>, %218, %cst_99 [1] : vector<16x16xf32> to vector<16xf32>
    %220 = vector.shape_cast %219 : vector<16xf32> to vector<16x1xf32>
    %221 = vector.broadcast %220 : vector<16x1xf32> to vector<16x16xf32>
    %222 = arith.subf %218, %221 : vector<16x16xf32>
    %223 = math.exp %222 : vector<16x16xf32>
    %cst_100 = arith.constant dense<0.000000e+00> : vector<16xf32>
    %224 = vector.multi_reduction <add>, %223, %cst_100 [1] : vector<16x16xf32> to vector<16xf32>
    %225 = vector.shape_cast %224 : vector<16xf32> to vector<16x1xf32>
    %226 = tpu.reciprocal %225 {approx = true} : vector<16x1xf32> -> vector<16x1xf32>
    %227 = vector.broadcast %226 : vector<16x1xf32> to vector<16x16xf32>
    %228 = arith.mulf %223, %227 : vector<16x16xf32>
    %cst_101 = arith.constant dense<0.000000e+00> : vector<16x16xf32>
    %229 = tpu.matmul %228, %214, %cst_101 {dimension_numbers = #tpu.dot_dimension_numbers<[1], [0], [0], [1], [0, 0, 1, 1], [], []>} : vector<16x16xf32>, vector<16x16xf32>, vector<16x16xf32> -> vector<16x16xf32>
    %230 = vector.extract_strided_slice %211 {offsets = [0, 0], sizes = [16, 64], strides = [1, 1]} : vector<64x64xf32> to vector<16x64xf32>
    %cst_102 = arith.constant dense<0.000000e+00> : vector<16x64xf32>
    %231 = tpu.matmul %229, %230, %cst_102 {dimension_numbers = #tpu.dot_dimension_numbers<[1], [0], [0], [1], [0, 0, 1, 1], [], []>} : vector<16x16xf32>, vector<16x64xf32>, vector<16x64xf32> -> vector<16x64xf32>
    %232 = vector.extract_strided_slice %209 {offsets = [0, 16], sizes = [16, 16], strides = [1, 1]} : vector<16x192xf32> to vector<16x16xf32>
    %233 = vector.extract_strided_slice %209 {offsets = [0, 80], sizes = [16, 16], strides = [1, 1]} : vector<16x192xf32> to vector<16x16xf32>
    %234 = vector.extract_strided_slice %209 {offsets = [0, 144], sizes = [16, 16], strides = [1, 1]} : vector<16x192xf32> to vector<16x16xf32>
    %cst_103 = arith.constant dense<0.000000e+00> : vector<16x16xf32>
    %235 = tpu.matmul %232, %233, %cst_103 {dimension_numbers = #tpu.dot_dimension_numbers<[1], [1], [0], [0], [0, 0, 1, 0], [], []>} : vector<16x16xf32>, vector<16x16xf32>, vector<16x16xf32> -> vector<16x16xf32>
    %cst_104 = arith.constant 2.500000e-01 : f32
    %236 = vector.broadcast %cst_104 : f32 to vector<16x16xf32>
    %237 = arith.mulf %235, %236 : vector<16x16xf32>
    %238 = arith.addf %237, %0 : vector<16x16xf32>
    %cst_105 = arith.constant dense<0xFF800000> : vector<16xf32>
    %239 = vector.multi_reduction <maximumf>, %238, %cst_105 [1] : vector<16x16xf32> to vector<16xf32>
    %240 = vector.shape_cast %239 : vector<16xf32> to vector<16x1xf32>
    %241 = vector.broadcast %240 : vector<16x1xf32> to vector<16x16xf32>
    %242 = arith.subf %238, %241 : vector<16x16xf32>
    %243 = math.exp %242 : vector<16x16xf32>
    %cst_106 = arith.constant dense<0.000000e+00> : vector<16xf32>
    %244 = vector.multi_reduction <add>, %243, %cst_106 [1] : vector<16x16xf32> to vector<16xf32>
    %245 = vector.shape_cast %244 : vector<16xf32> to vector<16x1xf32>
    %246 = tpu.reciprocal %245 {approx = true} : vector<16x1xf32> -> vector<16x1xf32>
    %247 = vector.broadcast %246 : vector<16x1xf32> to vector<16x16xf32>
    %248 = arith.mulf %243, %247 : vector<16x16xf32>
    %cst_107 = arith.constant dense<0.000000e+00> : vector<16x16xf32>
    %249 = tpu.matmul %248, %234, %cst_107 {dimension_numbers = #tpu.dot_dimension_numbers<[1], [0], [0], [1], [0, 0, 1, 1], [], []>} : vector<16x16xf32>, vector<16x16xf32>, vector<16x16xf32> -> vector<16x16xf32>
    %250 = vector.extract_strided_slice %211 {offsets = [16, 0], sizes = [16, 64], strides = [1, 1]} : vector<64x64xf32> to vector<16x64xf32>
    %cst_108 = arith.constant dense<0.000000e+00> : vector<16x64xf32>
    %251 = tpu.matmul %249, %250, %cst_108 {dimension_numbers = #tpu.dot_dimension_numbers<[1], [0], [0], [1], [0, 0, 1, 1], [], []>} : vector<16x16xf32>, vector<16x64xf32>, vector<16x64xf32> -> vector<16x64xf32>
    %252 = arith.addf %231, %251 : vector<16x64xf32>
    %253 = vector.extract_strided_slice %209 {offsets = [0, 32], sizes = [16, 16], strides = [1, 1]} : vector<16x192xf32> to vector<16x16xf32>
    %254 = vector.extract_strided_slice %209 {offsets = [0, 96], sizes = [16, 16], strides = [1, 1]} : vector<16x192xf32> to vector<16x16xf32>
    %255 = vector.extract_strided_slice %209 {offsets = [0, 160], sizes = [16, 16], strides = [1, 1]} : vector<16x192xf32> to vector<16x16xf32>
    %cst_109 = arith.constant dense<0.000000e+00> : vector<16x16xf32>
    %256 = tpu.matmul %253, %254, %cst_109 {dimension_numbers = #tpu.dot_dimension_numbers<[1], [1], [0], [0], [0, 0, 1, 0], [], []>} : vector<16x16xf32>, vector<16x16xf32>, vector<16x16xf32> -> vector<16x16xf32>
    %cst_110 = arith.constant 2.500000e-01 : f32
    %257 = vector.broadcast %cst_110 : f32 to vector<16x16xf32>
    %258 = arith.mulf %256, %257 : vector<16x16xf32>
    %259 = arith.addf %258, %0 : vector<16x16xf32>
    %cst_111 = arith.constant dense<0xFF800000> : vector<16xf32>
    %260 = vector.multi_reduction <maximumf>, %259, %cst_111 [1] : vector<16x16xf32> to vector<16xf32>
    %261 = vector.shape_cast %260 : vector<16xf32> to vector<16x1xf32>
    %262 = vector.broadcast %261 : vector<16x1xf32> to vector<16x16xf32>
    %263 = arith.subf %259, %262 : vector<16x16xf32>
    %264 = math.exp %263 : vector<16x16xf32>
    %cst_112 = arith.constant dense<0.000000e+00> : vector<16xf32>
    %265 = vector.multi_reduction <add>, %264, %cst_112 [1] : vector<16x16xf32> to vector<16xf32>
    %266 = vector.shape_cast %265 : vector<16xf32> to vector<16x1xf32>
    %267 = tpu.reciprocal %266 {approx = true} : vector<16x1xf32> -> vector<16x1xf32>
    %268 = vector.broadcast %267 : vector<16x1xf32> to vector<16x16xf32>
    %269 = arith.mulf %264, %268 : vector<16x16xf32>
    %cst_113 = arith.constant dense<0.000000e+00> : vector<16x16xf32>
    %270 = tpu.matmul %269, %255, %cst_113 {dimension_numbers = #tpu.dot_dimension_numbers<[1], [0], [0], [1], [0, 0, 1, 1], [], []>} : vector<16x16xf32>, vector<16x16xf32>, vector<16x16xf32> -> vector<16x16xf32>
    %271 = vector.extract_strided_slice %211 {offsets = [32, 0], sizes = [16, 64], strides = [1, 1]} : vector<64x64xf32> to vector<16x64xf32>
    %cst_114 = arith.constant dense<0.000000e+00> : vector<16x64xf32>
    %272 = tpu.matmul %270, %271, %cst_114 {dimension_numbers = #tpu.dot_dimension_numbers<[1], [0], [0], [1], [0, 0, 1, 1], [], []>} : vector<16x16xf32>, vector<16x64xf32>, vector<16x64xf32> -> vector<16x64xf32>
    %273 = arith.addf %252, %272 : vector<16x64xf32>
    %274 = vector.extract_strided_slice %209 {offsets = [0, 48], sizes = [16, 16], strides = [1, 1]} : vector<16x192xf32> to vector<16x16xf32>
    %275 = vector.extract_strided_slice %209 {offsets = [0, 112], sizes = [16, 16], strides = [1, 1]} : vector<16x192xf32> to vector<16x16xf32>
    %276 = vector.extract_strided_slice %209 {offsets = [0, 176], sizes = [16, 16], strides = [1, 1]} : vector<16x192xf32> to vector<16x16xf32>
    %cst_115 = arith.constant dense<0.000000e+00> : vector<16x16xf32>
    %277 = tpu.matmul %274, %275, %cst_115 {dimension_numbers = #tpu.dot_dimension_numbers<[1], [1], [0], [0], [0, 0, 1, 0], [], []>} : vector<16x16xf32>, vector<16x16xf32>, vector<16x16xf32> -> vector<16x16xf32>
    %cst_116 = arith.constant 2.500000e-01 : f32
    %278 = vector.broadcast %cst_116 : f32 to vector<16x16xf32>
    %279 = arith.mulf %277, %278 : vector<16x16xf32>
    %280 = arith.addf %279, %0 : vector<16x16xf32>
    %cst_117 = arith.constant dense<0xFF800000> : vector<16xf32>
    %281 = vector.multi_reduction <maximumf>, %280, %cst_117 [1] : vector<16x16xf32> to vector<16xf32>
    %282 = vector.shape_cast %281 : vector<16xf32> to vector<16x1xf32>
    %283 = vector.broadcast %282 : vector<16x1xf32> to vector<16x16xf32>
    %284 = arith.subf %280, %283 : vector<16x16xf32>
    %285 = math.exp %284 : vector<16x16xf32>
    %cst_118 = arith.constant dense<0.000000e+00> : vector<16xf32>
    %286 = vector.multi_reduction <add>, %285, %cst_118 [1] : vector<16x16xf32> to vector<16xf32>
    %287 = vector.shape_cast %286 : vector<16xf32> to vector<16x1xf32>
    %288 = tpu.reciprocal %287 {approx = true} : vector<16x1xf32> -> vector<16x1xf32>
    %289 = vector.broadcast %288 : vector<16x1xf32> to vector<16x16xf32>
    %290 = arith.mulf %285, %289 : vector<16x16xf32>
    %cst_119 = arith.constant dense<0.000000e+00> : vector<16x16xf32>
    %291 = tpu.matmul %290, %276, %cst_119 {dimension_numbers = #tpu.dot_dimension_numbers<[1], [0], [0], [1], [0, 0, 1, 1], [], []>} : vector<16x16xf32>, vector<16x16xf32>, vector<16x16xf32> -> vector<16x16xf32>
    %292 = vector.extract_strided_slice %211 {offsets = [48, 0], sizes = [16, 64], strides = [1, 1]} : vector<64x64xf32> to vector<16x64xf32>
    %cst_120 = arith.constant dense<0.000000e+00> : vector<16x64xf32>
    %293 = tpu.matmul %291, %292, %cst_120 {dimension_numbers = #tpu.dot_dimension_numbers<[1], [0], [0], [1], [0, 0, 1, 1], [], []>} : vector<16x16xf32>, vector<16x64xf32>, vector<16x64xf32> -> vector<16x64xf32>
    %294 = arith.addf %273, %293 : vector<16x64xf32>
    %c1_121 = arith.constant 1 : index
    %c0_122 = arith.constant 0 : index
    %c0_123 = arith.constant 0 : index
    %295 = vector.load %arg7[%c1_121, %c0_122, %c0_123] : memref<3x1x64xf32, #tpu.memory_space<vmem>>, vector<1x1x64xf32>
    %296 = vector.shape_cast %295 : vector<1x1x64xf32> to vector<1x64xf32>
    %297 = vector.broadcast %296 : vector<1x64xf32> to vector<16x64xf32>
    %298 = arith.addf %294, %297 : vector<16x64xf32>
    %299 = arith.addf %202, %298 : vector<16x64xf32>
    %c1_124 = arith.constant 1 : index
    %c0_125 = arith.constant 0 : index
    %c0_126 = arith.constant 0 : index
    %300 = vector.load %arg8[%c1_124, %c0_125, %c0_126] : memref<3x1x64xf32, #tpu.memory_space<vmem>>, vector<1x1x64xf32>
    %301 = vector.shape_cast %300 : vector<1x1x64xf32> to vector<1x64xf32>
    %c1_127 = arith.constant 1 : index
    %c0_128 = arith.constant 0 : index
    %c0_129 = arith.constant 0 : index
    %302 = vector.load %arg9[%c1_127, %c0_128, %c0_129] : memref<3x1x64xf32, #tpu.memory_space<vmem>>, vector<1x1x64xf32>
    %303 = vector.shape_cast %302 : vector<1x1x64xf32> to vector<1x64xf32>
    %cst_130 = arith.constant dense<0.000000e+00> : vector<16xf32>
    %304 = vector.multi_reduction <add>, %299, %cst_130 [1] : vector<16x64xf32> to vector<16xf32>
    %305 = vector.shape_cast %304 : vector<16xf32> to vector<16x1xf32>
    %cst_131 = arith.constant 6.400000e+01 : f32
    %306 = vector.broadcast %cst_131 : f32 to vector<16x1xf32>
    %307 = arith.divf %305, %306 : vector<16x1xf32>
    %308 = vector.broadcast %307 : vector<16x1xf32> to vector<16x64xf32>
    %309 = arith.subf %299, %308 : vector<16x64xf32>
    %310 = arith.mulf %309, %309 : vector<16x64xf32>
    %cst_132 = arith.constant dense<0.000000e+00> : vector<16xf32>
    %311 = vector.multi_reduction <add>, %310, %cst_132 [1] : vector<16x64xf32> to vector<16xf32>
    %312 = vector.shape_cast %311 : vector<16xf32> to vector<16x1xf32>
    %cst_133 = arith.constant 6.400000e+01 : f32
    %313 = vector.broadcast %cst_133 : f32 to vector<16x1xf32>
    %314 = arith.divf %312, %313 : vector<16x1xf32>
    %315 = vector.broadcast %307 : vector<16x1xf32> to vector<16x64xf32>
    %316 = arith.subf %299, %315 : vector<16x64xf32>
    %cst_134 = arith.constant 9.99999996E-13 : f32
    %317 = vector.broadcast %cst_134 : f32 to vector<16x1xf32>
    %318 = arith.addf %314, %317 : vector<16x1xf32>
    %319 = math.rsqrt %318 : vector<16x1xf32>
    %320 = vector.broadcast %319 : vector<16x1xf32> to vector<16x64xf32>
    %321 = arith.mulf %316, %320 : vector<16x64xf32>
    %322 = vector.broadcast %301 : vector<1x64xf32> to vector<16x64xf32>
    %323 = arith.mulf %321, %322 : vector<16x64xf32>
    %324 = vector.broadcast %303 : vector<1x64xf32> to vector<16x64xf32>
    %325 = arith.addf %323, %324 : vector<16x64xf32>
    %c1_135 = arith.constant 1 : index
    %c0_136 = arith.constant 0 : index
    %c0_137 = arith.constant 0 : index
    %326 = vector.load %arg10[%c1_135, %c0_136, %c0_137] : memref<3x64x128xf32, #tpu.memory_space<vmem>>, vector<1x64x128xf32>
    %327 = vector.shape_cast %326 : vector<1x64x128xf32> to vector<64x128xf32>
    %cst_138 = arith.constant dense<0.000000e+00> : vector<16x128xf32>
    %328 = tpu.matmul %325, %327, %cst_138 {dimension_numbers = #tpu.dot_dimension_numbers<[1], [0], [0], [1], [0, 0, 1, 1], [], []>} : vector<16x64xf32>, vector<64x128xf32>, vector<16x128xf32> -> vector<16x128xf32>
    %c1_139 = arith.constant 1 : index
    %c0_140 = arith.constant 0 : index
    %c0_141 = arith.constant 0 : index
    %329 = vector.load %arg11[%c1_139, %c0_140, %c0_141] : memref<3x1x128xf32, #tpu.memory_space<vmem>>, vector<1x1x128xf32>
    %330 = vector.shape_cast %329 : vector<1x1x128xf32> to vector<1x128xf32>
    %331 = vector.broadcast %330 : vector<1x128xf32> to vector<16x128xf32>
    %332 = arith.addf %328, %331 : vector<16x128xf32>
    %333 = arith.mulf %332, %332 : vector<16x128xf32>
    %334 = arith.mulf %332, %333 : vector<16x128xf32>
    %cst_142 = arith.constant 4.471500e-02 : f32
    %335 = vector.broadcast %cst_142 : f32 to vector<16x128xf32>
    %336 = arith.mulf %335, %334 : vector<16x128xf32>
    %337 = arith.addf %332, %336 : vector<16x128xf32>
    %cst_143 = arith.constant 0.797884583 : f32
    %338 = vector.broadcast %cst_143 : f32 to vector<16x128xf32>
    %339 = arith.mulf %338, %337 : vector<16x128xf32>
    %340 = math.tanh %339 : vector<16x128xf32>
    %cst_144 = arith.constant 1.000000e+00 : f32
    %341 = vector.broadcast %cst_144 : f32 to vector<16x128xf32>
    %342 = arith.addf %341, %340 : vector<16x128xf32>
    %cst_145 = arith.constant 5.000000e-01 : f32
    %343 = vector.broadcast %cst_145 : f32 to vector<16x128xf32>
    %344 = arith.mulf %343, %342 : vector<16x128xf32>
    %345 = arith.mulf %332, %344 : vector<16x128xf32>
    %c1_146 = arith.constant 1 : index
    %c0_147 = arith.constant 0 : index
    %c0_148 = arith.constant 0 : index
    %346 = vector.load %arg12[%c1_146, %c0_147, %c0_148] : memref<3x128x64xf32, #tpu.memory_space<vmem>>, vector<1x128x64xf32>
    %347 = vector.shape_cast %346 : vector<1x128x64xf32> to vector<128x64xf32>
    %cst_149 = arith.constant dense<0.000000e+00> : vector<16x64xf32>
    %348 = tpu.matmul %345, %347, %cst_149 {dimension_numbers = #tpu.dot_dimension_numbers<[1], [0], [0], [1], [0, 0, 1, 1], [], []>} : vector<16x128xf32>, vector<128x64xf32>, vector<16x64xf32> -> vector<16x64xf32>
    %c1_150 = arith.constant 1 : index
    %c0_151 = arith.constant 0 : index
    %c0_152 = arith.constant 0 : index
    %349 = vector.load %arg13[%c1_150, %c0_151, %c0_152] : memref<3x1x64xf32, #tpu.memory_space<vmem>>, vector<1x1x64xf32>
    %350 = vector.shape_cast %349 : vector<1x1x64xf32> to vector<1x64xf32>
    %351 = vector.broadcast %350 : vector<1x64xf32> to vector<16x64xf32>
    %352 = arith.addf %348, %351 : vector<16x64xf32>
    %353 = arith.addf %325, %352 : vector<16x64xf32>
    %c1_153 = arith.constant 1 : index
    %c0_154 = arith.constant 0 : index
    %c0_155 = arith.constant 0 : index
    %354 = vector.load %arg14[%c1_153, %c0_154, %c0_155] : memref<3x1x64xf32, #tpu.memory_space<vmem>>, vector<1x1x64xf32>
    %355 = vector.shape_cast %354 : vector<1x1x64xf32> to vector<1x64xf32>
    %c1_156 = arith.constant 1 : index
    %c0_157 = arith.constant 0 : index
    %c0_158 = arith.constant 0 : index
    %356 = vector.load %arg15[%c1_156, %c0_157, %c0_158] : memref<3x1x64xf32, #tpu.memory_space<vmem>>, vector<1x1x64xf32>
    %357 = vector.shape_cast %356 : vector<1x1x64xf32> to vector<1x64xf32>
    %cst_159 = arith.constant dense<0.000000e+00> : vector<16xf32>
    %358 = vector.multi_reduction <add>, %353, %cst_159 [1] : vector<16x64xf32> to vector<16xf32>
    %359 = vector.shape_cast %358 : vector<16xf32> to vector<16x1xf32>
    %cst_160 = arith.constant 6.400000e+01 : f32
    %360 = vector.broadcast %cst_160 : f32 to vector<16x1xf32>
    %361 = arith.divf %359, %360 : vector<16x1xf32>
    %362 = vector.broadcast %361 : vector<16x1xf32> to vector<16x64xf32>
    %363 = arith.subf %353, %362 : vector<16x64xf32>
    %364 = arith.mulf %363, %363 : vector<16x64xf32>
    %cst_161 = arith.constant dense<0.000000e+00> : vector<16xf32>
    %365 = vector.multi_reduction <add>, %364, %cst_161 [1] : vector<16x64xf32> to vector<16xf32>
    %366 = vector.shape_cast %365 : vector<16xf32> to vector<16x1xf32>
    %cst_162 = arith.constant 6.400000e+01 : f32
    %367 = vector.broadcast %cst_162 : f32 to vector<16x1xf32>
    %368 = arith.divf %366, %367 : vector<16x1xf32>
    %369 = vector.broadcast %361 : vector<16x1xf32> to vector<16x64xf32>
    %370 = arith.subf %353, %369 : vector<16x64xf32>
    %cst_163 = arith.constant 9.99999996E-13 : f32
    %371 = vector.broadcast %cst_163 : f32 to vector<16x1xf32>
    %372 = arith.addf %368, %371 : vector<16x1xf32>
    %373 = math.rsqrt %372 : vector<16x1xf32>
    %374 = vector.broadcast %373 : vector<16x1xf32> to vector<16x64xf32>
    %375 = arith.mulf %370, %374 : vector<16x64xf32>
    %376 = vector.broadcast %355 : vector<1x64xf32> to vector<16x64xf32>
    %377 = arith.mulf %375, %376 : vector<16x64xf32>
    %378 = vector.broadcast %357 : vector<1x64xf32> to vector<16x64xf32>
    %379 = arith.addf %377, %378 : vector<16x64xf32>
    %c2 = arith.constant 2 : index
    %c0_164 = arith.constant 0 : index
    %c0_165 = arith.constant 0 : index
    %380 = vector.load %arg4[%c2, %c0_164, %c0_165] : memref<3x64x192xf32, #tpu.memory_space<vmem>>, vector<1x64x192xf32>
    %381 = vector.shape_cast %380 : vector<1x64x192xf32> to vector<64x192xf32>
    %cst_166 = arith.constant dense<0.000000e+00> : vector<16x192xf32>
    %382 = tpu.matmul %379, %381, %cst_166 {dimension_numbers = #tpu.dot_dimension_numbers<[1], [0], [0], [1], [0, 0, 1, 1], [], []>} : vector<16x64xf32>, vector<64x192xf32>, vector<16x192xf32> -> vector<16x192xf32>
    %c2_167 = arith.constant 2 : index
    %c0_168 = arith.constant 0 : index
    %c0_169 = arith.constant 0 : index
    %383 = vector.load %arg5[%c2_167, %c0_168, %c0_169] : memref<3x1x192xf32, #tpu.memory_space<vmem>>, vector<1x1x192xf32>
    %384 = vector.shape_cast %383 : vector<1x1x192xf32> to vector<1x192xf32>
    %385 = vector.broadcast %384 : vector<1x192xf32> to vector<16x192xf32>
    %386 = arith.addf %382, %385 : vector<16x192xf32>
    %c2_170 = arith.constant 2 : index
    %c0_171 = arith.constant 0 : index
    %c0_172 = arith.constant 0 : index
    %387 = vector.load %arg6[%c2_170, %c0_171, %c0_172] : memref<3x64x64xf32, #tpu.memory_space<vmem>>, vector<1x64x64xf32>
    %388 = vector.shape_cast %387 : vector<1x64x64xf32> to vector<64x64xf32>
    %389 = vector.extract_strided_slice %386 {offsets = [0, 0], sizes = [16, 16], strides = [1, 1]} : vector<16x192xf32> to vector<16x16xf32>
    %390 = vector.extract_strided_slice %386 {offsets = [0, 64], sizes = [16, 16], strides = [1, 1]} : vector<16x192xf32> to vector<16x16xf32>
    %391 = vector.extract_strided_slice %386 {offsets = [0, 128], sizes = [16, 16], strides = [1, 1]} : vector<16x192xf32> to vector<16x16xf32>
    %cst_173 = arith.constant dense<0.000000e+00> : vector<16x16xf32>
    %392 = tpu.matmul %389, %390, %cst_173 {dimension_numbers = #tpu.dot_dimension_numbers<[1], [1], [0], [0], [0, 0, 1, 0], [], []>} : vector<16x16xf32>, vector<16x16xf32>, vector<16x16xf32> -> vector<16x16xf32>
    %cst_174 = arith.constant 2.500000e-01 : f32
    %393 = vector.broadcast %cst_174 : f32 to vector<16x16xf32>
    %394 = arith.mulf %392, %393 : vector<16x16xf32>
    %395 = arith.addf %394, %0 : vector<16x16xf32>
    %cst_175 = arith.constant dense<0xFF800000> : vector<16xf32>
    %396 = vector.multi_reduction <maximumf>, %395, %cst_175 [1] : vector<16x16xf32> to vector<16xf32>
    %397 = vector.shape_cast %396 : vector<16xf32> to vector<16x1xf32>
    %398 = vector.broadcast %397 : vector<16x1xf32> to vector<16x16xf32>
    %399 = arith.subf %395, %398 : vector<16x16xf32>
    %400 = math.exp %399 : vector<16x16xf32>
    %cst_176 = arith.constant dense<0.000000e+00> : vector<16xf32>
    %401 = vector.multi_reduction <add>, %400, %cst_176 [1] : vector<16x16xf32> to vector<16xf32>
    %402 = vector.shape_cast %401 : vector<16xf32> to vector<16x1xf32>
    %403 = tpu.reciprocal %402 {approx = true} : vector<16x1xf32> -> vector<16x1xf32>
    %404 = vector.broadcast %403 : vector<16x1xf32> to vector<16x16xf32>
    %405 = arith.mulf %400, %404 : vector<16x16xf32>
    %cst_177 = arith.constant dense<0.000000e+00> : vector<16x16xf32>
    %406 = tpu.matmul %405, %391, %cst_177 {dimension_numbers = #tpu.dot_dimension_numbers<[1], [0], [0], [1], [0, 0, 1, 1], [], []>} : vector<16x16xf32>, vector<16x16xf32>, vector<16x16xf32> -> vector<16x16xf32>
    %407 = vector.extract_strided_slice %388 {offsets = [0, 0], sizes = [16, 64], strides = [1, 1]} : vector<64x64xf32> to vector<16x64xf32>
    %cst_178 = arith.constant dense<0.000000e+00> : vector<16x64xf32>
    %408 = tpu.matmul %406, %407, %cst_178 {dimension_numbers = #tpu.dot_dimension_numbers<[1], [0], [0], [1], [0, 0, 1, 1], [], []>} : vector<16x16xf32>, vector<16x64xf32>, vector<16x64xf32> -> vector<16x64xf32>
    %409 = vector.extract_strided_slice %386 {offsets = [0, 16], sizes = [16, 16], strides = [1, 1]} : vector<16x192xf32> to vector<16x16xf32>
    %410 = vector.extract_strided_slice %386 {offsets = [0, 80], sizes = [16, 16], strides = [1, 1]} : vector<16x192xf32> to vector<16x16xf32>
    %411 = vector.extract_strided_slice %386 {offsets = [0, 144], sizes = [16, 16], strides = [1, 1]} : vector<16x192xf32> to vector<16x16xf32>
    %cst_179 = arith.constant dense<0.000000e+00> : vector<16x16xf32>
    %412 = tpu.matmul %409, %410, %cst_179 {dimension_numbers = #tpu.dot_dimension_numbers<[1], [1], [0], [0], [0, 0, 1, 0], [], []>} : vector<16x16xf32>, vector<16x16xf32>, vector<16x16xf32> -> vector<16x16xf32>
    %cst_180 = arith.constant 2.500000e-01 : f32
    %413 = vector.broadcast %cst_180 : f32 to vector<16x16xf32>
    %414 = arith.mulf %412, %413 : vector<16x16xf32>
    %415 = arith.addf %414, %0 : vector<16x16xf32>
    %cst_181 = arith.constant dense<0xFF800000> : vector<16xf32>
    %416 = vector.multi_reduction <maximumf>, %415, %cst_181 [1] : vector<16x16xf32> to vector<16xf32>
    %417 = vector.shape_cast %416 : vector<16xf32> to vector<16x1xf32>
    %418 = vector.broadcast %417 : vector<16x1xf32> to vector<16x16xf32>
    %419 = arith.subf %415, %418 : vector<16x16xf32>
    %420 = math.exp %419 : vector<16x16xf32>
    %cst_182 = arith.constant dense<0.000000e+00> : vector<16xf32>
    %421 = vector.multi_reduction <add>, %420, %cst_182 [1] : vector<16x16xf32> to vector<16xf32>
    %422 = vector.shape_cast %421 : vector<16xf32> to vector<16x1xf32>
    %423 = tpu.reciprocal %422 {approx = true} : vector<16x1xf32> -> vector<16x1xf32>
    %424 = vector.broadcast %423 : vector<16x1xf32> to vector<16x16xf32>
    %425 = arith.mulf %420, %424 : vector<16x16xf32>
    %cst_183 = arith.constant dense<0.000000e+00> : vector<16x16xf32>
    %426 = tpu.matmul %425, %411, %cst_183 {dimension_numbers = #tpu.dot_dimension_numbers<[1], [0], [0], [1], [0, 0, 1, 1], [], []>} : vector<16x16xf32>, vector<16x16xf32>, vector<16x16xf32> -> vector<16x16xf32>
    %427 = vector.extract_strided_slice %388 {offsets = [16, 0], sizes = [16, 64], strides = [1, 1]} : vector<64x64xf32> to vector<16x64xf32>
    %cst_184 = arith.constant dense<0.000000e+00> : vector<16x64xf32>
    %428 = tpu.matmul %426, %427, %cst_184 {dimension_numbers = #tpu.dot_dimension_numbers<[1], [0], [0], [1], [0, 0, 1, 1], [], []>} : vector<16x16xf32>, vector<16x64xf32>, vector<16x64xf32> -> vector<16x64xf32>
    %429 = arith.addf %408, %428 : vector<16x64xf32>
    %430 = vector.extract_strided_slice %386 {offsets = [0, 32], sizes = [16, 16], strides = [1, 1]} : vector<16x192xf32> to vector<16x16xf32>
    %431 = vector.extract_strided_slice %386 {offsets = [0, 96], sizes = [16, 16], strides = [1, 1]} : vector<16x192xf32> to vector<16x16xf32>
    %432 = vector.extract_strided_slice %386 {offsets = [0, 160], sizes = [16, 16], strides = [1, 1]} : vector<16x192xf32> to vector<16x16xf32>
    %cst_185 = arith.constant dense<0.000000e+00> : vector<16x16xf32>
    %433 = tpu.matmul %430, %431, %cst_185 {dimension_numbers = #tpu.dot_dimension_numbers<[1], [1], [0], [0], [0, 0, 1, 0], [], []>} : vector<16x16xf32>, vector<16x16xf32>, vector<16x16xf32> -> vector<16x16xf32>
    %cst_186 = arith.constant 2.500000e-01 : f32
    %434 = vector.broadcast %cst_186 : f32 to vector<16x16xf32>
    %435 = arith.mulf %433, %434 : vector<16x16xf32>
    %436 = arith.addf %435, %0 : vector<16x16xf32>
    %cst_187 = arith.constant dense<0xFF800000> : vector<16xf32>
    %437 = vector.multi_reduction <maximumf>, %436, %cst_187 [1] : vector<16x16xf32> to vector<16xf32>
    %438 = vector.shape_cast %437 : vector<16xf32> to vector<16x1xf32>
    %439 = vector.broadcast %438 : vector<16x1xf32> to vector<16x16xf32>
    %440 = arith.subf %436, %439 : vector<16x16xf32>
    %441 = math.exp %440 : vector<16x16xf32>
    %cst_188 = arith.constant dense<0.000000e+00> : vector<16xf32>
    %442 = vector.multi_reduction <add>, %441, %cst_188 [1] : vector<16x16xf32> to vector<16xf32>
    %443 = vector.shape_cast %442 : vector<16xf32> to vector<16x1xf32>
    %444 = tpu.reciprocal %443 {approx = true} : vector<16x1xf32> -> vector<16x1xf32>
    %445 = vector.broadcast %444 : vector<16x1xf32> to vector<16x16xf32>
    %446 = arith.mulf %441, %445 : vector<16x16xf32>
    %cst_189 = arith.constant dense<0.000000e+00> : vector<16x16xf32>
    %447 = tpu.matmul %446, %432, %cst_189 {dimension_numbers = #tpu.dot_dimension_numbers<[1], [0], [0], [1], [0, 0, 1, 1], [], []>} : vector<16x16xf32>, vector<16x16xf32>, vector<16x16xf32> -> vector<16x16xf32>
    %448 = vector.extract_strided_slice %388 {offsets = [32, 0], sizes = [16, 64], strides = [1, 1]} : vector<64x64xf32> to vector<16x64xf32>
    %cst_190 = arith.constant dense<0.000000e+00> : vector<16x64xf32>
    %449 = tpu.matmul %447, %448, %cst_190 {dimension_numbers = #tpu.dot_dimension_numbers<[1], [0], [0], [1], [0, 0, 1, 1], [], []>} : vector<16x16xf32>, vector<16x64xf32>, vector<16x64xf32> -> vector<16x64xf32>
    %450 = arith.addf %429, %449 : vector<16x64xf32>
    %451 = vector.extract_strided_slice %386 {offsets = [0, 48], sizes = [16, 16], strides = [1, 1]} : vector<16x192xf32> to vector<16x16xf32>
    %452 = vector.extract_strided_slice %386 {offsets = [0, 112], sizes = [16, 16], strides = [1, 1]} : vector<16x192xf32> to vector<16x16xf32>
    %453 = vector.extract_strided_slice %386 {offsets = [0, 176], sizes = [16, 16], strides = [1, 1]} : vector<16x192xf32> to vector<16x16xf32>
    %cst_191 = arith.constant dense<0.000000e+00> : vector<16x16xf32>
    %454 = tpu.matmul %451, %452, %cst_191 {dimension_numbers = #tpu.dot_dimension_numbers<[1], [1], [0], [0], [0, 0, 1, 0], [], []>} : vector<16x16xf32>, vector<16x16xf32>, vector<16x16xf32> -> vector<16x16xf32>
    %cst_192 = arith.constant 2.500000e-01 : f32
    %455 = vector.broadcast %cst_192 : f32 to vector<16x16xf32>
    %456 = arith.mulf %454, %455 : vector<16x16xf32>
    %457 = arith.addf %456, %0 : vector<16x16xf32>
    %cst_193 = arith.constant dense<0xFF800000> : vector<16xf32>
    %458 = vector.multi_reduction <maximumf>, %457, %cst_193 [1] : vector<16x16xf32> to vector<16xf32>
    %459 = vector.shape_cast %458 : vector<16xf32> to vector<16x1xf32>
    %460 = vector.broadcast %459 : vector<16x1xf32> to vector<16x16xf32>
    %461 = arith.subf %457, %460 : vector<16x16xf32>
    %462 = math.exp %461 : vector<16x16xf32>
    %cst_194 = arith.constant dense<0.000000e+00> : vector<16xf32>
    %463 = vector.multi_reduction <add>, %462, %cst_194 [1] : vector<16x16xf32> to vector<16xf32>
    %464 = vector.shape_cast %463 : vector<16xf32> to vector<16x1xf32>
    %465 = tpu.reciprocal %464 {approx = true} : vector<16x1xf32> -> vector<16x1xf32>
    %466 = vector.broadcast %465 : vector<16x1xf32> to vector<16x16xf32>
    %467 = arith.mulf %462, %466 : vector<16x16xf32>
    %cst_195 = arith.constant dense<0.000000e+00> : vector<16x16xf32>
    %468 = tpu.matmul %467, %453, %cst_195 {dimension_numbers = #tpu.dot_dimension_numbers<[1], [0], [0], [1], [0, 0, 1, 1], [], []>} : vector<16x16xf32>, vector<16x16xf32>, vector<16x16xf32> -> vector<16x16xf32>
    %469 = vector.extract_strided_slice %388 {offsets = [48, 0], sizes = [16, 64], strides = [1, 1]} : vector<64x64xf32> to vector<16x64xf32>
    %cst_196 = arith.constant dense<0.000000e+00> : vector<16x64xf32>
    %470 = tpu.matmul %468, %469, %cst_196 {dimension_numbers = #tpu.dot_dimension_numbers<[1], [0], [0], [1], [0, 0, 1, 1], [], []>} : vector<16x16xf32>, vector<16x64xf32>, vector<16x64xf32> -> vector<16x64xf32>
    %471 = arith.addf %450, %470 : vector<16x64xf32>
    %c2_197 = arith.constant 2 : index
    %c0_198 = arith.constant 0 : index
    %c0_199 = arith.constant 0 : index
    %472 = vector.load %arg7[%c2_197, %c0_198, %c0_199] : memref<3x1x64xf32, #tpu.memory_space<vmem>>, vector<1x1x64xf32>
    %473 = vector.shape_cast %472 : vector<1x1x64xf32> to vector<1x64xf32>
    %474 = vector.broadcast %473 : vector<1x64xf32> to vector<16x64xf32>
    %475 = arith.addf %471, %474 : vector<16x64xf32>
    %476 = arith.addf %379, %475 : vector<16x64xf32>
    %c2_200 = arith.constant 2 : index
    %c0_201 = arith.constant 0 : index
    %c0_202 = arith.constant 0 : index
    %477 = vector.load %arg8[%c2_200, %c0_201, %c0_202] : memref<3x1x64xf32, #tpu.memory_space<vmem>>, vector<1x1x64xf32>
    %478 = vector.shape_cast %477 : vector<1x1x64xf32> to vector<1x64xf32>
    %c2_203 = arith.constant 2 : index
    %c0_204 = arith.constant 0 : index
    %c0_205 = arith.constant 0 : index
    %479 = vector.load %arg9[%c2_203, %c0_204, %c0_205] : memref<3x1x64xf32, #tpu.memory_space<vmem>>, vector<1x1x64xf32>
    %480 = vector.shape_cast %479 : vector<1x1x64xf32> to vector<1x64xf32>
    %cst_206 = arith.constant dense<0.000000e+00> : vector<16xf32>
    %481 = vector.multi_reduction <add>, %476, %cst_206 [1] : vector<16x64xf32> to vector<16xf32>
    %482 = vector.shape_cast %481 : vector<16xf32> to vector<16x1xf32>
    %cst_207 = arith.constant 6.400000e+01 : f32
    %483 = vector.broadcast %cst_207 : f32 to vector<16x1xf32>
    %484 = arith.divf %482, %483 : vector<16x1xf32>
    %485 = vector.broadcast %484 : vector<16x1xf32> to vector<16x64xf32>
    %486 = arith.subf %476, %485 : vector<16x64xf32>
    %487 = arith.mulf %486, %486 : vector<16x64xf32>
    %cst_208 = arith.constant dense<0.000000e+00> : vector<16xf32>
    %488 = vector.multi_reduction <add>, %487, %cst_208 [1] : vector<16x64xf32> to vector<16xf32>
    %489 = vector.shape_cast %488 : vector<16xf32> to vector<16x1xf32>
    %cst_209 = arith.constant 6.400000e+01 : f32
    %490 = vector.broadcast %cst_209 : f32 to vector<16x1xf32>
    %491 = arith.divf %489, %490 : vector<16x1xf32>
    %492 = vector.broadcast %484 : vector<16x1xf32> to vector<16x64xf32>
    %493 = arith.subf %476, %492 : vector<16x64xf32>
    %cst_210 = arith.constant 9.99999996E-13 : f32
    %494 = vector.broadcast %cst_210 : f32 to vector<16x1xf32>
    %495 = arith.addf %491, %494 : vector<16x1xf32>
    %496 = math.rsqrt %495 : vector<16x1xf32>
    %497 = vector.broadcast %496 : vector<16x1xf32> to vector<16x64xf32>
    %498 = arith.mulf %493, %497 : vector<16x64xf32>
    %499 = vector.broadcast %478 : vector<1x64xf32> to vector<16x64xf32>
    %500 = arith.mulf %498, %499 : vector<16x64xf32>
    %501 = vector.broadcast %480 : vector<1x64xf32> to vector<16x64xf32>
    %502 = arith.addf %500, %501 : vector<16x64xf32>
    %c2_211 = arith.constant 2 : index
    %c0_212 = arith.constant 0 : index
    %c0_213 = arith.constant 0 : index
    %503 = vector.load %arg10[%c2_211, %c0_212, %c0_213] : memref<3x64x128xf32, #tpu.memory_space<vmem>>, vector<1x64x128xf32>
    %504 = vector.shape_cast %503 : vector<1x64x128xf32> to vector<64x128xf32>
    %cst_214 = arith.constant dense<0.000000e+00> : vector<16x128xf32>
    %505 = tpu.matmul %502, %504, %cst_214 {dimension_numbers = #tpu.dot_dimension_numbers<[1], [0], [0], [1], [0, 0, 1, 1], [], []>} : vector<16x64xf32>, vector<64x128xf32>, vector<16x128xf32> -> vector<16x128xf32>
    %c2_215 = arith.constant 2 : index
    %c0_216 = arith.constant 0 : index
    %c0_217 = arith.constant 0 : index
    %506 = vector.load %arg11[%c2_215, %c0_216, %c0_217] : memref<3x1x128xf32, #tpu.memory_space<vmem>>, vector<1x1x128xf32>
    %507 = vector.shape_cast %506 : vector<1x1x128xf32> to vector<1x128xf32>
    %508 = vector.broadcast %507 : vector<1x128xf32> to vector<16x128xf32>
    %509 = arith.addf %505, %508 : vector<16x128xf32>
    %510 = arith.mulf %509, %509 : vector<16x128xf32>
    %511 = arith.mulf %509, %510 : vector<16x128xf32>
    %cst_218 = arith.constant 4.471500e-02 : f32
    %512 = vector.broadcast %cst_218 : f32 to vector<16x128xf32>
    %513 = arith.mulf %512, %511 : vector<16x128xf32>
    %514 = arith.addf %509, %513 : vector<16x128xf32>
    %cst_219 = arith.constant 0.797884583 : f32
    %515 = vector.broadcast %cst_219 : f32 to vector<16x128xf32>
    %516 = arith.mulf %515, %514 : vector<16x128xf32>
    %517 = math.tanh %516 : vector<16x128xf32>
    %cst_220 = arith.constant 1.000000e+00 : f32
    %518 = vector.broadcast %cst_220 : f32 to vector<16x128xf32>
    %519 = arith.addf %518, %517 : vector<16x128xf32>
    %cst_221 = arith.constant 5.000000e-01 : f32
    %520 = vector.broadcast %cst_221 : f32 to vector<16x128xf32>
    %521 = arith.mulf %520, %519 : vector<16x128xf32>
    %522 = arith.mulf %509, %521 : vector<16x128xf32>
    %c2_222 = arith.constant 2 : index
    %c0_223 = arith.constant 0 : index
    %c0_224 = arith.constant 0 : index
    %523 = vector.load %arg12[%c2_222, %c0_223, %c0_224] : memref<3x128x64xf32, #tpu.memory_space<vmem>>, vector<1x128x64xf32>
    %524 = vector.shape_cast %523 : vector<1x128x64xf32> to vector<128x64xf32>
    %cst_225 = arith.constant dense<0.000000e+00> : vector<16x64xf32>
    %525 = tpu.matmul %522, %524, %cst_225 {dimension_numbers = #tpu.dot_dimension_numbers<[1], [0], [0], [1], [0, 0, 1, 1], [], []>} : vector<16x128xf32>, vector<128x64xf32>, vector<16x64xf32> -> vector<16x64xf32>
    %c2_226 = arith.constant 2 : index
    %c0_227 = arith.constant 0 : index
    %c0_228 = arith.constant 0 : index
    %526 = vector.load %arg13[%c2_226, %c0_227, %c0_228] : memref<3x1x64xf32, #tpu.memory_space<vmem>>, vector<1x1x64xf32>
    %527 = vector.shape_cast %526 : vector<1x1x64xf32> to vector<1x64xf32>
    %528 = vector.broadcast %527 : vector<1x64xf32> to vector<16x64xf32>
    %529 = arith.addf %525, %528 : vector<16x64xf32>
    %530 = arith.addf %502, %529 : vector<16x64xf32>
    %c2_229 = arith.constant 2 : index
    %c0_230 = arith.constant 0 : index
    %c0_231 = arith.constant 0 : index
    %531 = vector.load %arg14[%c2_229, %c0_230, %c0_231] : memref<3x1x64xf32, #tpu.memory_space<vmem>>, vector<1x1x64xf32>
    %532 = vector.shape_cast %531 : vector<1x1x64xf32> to vector<1x64xf32>
    %c2_232 = arith.constant 2 : index
    %c0_233 = arith.constant 0 : index
    %c0_234 = arith.constant 0 : index
    %533 = vector.load %arg15[%c2_232, %c0_233, %c0_234] : memref<3x1x64xf32, #tpu.memory_space<vmem>>, vector<1x1x64xf32>
    %534 = vector.shape_cast %533 : vector<1x1x64xf32> to vector<1x64xf32>
    %cst_235 = arith.constant dense<0.000000e+00> : vector<16xf32>
    %535 = vector.multi_reduction <add>, %530, %cst_235 [1] : vector<16x64xf32> to vector<16xf32>
    %536 = vector.shape_cast %535 : vector<16xf32> to vector<16x1xf32>
    %cst_236 = arith.constant 6.400000e+01 : f32
    %537 = vector.broadcast %cst_236 : f32 to vector<16x1xf32>
    %538 = arith.divf %536, %537 : vector<16x1xf32>
    %539 = vector.broadcast %538 : vector<16x1xf32> to vector<16x64xf32>
    %540 = arith.subf %530, %539 : vector<16x64xf32>
    %541 = arith.mulf %540, %540 : vector<16x64xf32>
    %cst_237 = arith.constant dense<0.000000e+00> : vector<16xf32>
    %542 = vector.multi_reduction <add>, %541, %cst_237 [1] : vector<16x64xf32> to vector<16xf32>
    %543 = vector.shape_cast %542 : vector<16xf32> to vector<16x1xf32>
    %cst_238 = arith.constant 6.400000e+01 : f32
    %544 = vector.broadcast %cst_238 : f32 to vector<16x1xf32>
    %545 = arith.divf %543, %544 : vector<16x1xf32>
    %546 = vector.broadcast %538 : vector<16x1xf32> to vector<16x64xf32>
    %547 = arith.subf %530, %546 : vector<16x64xf32>
    %cst_239 = arith.constant 9.99999996E-13 : f32
    %548 = vector.broadcast %cst_239 : f32 to vector<16x1xf32>
    %549 = arith.addf %545, %548 : vector<16x1xf32>
    %550 = math.rsqrt %549 : vector<16x1xf32>
    %551 = vector.broadcast %550 : vector<16x1xf32> to vector<16x64xf32>
    %552 = arith.mulf %547, %551 : vector<16x64xf32>
    %553 = vector.broadcast %532 : vector<1x64xf32> to vector<16x64xf32>
    %554 = arith.mulf %552, %553 : vector<16x64xf32>
    %555 = vector.broadcast %534 : vector<1x64xf32> to vector<16x64xf32>
    %556 = arith.addf %554, %555 : vector<16x64xf32>
    %c0_240 = arith.constant 0 : index
    %c0_241 = arith.constant 0 : index
    %557 = vector.load %arg16[%c0_240, %c0_241] : memref<64x128xf32, #tpu.memory_space<vmem>>, vector<64x128xf32>
    %cst_242 = arith.constant dense<0.000000e+00> : vector<16x128xf32>
    %558 = tpu.matmul %556, %557, %cst_242 {dimension_numbers = #tpu.dot_dimension_numbers<[1], [0], [0], [1], [0, 0, 1, 1], [], []>} : vector<16x64xf32>, vector<64x128xf32>, vector<16x128xf32> -> vector<16x128xf32>
    %c0_243 = arith.constant 0 : index
    %c0_244 = arith.constant 0 : index
    %559 = vector.load %arg17[%c0_243, %c0_244] : memref<64x128xf32, #tpu.memory_space<vmem>>, vector<64x128xf32>
    %cst_245 = arith.constant dense<0.000000e+00> : vector<16x128xf32>
    %560 = tpu.matmul %202, %559, %cst_245 {dimension_numbers = #tpu.dot_dimension_numbers<[1], [0], [0], [1], [0, 0, 1, 1], [], []>} : vector<16x64xf32>, vector<64x128xf32>, vector<16x128xf32> -> vector<16x128xf32>
    %561 = arith.addf %558, %560 : vector<16x128xf32>
    %c0_246 = arith.constant 0 : index
    %c0_247 = arith.constant 0 : index
    %562 = vector.load %arg18[%c0_246, %c0_247] : memref<1x128xf32, #tpu.memory_space<vmem>>, vector<1x128xf32>
    %563 = vector.broadcast %562 : vector<1x128xf32> to vector<16x128xf32>
    %564 = arith.addf %561, %563 : vector<16x128xf32>
    %cst_248 = arith.constant 0.000000e+00 : f32
    %565 = vector.broadcast %cst_248 : f32 to vector<16x128xf32>
    %566 = arith.cmpf ogt, %564, %565 : vector<16x128xf32>
    %cst_249 = arith.constant 0.00999999977 : f32
    %567 = vector.broadcast %cst_249 : f32 to vector<16x128xf32>
    %568 = arith.mulf %567, %564 : vector<16x128xf32>
    %569 = arith.select %566, %564, %568 : vector<16x128xi1>, vector<16x128xf32>
    %c0_250 = arith.constant 0 : index
    %c0_251 = arith.constant 0 : index
    %570 = vector.load %arg19[%c0_250, %c0_251] : memref<128x128xf32, #tpu.memory_space<vmem>>, vector<128x128xf32>
    %cst_252 = arith.constant dense<0.000000e+00> : vector<16x128xf32>
    %571 = tpu.matmul %569, %570, %cst_252 {dimension_numbers = #tpu.dot_dimension_numbers<[1], [0], [0], [1], [0, 0, 1, 1], [], []>} : vector<16x128xf32>, vector<128x128xf32>, vector<16x128xf32> -> vector<16x128xf32>
    %c0_253 = arith.constant 0 : index
    %c0_254 = arith.constant 0 : index
    %572 = vector.load %arg20[%c0_253, %c0_254] : memref<1x128xf32, #tpu.memory_space<vmem>>, vector<1x128xf32>
    %573 = vector.broadcast %572 : vector<1x128xf32> to vector<16x128xf32>
    %574 = arith.addf %571, %573 : vector<16x128xf32>
    %c0_255 = arith.constant 0 : index
    %c0_256 = arith.constant 0 : index
    %575 = vector.load %arg21[%c0_255, %c0_256] : memref<16x128xf32, #tpu.memory_space<vmem>>, vector<16x128xf32>
    tpu.vector_store %arg21[%c0_255, %c0_256], %574 {strides = array<i32>} : memref<16x128xf32, #tpu.memory_space<vmem>>, vector<16x128xf32>,
    return
  }
}

</mosaic_0001>

<bundles_post_ra>
// kernel: transformer_qa_forward.1
= control target key start
LH: loop header
LB: loop body
LE: loop exit
PB: predicated region body
PF: predicated region fallthrough
CT: control target
= control target key end

     0   :  { %vm74_vm0 = vcmask 523264   ;;  %v6294_v19 = vmov 0.0   ;;  %v136_v47 = vlaneseq  ;;  %vm243_vm1 = vcmask 130048   ;;  %s7600_s22 = smov 48   ;;  %s7594_s28 = smov 96   ;;  %s7564_s0 = inlined_call_operand.vmem [shape: f32[16,64], index: 0, kind: input, shape index: {}]   ;;  %s7565_s4 = inlined_call_operand.vmem [shape: f32[3,64,192], index: 4, kind: input, shape index: {}]   ;;  %s7566_s2 = inlined_call_operand.vmem [shape: f32[1,64], index: 2, kind: input, shape index: {}]   ;;  %s7567_s3 = inlined_call_operand.vmem [shape: f32[1,64], index: 3, kind: input, shape index: {}]   ;;  %s7568_s5 = inlined_call_operand.vmem [shape: f32[3,1,192], index: 5, kind: input, shape index: {}]   ;;  %s7569_s1 = inlined_call_operand.vmem [shape: f32[16,16], index: 1, kind: input, shape index: {}]   ;;  %s7570_s6 = inlined_call_operand.vmem [shape: f32[3,64,64], index: 6, kind: input, shape index: {}]   ;;  %s7571_s7 = inlined_call_operand.vmem [shape: f32[3,1,64], index: 7, kind: input, shape index: {}]   ;;  %s7572_s10 = inlined_call_operand.vmem [shape: f32[3,64,128], index: 10, kind: input, shape index: {}]   ;;  %s7573_s8 = inlined_call_operand.vmem [shape: f32[3,1,64], index: 8, kind: input, shape index: {}]   ;;  %s7574_s9 = inlined_call_operand.vmem [shape: f32[3,1,64], index: 9, kind: input, shape index: {}]   ;;  %s7575_s12 = inlined_call_operand.vmem [shape: f32[3,128,64], index: 12, kind: input, shape index: {}]   ;;  %s7576_s11 = inlined_call_operand.vmem [shape: f32[3,1,128], index: 11, kind: input, shape index: {}]   ;;  %s7577_s13 = inlined_call_operand.vmem [shape: f32[3,1,64], index: 13, kind: input, shape index: {}]   ;;  %s7578_s14 = inlined_call_operand.vmem [shape: f32[3,1,64], index: 14, kind: input, shape index: {}]   ;;  %s7579_s15 = inlined_call_operand.vmem [shape: f32[3,1,64], index: 15, kind: input, shape index: {}]   ;;  %s7580_s17 = inlined_call_operand.vmem [shape: f32[64,128], index: 17, kind: input, shape index: {}]   ;;  %s7581_s16 = inlined_call_operand.vmem [shape: f32[64,128], index: 16, kind: input, shape index: {}]   ;;  %s7582_s19 = inlined_call_operand.vmem [shape: f32[128,128], index: 19, kind: input, shape index: {}]   ;;  %s7583_s18 = inlined_call_operand.vmem [shape: f32[1,128], index: 18, kind: input, shape index: {}]   ;;  %s7584_s20 = inlined_call_operand.vmem [shape: f32[1,128], index: 20, kind: input, shape index: {}]   ;;  %s7585_s21 = inlined_call_operand.vmem [shape: f32[16,128], index: 21, kind: output, shape index: {}]  }
   0x1   :  { %7605 = sst [smem:[#allocation2_spill]] %s7564_s0  ;;  %216 = vmatprep.mubr.f32.mxu0 %v6294_v19  ;;  %s7592_s29 = smov 16  }
   0x2   :  { %7606 = sst [smem:[#allocation3_spill]] %s7565_s4  ;;  %v137_v48 = vshrl.u32 %v136_v47, 7  ;;  %s7590_s30 = smov 80  }
   0x3   :  { %7607 = sst [smem:[#allocation4_spill]] %s7566_s2  ;;  %s7621_s24 = smov 32  }
   0x4   :  { %7608 = sst [smem:[#allocation5_spill]] %s7567_s3  ;;  %v6486_v49 = vsub.s32 0, %v137_v48  ;;  %s7602_s3 = smov 64   ;;  %v6502_v57 = vsub.s32 1, %v137_v48 }
   0x5   :  { %7609 = sst [smem:[#allocation6_spill]] %s7568_s5 }
   0x6   :  { %7610 = sst [smem:[#allocation7_spill]] %s7569_s1 }
   0x7   :  { %7611 = sst [smem:[#allocation8_spill]] %s7583_s18 }
   0x8   :  { %7612 = sst [smem:[#allocation9_spill]] %s7584_s20 }
   0x9   :  { %7613 = sst [smem:[#allocation10_spill]] %s7585_s21 }
   0xa   :  { %s7614_s26 = sld [smem:[#allocation2_spill]] }
   0xb   :  { %s7615_s0 = sld [smem:[#allocation3_spill]] }
   0xc   :  { %s7616_s23 = sld [smem:[#allocation4_spill]] }
   0xd   :  { %s7617_s2 = sld [smem:[#allocation5_spill]] }
   0xe   :  { %s7618_s27 = sld [smem:[#allocation6_spill]] }
   0xf   :  { %s7619_s5 = sld [smem:[#allocation7_spill]] }
  0x10   :  { %v70_v0 = vld [vmem:[%s7614_s26] sm:$0xff]  ;;  %v71_v1 = vld [vmem:[%s7614_s26 + $0x8] sm:$0xff]  ;;  %s7596_s26 = smov 32   ;;  %s7627_s4 = sld [smem:[#allocation8_spill]] }
  0x11   :  { %v75_v2 = vsel %vm74_vm0, %v70_v0, 0.0  ;;  %v78_v3 = vsel %vm74_vm0, %v71_v1, 0.0  ;;  %v133_v14 = vld [vmem:[%s7615_s0 + $0x78] sm:$0xff]  ;;  %v132_v15 = vld [vmem:[%s7615_s0 + $0x70] sm:$0xff]  ;;  %v131_v16 = vld [vmem:[%s7615_s0 + $0x68] sm:$0xff] }
  0x12   :  { %76 = vadd.xlane.f32.xlu0 %v75_v2  ;;  %168 = vmatprep.subr.mxu0 %v133_v14  ;;  %v130_v17 = vld [vmem:[%s7615_s0 + $0x60] sm:$0xff]  ;;  %v129_v18 = vld [vmem:[%s7615_s0 + $0x58] sm:$0xff]  ;;  %v128_v20 = vld [vmem:[%s7615_s0 + $0x50] sm:$0xff] }
  0x13   :  { %169 = vmatpush1.msra.mxu0 %v132_v15  ;;  %v127_v21 = vld [vmem:[%s7615_s0 + $0x48] sm:$0xff]  ;;  %v126_v22 = vld [vmem:[%s7615_s0 + $0x40] sm:$0xff]  ;;  %v125_v23 = vld [vmem:[%s7615_s0 + $0x38] sm:$0xff] }
  0x14   :  { %170 = vmatprep.subr.mxu0 %v131_v16  ;;  %v124_v24 = vld [vmem:[%s7615_s0 + $0x30] sm:$0xff]  ;;  %v123_v25 = vld [vmem:[%s7615_s0 + $0x28] sm:$0xff]  ;;  %v122_v26 = vld [vmem:[%s7615_s0 + $0x20] sm:$0xff] }
  0x15   :  { %171 = vmatpush1.msra.mxu0 %v130_v17  ;;  %v121_v27 = vld [vmem:[%s7615_s0 + $0x18] sm:$0xff]  ;;  %v120_v28 = vld [vmem:[%s7615_s0 + $0x10] sm:$0xff]  ;;  %v119_v29 = vld [vmem:[%s7615_s0 + $0x8] sm:$0xff] }
  0x16   :  { %79 = vadd.xlane.f32.xlu0 %v78_v3  ;;  %172 = vmatprep.subr.mxu0 %v129_v18  ;;  %v118_v30 = vld [vmem:[%s7615_s0] sm:$0xff] }
  0x17   :  { %173 = vmatpush1.msra.mxu0 %v128_v20  ;;  %v5144_v38 = vld [vmem:[%s7616_s23] ss:$0 sm:$0xff]  ;;  %s7598_s23 = smov 112  }
  0x18   :  { %174 = vmatprep.subr.mxu0 %v127_v21  ;;  %v5145_v40 = vld [vmem:[%s7617_s2] ss:$0 sm:$0xff]  ;;  %s7623_s2 = smov 16  }
  0x19   :  { %175 = vmatpush1.msra.mxu0 %v126_v22  ;;  %v134_v50 = vld [vmem:[%s7618_s27] sm:$0x3] }
  0x1a   :  { %176 = vmatprep.subr.mxu0 %v125_v23  ;;  %v139_v51 = vrot.slane %v134_v50, %v6486_v49  ;;  %v143_v61 = vrot.slane %v134_v50, %v6502_v57 }
  0x1b   :  { %177 = vmatpush1.msra.mxu0 %v124_v24 }
  0x1c   :  { %178 = vmatprep.subr.mxu0 %v123_v25 }
  0x1d   :  { %179 = vmatpush1.msra.mxu0 %v122_v26 }
  0x1e   :  { %180 = vmatprep.subr.mxu0 %v121_v27 }
  0x1f   :  { %181 = vmatpush1.msra.mxu0 %v120_v28 }
  0x20   :  { %182 = vmatprep.subr.mxu0 %v119_v29 }
  0x21   :  { %183 = vmatpush1.msra.mxu0 %v118_v30 }
  0x9b   :  { %v77_v4 = vpop.xlane.xlu0 %76 }
  0x9c   :  { %v82_v5 = vmul.f32 0.015625, %v77_v4  ;;  %v6527_v4 = vld [vmem:[%s7619_s5] sm:$0xff] }
  0x9e   :  { %v84_v6 = vsub.f32 %v70_v0, %v82_v5 }
  0x9f   :  { %v80_v7 = vpop.xlane.xlu0 %79 }
  0xa0   :  { %v83_v8 = vmul.f32 0.015625, %v80_v7  ;;  %v86_v9 = vmul.f32 %v84_v6, %v84_v6 }
  0xa2   :  { %v85_v10 = vsub.f32 %v71_v1, %v83_v8  ;;  %v88_v11 = vsel %vm74_vm0, %v86_v9, 0.0  ;;  %v6522_v1 = vld [vmem:[%s7619_s5 + $0x8] sm:$0xff] }
  0xa3   :  { %89 = vadd.xlane.f32.xlu1 %v88_v11 }
  0xa4   :  { %v87_v12 = vmul.f32 %v85_v10, %v85_v10 }
  0xa6   :  { %v91_v13 = vsel %vm74_vm0, %v87_v12, 0.0 }
  0xa7   :  { %92 = vadd.xlane.f32.xlu1 %v91_v13 }
 0x12c   :  { %v90_v31 = vpop.xlane.xlu1 %89 }
 0x12d   :  { %v94_v32 = vmul.f32 0.015625, %v90_v31 }
 0x12f   :  { %v96_v33 = vadd.f32 1e-12, %v94_v32 }
 0x130   :  { %v93_v34 = vpop.xlane.xlu1 %92 }
 0x131   :  { %6154 = vrsqrt.f32 %v96_v33  ;;  %v95_v35 = vmul.f32 0.015625, %v93_v34 }
 0x133   :  { %v97_v36 = vadd.f32 1e-12, %v95_v35 }
 0x135   :  { %6156 = vrsqrt.f32 %v97_v36 }
 0x13e   :  { %v6155_v37 = vpop.eup %6154 }
 0x13f   :  { %v100_v39 = vmul.f32 %v6155_v37, %v84_v6 }
 0x141   :  { %v108_v41 = vmul.f32 %v5144_v38, %v100_v39 }
 0x142   :  { %v6157_v42 = vpop.eup %6156 }
 0x143   :  { %v6477_v43 = vadd.f32 %v5145_v40, %v108_v41  ;;  %v101_v44 = vmul.f32 %v6157_v42, %v85_v10  ;;  %v232_v41 = vld [vmem:[%s7570_s6 + $0x18] sm:$0xff]  ;;  %v231_v42 = vld [vmem:[%s7570_s6 + $0x10] sm:$0xff] }
 0x145   :  { %5146 = vmatmul.mubr.msk.f32.vlgmr.msra.gmra.mxu0 %vm74_vm0, %v6477_v43  ;;  %v109_v45 = vmul.f32 %v5144_v38, %v101_v44 }
 0x146   :  { %222 = vmatprep.mubr.f32.mxu0 %v6294_v19 }
 0x147   :  { %v6482_v46 = vadd.f32 %v5145_v40, %v109_v45 }
 0x149   :  { %5147 = vmatmul.mubr.msk.f32.gmra.mxu0 %vm74_vm0, %v6482_v46 }
 0x205   :  { %v218_v52 = vpop.f32.mrf.mxu0 }
 0x206   :  { %v6492_v53 = vadd.f32 %v218_v52, %v139_v51 }
 0x207   :  { %v220_v54 = vpop.f32.mrf.mxu0 }
 0x208   :  { %5663 = vmatprep.mubr.msk.f32.mxu1 %vm243_vm1, %v6492_v53  ;;  %239 = vrot.lane.b32.xlu1 %v6492_v53, %s7602_s3  ;;  %v6512_v63 = vadd.f32 %v220_v54, %v143_v61 }
 0x209   :  { %v224_v55 = vpop.f32.mrf.mxu0 }
 0x20a   :  { %v6498_v56 = vadd.f32 %v224_v55, %v139_v51 }
 0x20b   :  { %v226_v59 = vpop.f32.mrf.mxu0 }
 0x20c   :  { %241 = vrot.lane.b32.xlu0 %v6498_v56, %s7602_s3  ;;  %v6508_v62 = vadd.f32 %v226_v59, %v143_v61 }
 0x27a   :  { %v240_v60 = vpop.permute.xlu1 %239 }
 0x27e   :  { %v242_v58 = vpop.permute.xlu0 %241 }
 0x27f   :  { %5659 = vmatprep.subr.msk.mxu1 %vm243_vm1, %v242_v58 }
 0x280   :  { %5660 = vmatpush3.xpose.msk.msra.mxu1 %vm243_vm1, %v242_v58 }
 0x281   :  { %5661 = vmatprep.subr.msk.mxu1 %vm243_vm1, %v240_v60 }
 0x284   :  { %5662 = vmatpush3.xpose.msk.msra.mxu1 %vm243_vm1, %v240_v60 }
 0x285   :  { %5666 = vmatprep.subr.mxu1 %v6508_v62 }
 0x287   :  { %5664 = vmatmul.mubr.msk.f32.vlgmr.msra.gmra.mxu1 %vm243_vm1, %v6498_v56 }
 0x288   :  { %5667 = vmatpush3.msra.mxu1 %v6508_v62 }
 0x289   :  { %5668 = vmatprep.subr.mxu1 %v6512_v63 }
 0x28a   :  { %5669 = vmatpush3.msra.mxu1 %v6512_v63 }
 0x347   :  { %v5665_v0 = vpop.f32.mrf.mxu1 }
 0x348   :  { %v328_v2 = vmul.f32 0.25, %v5665_v0 }
 0x349   :  { %v318_v3 = vpop.f32.mrf.mxu1 }
 0x34a   :  { %v327_v5 = vmul.f32 0.25, %v318_v3  ;;  %v330_v6 = vadd.f32 %v328_v2, %v6522_v1  ;;  %v230_v3 = vld [vmem:[%s7570_s6 + $0x8] sm:$0xff] }
 0x34c   :  { %v334_v7 = vsel %vm243_vm1, %v330_v6, -inf  ;;  %v329_v8 = vadd.f32 %v327_v5, %v6527_v4 }
 0x34d   :  { %335 = vmax.xlane.f32.xlu0 %v334_v7 }
 0x34e   :  { %v331_v9 = vsel %vm243_vm1, %v329_v8, -inf }
 0x34f   :  { %332 = vmax.xlane.f32.xlu1 %v331_v9 }
 0x3d6   :  { %v336_v10 = vpop.xlane.xlu0 %335 }
 0x3d7   :  { %v338_v11 = vsub.f32 %v330_v6, %v336_v10 }
 0x3d8   :  { %v333_v12 = vpop.xlane.xlu1 %332 }
 0x3d9   :  { %v341_v13 = vmul.f32 1.442695, %v338_v11  ;;  %v337_v14 = vsub.f32 %v329_v8, %v333_v12 }
 0x3db   :  { %6158 = vpow2.f32 %v341_v13  ;;  %v339_v15 = vmul.f32 1.442695, %v337_v14 }
 0x3dd   :  { %6160 = vpow2.f32 %v339_v15 }
 0x3e8   :  { %v6159_v16 = vpop.eup %6158 }
 0x3e9   :  { %v346_v17 = vsel %vm243_vm1, %v6159_v16, 0.0 }
 0x3ea   :  { %v6161_v18 = vpop.eup %6160  ;;  %347 = vadd.xlane.f32.xlu1 %v346_v17 }
 0x3eb   :  { %v343_v20 = vsel %vm243_vm1, %v6161_v18, 0.0 }
 0x3ec   :  { %344 = vadd.xlane.f32.xlu0 %v343_v20 }
 0x3fb   :  { %438 = vrot.lane.b32.xlu1 %v6492_v53, %s7600_s22 }
 0x3ff   :  { %434 = vrot.lane.b32.xlu1 %v6492_v53, %s7598_s23 }
 0x402   :  { %440 = vrot.lane.b32.xlu0 %v6498_v56, %s7600_s22 }
 0x403   :  { %436 = vrot.lane.b32.xlu1 %v6498_v56, %s7598_s23 }
 0x473   :  { %v348_v21 = vpop.xlane.xlu1 %347 }
 0x474   :  { %6162 = vrcp.f32 %v348_v21 }
 0x475   :  { %v345_v22 = vpop.xlane.xlu0 %344 }
 0x476   :  { %6164 = vrcp.f32 %v345_v22 }
 0x477   :  { %v439_v24 = vpop.permute.xlu1 %438 }
 0x479   :  { %v441_v23 = vpop.permute.xlu0 %440 }
 0x47a   :  { %5673 = vmatprep.subr.msk.mxu1 %vm243_vm1, %v441_v23 }
 0x47b   :  { %v435_v29 = vpop.permute.xlu1 %434 }
 0x47f   :  { %v437_v30 = vpop.permute.xlu1 %436 }
 0x481   :  { %v6163_v25 = vpop.eup %6162 }
 0x482   :  { %v352_v28 = vmul.f32 %v6163_v25, %v6159_v16 }
 0x483   :  { %v6165_v26 = vpop.eup %6164 }
 0x484   :  { %v351_v27 = vmul.f32 %v6165_v26, %v6161_v18 }
 0x486   :  { %5670 = vmatprep.mubr.msk.f32.mxu1 %vm243_vm1, %v351_v27 }
 0x487   :  { %5671 = vmatmul.mubr.msk.f32.vlgmr.msra.gmra.mxu1 %vm243_vm1, %v352_v28 }
 0x488   :  { %5674 = vmatpush3.xpose.msk.msra.mxu1 %vm243_vm1, %v441_v23  ;;  %5677 = vmatprep.mubr.msk.f32.mxu1 %vm243_vm1, %v435_v29 }
 0x489   :  { %5675 = vmatprep.subr.msk.mxu1 %vm243_vm1, %v439_v24 }
 0x48c   :  { %5676 = vmatpush3.xpose.msk.msra.mxu1 %vm243_vm1, %v439_v24 }
 0x48d   :  { %5687 = vmatprep.subr.mxu1 %v232_v41 }
 0x48f   :  { %5678 = vmatmul.mubr.msk.f32.vlgmr.msra.gmra.mxu1 %vm243_vm1, %v437_v30 }
 0x490   :  { %5688 = vmatpush3.msra.mxu1 %v232_v41 }
 0x491   :  { %5689 = vmatprep.subr.mxu1 %v231_v42 }
 0x492   :  { %5690 = vmatpush3.msra.mxu1 %v231_v42 }
 0x547   :  { %v6551_v31 = vpop.f32.mrf.mxu1 }
 0x549   :  { %v6553_v32 = vpop.f32.mrf.mxu1 }
 0x54f   :  { %v5679_v33 = vpop.f32.mrf.mxu1 }
 0x550   :  { %v526_v34 = vmul.f32 0.25, %v5679_v33 }
 0x551   :  { %v516_v35 = vpop.f32.mrf.mxu1 }
 0x552   :  { %v525_v36 = vmul.f32 0.25, %v516_v35  ;;  %v528_v37 = vadd.f32 %v526_v34, %v6522_v1 }
 0x554   :  { %v532_v38 = vsel %vm243_vm1, %v528_v37, -inf  ;;  %v527_v39 = vadd.f32 %v525_v36, %v6527_v4 }
 0x555   :  { %533 = vmax.xlane.f32.xlu1 %v532_v38 }
 0x556   :  { %v529_v40 = vsel %vm243_vm1, %v527_v39, -inf }
 0x557   :  { %530 = vmax.xlane.f32.xlu0 %v529_v40 }
 0x566   :  { %553 = vrot.lane.b32.xlu1 %v6512_v63, %s7598_s23 }
 0x56a   :  { %808 = vrot.lane.b32.xlu1 %v6498_v56, %s7596_s26 }
 0x56e   :  { %806 = vrot.lane.b32.xlu1 %v6492_v53, %s7596_s26 }
 0x572   :  { %804 = vrot.lane.b32.xlu1 %v6498_v56, %s7594_s28 }
 0x576   :  { %1093 = vrot.lane.b32.xlu1 %v6492_v53, %s7592_s29 }
 0x57a   :  { %1091 = vrot.lane.b32.xlu1 %v6498_v56, %s7590_s30 }
 0x5de   :  { %v534_v44 = vpop.xlane.xlu1 %533 }
 0x5df   :  { %v536_v45 = vsub.f32 %v528_v37, %v534_v44 }
 0x5e0   :  { %v531_v47 = vpop.xlane.xlu0 %530 }
 0x5e1   :  { %v539_v48 = vmul.f32 1.442695, %v536_v45  ;;  %v535_v50 = vsub.f32 %v527_v39, %v531_v47 }
 0x5e2   :  { %v554_v51 = vpop.permute.xlu1 %553 }
 0x5e3   :  { %6166 = vpow2.f32 %v539_v48  ;;  %v537_v52 = vmul.f32 1.442695, %v535_v50 }
 0x5e5   :  { %6168 = vpow2.f32 %v537_v52 }
 0x5e6   :  { %v809_v54 = vpop.permute.xlu1 %808 }
 0x5e7   :  { %5701 = vmatprep.subr.msk.mxu1 %vm243_vm1, %v809_v54 }
 0x5ea   :  { %v807_v10 = vpop.permute.xlu1 %806 }
 0x5ee   :  { %v805_v13 = vpop.permute.xlu1 %804 }
 0x5f0   :  { %v6167_v55 = vpop.eup %6166 }
 0x5f1   :  { %v544_v58 = vsel %vm243_vm1, %v6167_v55, 0.0 }
 0x5f2   :  { %v6169_v59 = vpop.eup %6168  ;;  %545 = vadd.xlane.f32.xlu0 %v544_v58  ;;  %v1094_v15 = vpop.permute.xlu1 %1093 }
 0x5f3   :  { %v541_v60 = vsel %vm243_vm1, %v6169_v59, 0.0 }
 0x5f6   :  { %542 = vadd.xlane.f32.xlu0 %v541_v60  ;;  %v1092_v16 = vpop.permute.xlu1 %1091 }
 0x60c   :  { %555 = vrot.lane.b32.xlu0 %v6508_v62, %s7598_s23  ;;  %s7620_s23 = smov 112  }
 0x610   :  { %802 = vrot.lane.b32.xlu0 %v6492_v53, %s7594_s28 }
 0x614   :  { %1095 = vrot.lane.b32.xlu0 %v6498_v56, %s7592_s29 }
 0x618   :  { %1089 = vrot.lane.b32.xlu0 %v6492_v53, %s7590_s30  ;;  %v229_v53 = vld [vmem:[%s7570_s6] sm:$0xff] }
 0x67b   :  { %v546_v61 = vpop.xlane.xlu0 %545 }
 0x67c   :  { %6170 = vrcp.f32 %v546_v61 }
 0x67f   :  { %v543_v0 = vpop.xlane.xlu0 %542 }
 0x680   :  { %6172 = vrcp.f32 %v543_v0 }
 0x683   :  { %v556_v2 = vpop.permute.xlu0 %555 }
 0x684   :  { %5680 = vmatprep.subr.mxu0 %v556_v2 }
 0x685   :  { %5681 = vmatpush3.msra.mxu0 %v556_v2 }
 0x686   :  { %5682 = vmatprep.subr.mxu0 %v554_v51 }
 0x687   :  { %5683 = vmatpush3.msra.mxu0 %v554_v51  ;;  %v803_v8 = vpop.permute.xlu0 %802 }
 0x688   :  { %5694 = vmatprep.subr.mxu0 %v230_v3 }
 0x689   :  { %v6171_v5 = vpop.eup %6170 }
 0x68a   :  { %v550_v7 = vmul.f32 %v6171_v5, %v6167_v55 }
 0x68b   :  { %v1096_v12 = vpop.permute.xlu0 %1095 }
 0x68d   :  { %v6173_v6 = vpop.eup %6172 }
 0x68e   :  { %v549_v56 = vmul.f32 %v6173_v6, %v6169_v59 }
 0x68f   :  { %v1090_v14 = vpop.permute.xlu0 %1089 }
 0x690   :  { %5684 = vmatprep.mubr.msk.f32.mxu0 %vm243_vm1, %v549_v56 }
 0x691   :  { %5685 = vmatmul.mubr.msk.f32.vlgmr.msra.gmra.mxu0 %vm243_vm1, %v550_v7 }
 0x692   :  { %5695 = vmatpush3.msra.mxu0 %v230_v3  ;;  %5698 = vmatprep.mubr.msk.f32.mxu0 %vm243_vm1, %v6553_v32 }
 0x693   :  { %5696 = vmatprep.subr.mxu0 %v229_v53 }
 0x694   :  { %5697 = vmatpush3.msra.mxu0 %v229_v53 }
 0x695   :  { %5699 = vmatmul.mubr.msk.f32.vlgmr.msra.gmra.mxu0 %vm243_vm1, %v6551_v31 }
 0x751   :  { %v5686_v9 = vpop.f32.mrf.mxu0 }
 0x753   :  { %v631_v11 = vpop.f32.mrf.mxu0 }
 0x754   :  { %5691 = vmatprep.mubr.msk.f32.mxu1 %vm243_vm1, %v631_v11 }
 0x755   :  { %5692 = vmatmul.mubr.msk.f32.vlgmr.msra.gmra.mxu1 %vm243_vm1, %v5686_v9  ;;  %v5700_v9 = vpop.f32.mrf.mxu0 }
 0x756   :  { %5702 = vmatpush3.xpose.msk.msra.mxu1 %vm243_vm1, %v809_v54  ;;  %5705 = vmatprep.mubr.msk.f32.mxu1 %vm243_vm1, %v803_v8 }
 0x757   :  { %5703 = vmatprep.subr.msk.mxu1 %vm243_vm1, %v807_v10 }
 0x75a   :  { %5704 = vmatpush3.xpose.msk.msra.mxu1 %vm243_vm1, %v807_v10  ;;  %v793_v10 = vpop.f32.mrf.mxu0 }
 0x75b   :  { %5722 = vmatprep.subr.msk.mxu1 %vm243_vm1, %v1096_v12 }
 0x75d   :  { %5706 = vmatmul.mubr.msk.f32.vlgmr.msra.gmra.mxu1 %vm243_vm1, %v805_v13 }
 0x75e   :  { %5723 = vmatpush3.xpose.msk.msra.mxu1 %vm243_vm1, %v1096_v12  ;;  %5726 = vmatprep.mubr.msk.f32.mxu1 %vm243_vm1, %v1090_v14 }
 0x75f   :  { %5724 = vmatprep.subr.msk.mxu1 %vm243_vm1, %v1094_v15 }
 0x762   :  { %5725 = vmatpush3.xpose.msk.msra.mxu1 %vm243_vm1, %v1094_v15 }
 0x765   :  { %5727 = vmatmul.mubr.msk.f32.vlgmr.msra.gmra.mxu1 %vm243_vm1, %v1092_v16 }
 0x815   :  { %v6613_v17 = vpop.f32.mrf.mxu1 }
 0x817   :  { %v6615_v18 = vpop.f32.mrf.mxu1 }
 0x81d   :  { %v5707_v20 = vpop.f32.mrf.mxu1 }
 0x81e   :  { %v894_v21 = vmul.f32 0.25, %v5707_v20 }
 0x81f   :  { %v884_v22 = vpop.f32.mrf.mxu1 }
 0x820   :  { %v893_v23 = vmul.f32 0.25, %v884_v22  ;;  %v896_v24 = vadd.f32 %v894_v21, %v6522_v1  ;;  %v236_v21 = vld [vmem:[%s7570_s6 + $0x38] sm:$0xff]  ;;  %v235_v22 = vld [vmem:[%s7570_s6 + $0x30] sm:$0xff] }
 0x822   :  { %v900_v25 = vsel %vm243_vm1, %v896_v24, -inf  ;;  %v895_v26 = vadd.f32 %v893_v23, %v6527_v4  ;;  %v799_v23 = vadd.f32 %v5700_v9, %v6613_v17  ;;  %v5182_v9 = vld [vmem:[%s7574_s9] ss:$0 sm:$0xff] }
 0x823   :  { %901 = vmax.xlane.f32.xlu1 %v900_v25  ;;  %v794_v25 = vadd.f32 %v793_v10, %v6615_v18 }
 0x824   :  { %v897_v27 = vsel %vm243_vm1, %v895_v26, -inf }
 0x825   :  { %898 = vmax.xlane.f32.xlu0 %v897_v27  ;;  %v5728_v28 = vpop.f32.mrf.mxu1 }
 0x826   :  { %v1181_v48 = vmul.f32 0.25, %v5728_v28 }
 0x827   :  { %v1171_v29 = vpop.f32.mrf.mxu1 }
 0x828   :  { %v1180_v30 = vmul.f32 0.25, %v1171_v29  ;;  %v1183_v50 = vadd.f32 %v1181_v48, %v6522_v1  ;;  %v234_v1 = vld [vmem:[%s7570_s6 + $0x28] sm:$0xff] }
 0x82a   :  { %v1182_v31 = vadd.f32 %v1180_v30, %v6527_v4  ;;  %v1187_v51 = vsel %vm243_vm1, %v1183_v50, -inf }
 0x82c   :  { %v1184_v32 = vsel %vm243_vm1, %v1182_v31, -inf }
 0x834   :  { %919 = vrot.lane.b32.xlu1 %v6512_v63, %s7594_s28 }
 0x858   :  { %1185 = vmax.xlane.f32.xlu1 %v1184_v32  ;;  %v5180_v32 = vld [vmem:[%s7571_s7] ss:$0 sm:$0xff] }
 0x8ac   :  { %v902_v33 = vpop.xlane.xlu1 %901 }
 0x8ad   :  { %v904_v34 = vsub.f32 %v896_v24, %v902_v33 }
 0x8ae   :  { %v899_v35 = vpop.xlane.xlu0 %898 }
 0x8af   :  { %v907_v36 = vmul.f32 1.442695, %v904_v34  ;;  %v903_v37 = vsub.f32 %v895_v26, %v899_v35 }
 0x8b0   :  { %v920_v4 = vpop.permute.xlu1 %919 }
 0x8b1   :  { %6174 = vpow2.f32 %v907_v36  ;;  %v905_v38 = vmul.f32 1.442695, %v903_v37 }
 0x8b3   :  { %6176 = vpow2.f32 %v905_v38 }
 0x8be   :  { %v6175_v39 = vpop.eup %6174 }
 0x8bf   :  { %v912_v40 = vsel %vm243_vm1, %v6175_v39, 0.0 }
 0x8c0   :  { %v6177_v41 = vpop.eup %6176  ;;  %913 = vadd.xlane.f32.xlu0 %v912_v40 }
 0x8c1   :  { %v909_v42 = vsel %vm243_vm1, %v6177_v41, 0.0 }
 0x8c4   :  { %910 = vadd.xlane.f32.xlu0 %v909_v42 }
 0x8da   :  { %921 = vrot.lane.b32.xlu0 %v6508_v62, %s7594_s28  ;;  %s7624_s28 = smov 80  }
 0x8e1   :  { %v1186_v44 = vpop.xlane.xlu1 %1185 }
 0x8e2   :  { %v1190_v45 = vsub.f32 %v1182_v31, %v1186_v44 }
 0x8e4   :  { %v1192_v47 = vmul.f32 1.442695, %v1190_v45 }
 0x8e6   :  { %6178 = vpow2.f32 %v1192_v47 }
 0x8f3   :  { %v6179_v52 = vpop.eup %6178 }
 0x8f4   :  { %v1196_v54 = vsel %vm243_vm1, %v6179_v52, 0.0 }
 0x8f9   :  { %1188 = vmax.xlane.f32.xlu0 %v1187_v51  ;;  %v1437_v51 = vld [vmem:[%s7572_s10 + $0x30] sm:$0xff] }
 0x8fd   :  { %1197 = vadd.xlane.f32.xlu0 %v1196_v54  ;;  %v1435_v54 = vld [vmem:[%s7572_s10 + $0x20] sm:$0xff] }
 0x913   :  { %1208 = vrot.lane.b32.xlu0 %v6508_v62, %s7590_s30  ;;  %v233_v62 = vld [vmem:[%s7570_s6 + $0x20] sm:$0xff] }
 0x949   :  { %v914_v55 = vpop.xlane.xlu0 %913 }
 0x94a   :  { %6180 = vrcp.f32 %v914_v55  ;;  %v1434_v55 = vld [vmem:[%s7572_s10 + $0x18] sm:$0xff] }
 0x94d   :  { %v911_v58 = vpop.xlane.xlu0 %910 }
 0x94e   :  { %6182 = vrcp.f32 %v911_v58  ;;  %v1433_v58 = vld [vmem:[%s7572_s10 + $0x10] sm:$0xff] }
 0x951   :  { %v922_v59 = vpop.permute.xlu0 %921 }
 0x952   :  { %5708 = vmatprep.subr.mxu0 %v922_v59 }
 0x953   :  { %5709 = vmatpush3.msra.mxu0 %v922_v59  ;;  %v1432_v59 = vld [vmem:[%s7572_s10 + $0x8] sm:$0xff] }
 0x954   :  { %5710 = vmatprep.subr.mxu0 %v920_v4 }
 0x955   :  { %5711 = vmatpush3.msra.mxu0 %v920_v4 }
 0x956   :  { %5715 = vmatprep.subr.mxu0 %v234_v1 }
 0x957   :  { %v6181_v60 = vpop.eup %6180 }
 0x958   :  { %v918_v2 = vmul.f32 %v6181_v60, %v6175_v39 }
 0x95b   :  { %v6183_v61 = vpop.eup %6182 }
 0x95c   :  { %v917_v0 = vmul.f32 %v6183_v61, %v6177_v41 }
 0x95e   :  { %5712 = vmatprep.mubr.msk.f32.mxu0 %vm243_vm1, %v917_v0 }
 0x95f   :  { %5713 = vmatmul.mubr.msk.f32.vlgmr.msra.gmra.mxu0 %vm243_vm1, %v918_v2 }
 0x960   :  { %5716 = vmatpush3.msra.mxu0 %v234_v1  ;;  %v1431_v1 = vld [vmem:[%s7572_s10] sm:$0xff] }
 0x961   :  { %5717 = vmatprep.subr.mxu0 %v233_v62 }
 0x962   :  { %5718 = vmatpush3.msra.mxu0 %v233_v62 }
 0x982   :  { %v1189_v3 = vpop.xlane.xlu0 %1188 }
 0x983   :  { %v1191_v5 = vsub.f32 %v1183_v50, %v1189_v3 }
 0x985   :  { %v1194_v6 = vmul.f32 1.442695, %v1191_v5 }
 0x986   :  { %v1198_v56 = vpop.xlane.xlu0 %1197 }
 0x987   :  { %6184 = vpow2.f32 %v1194_v6  ;;  %v5181_v6 = vld [vmem:[%s7573_s8] ss:$0 sm:$0xff] }
 0x988   :  { %6186 = vrcp.f32 %v1198_v56 }
 0x98a   :  { %v1209_v7 = vpop.permute.xlu0 %1208 }
 0x98b   :  { %5729 = vmatprep.subr.mxu0 %v1209_v7 }
 0x994   :  { %v6185_v53 = vpop.eup %6184 }
 0x995   :  { %v1199_v8 = vsel %vm243_vm1, %v6185_v53, 0.0  ;;  %v6187_v11 = vpop.eup %6186 }
 0x996   :  { %1200 = vadd.xlane.f32.xlu1 %v1199_v8  ;;  %v1204_v15 = vmul.f32 %v6187_v11, %v6179_v52  ;;  %v1436_v52 = vld [vmem:[%s7572_s10 + $0x28] sm:$0xff] }
 0x9a7   :  { %1206 = vrot.lane.b32.xlu1 %v6512_v63, %s7590_s30  ;;  %s7622_s30 = smov 96  }
 0xa1f   :  { %v5714_v12 = vpop.f32.mrf.mxu0  ;;  %v1201_v13 = vpop.xlane.xlu1 %1200 }
 0xa20   :  { %6188 = vrcp.f32 %v1201_v13  ;;  %v1560_v13 = vld [vmem:[%s7575_s12 + $0x78] sm:$0xff] }
 0xa21   :  { %v997_v14 = vpop.f32.mrf.mxu0 }
 0xa22   :  { %5719 = vmatprep.mubr.msk.f32.mxu0 %vm243_vm1, %v997_v14  ;;  %v1559_v14 = vld [vmem:[%s7575_s12 + $0x70] sm:$0xff] }
 0xa23   :  { %5720 = vmatmul.mubr.msk.f32.vlgmr.msra.gmra.mxu0 %vm243_vm1, %v5714_v12  ;;  %v1207_v16 = vpop.permute.xlu1 %1206 }
 0xa24   :  { %5730 = vmatpush3.msra.mxu0 %v1209_v7  ;;  %5733 = vmatprep.mubr.msk.f32.mxu0 %vm243_vm1, %v1204_v15  ;;  %v1558_v15 = vld [vmem:[%s7575_s12 + $0x68] sm:$0xff] }
 0xa25   :  { %5731 = vmatprep.subr.mxu0 %v1207_v16 }
 0xa26   :  { %5732 = vmatpush3.msra.mxu0 %v1207_v16  ;;  %v1557_v16 = vld [vmem:[%s7575_s12 + $0x60] sm:$0xff] }
 0xa27   :  { %5736 = vmatprep.subr.mxu0 %v236_v21 }
 0xa2d   :  { %v6189_v63 = vpop.eup %6188 }
 0xa2e   :  { %v1205_v20 = vmul.f32 %v6189_v63, %v6185_v53  ;;  %v1556_v63 = vld [vmem:[%s7575_s12 + $0x58] sm:$0xff] }
 0xa30   :  { %5734 = vmatmul.mubr.msk.f32.vlgmr.msra.gmra.mxu0 %vm243_vm1, %v1205_v20  ;;  %v1555_v20 = vld [vmem:[%s7575_s12 + $0x50] sm:$0xff] }
 0xa31   :  { %5737 = vmatpush3.msra.mxu0 %v236_v21  ;;  %v1554_v21 = vld [vmem:[%s7575_s12 + $0x48] sm:$0xff] }
 0xa32   :  { %5738 = vmatprep.subr.mxu0 %v235_v22 }
 0xa33   :  { %5739 = vmatpush3.msra.mxu0 %v235_v22  ;;  %v1553_v22 = vld [vmem:[%s7575_s12 + $0x40] sm:$0xff] }
 0xa34   :  { %5762 = vmatprep.subr.mxu0 %v1560_v13 }
 0xae3   :  { %v5721_v24 = vpop.f32.mrf.mxu0 }
 0xae4   :  { %v1088_v26 = vadd.f32 %v5721_v24, %v799_v23  ;;  %v1552_v23 = vld [vmem:[%s7575_s12 + $0x38] sm:$0xff]  ;;  %v1551_v24 = vld [vmem:[%s7575_s12 + $0x30] sm:$0xff] }
 0xae5   :  { %v1078_v27 = vpop.f32.mrf.mxu0 }
 0xae6   :  { %v1087_v28 = vadd.f32 %v1078_v27, %v794_v25  ;;  %v1550_v25 = vld [vmem:[%s7575_s12 + $0x28] sm:$0xff]  ;;  %v1548_v27 = vld [vmem:[%s7575_s12 + $0x18] sm:$0xff] }
 0xaf0   :  { %v5735_v29 = vpop.f32.mrf.mxu0 }
 0xaf2   :  { %v1284_v30 = vpop.f32.mrf.mxu0 }
 0xaf3   :  { %5740 = vmatprep.mubr.msk.f32.mxu0 %vm243_vm1, %v1284_v30  ;;  %v1545_v30 = vld [vmem:[%s7575_s12] sm:$0xff] }
 0xaf4   :  { %5741 = vmatmul.mubr.msk.f32.vlgmr.msra.gmra.mxu0 %vm243_vm1, %v5735_v29  ;;  %v1546_v29 = vld [vmem:[%s7575_s12 + $0x8] sm:$0xff] }
 0xaf5   :  { %5763 = vmatpush3.msra.mxu0 %v1560_v13  ;;  %v5201_v13 = vld [vmem:[%s7615_s0 + $0xe0] sm:$0xff] }
 0xaf6   :  { %5764 = vmatprep.subr.mxu0 %v1559_v14 }
 0xaf7   :  { %5765 = vmatpush3.msra.mxu0 %v1559_v14  ;;  %v5200_v14 = vld [vmem:[%s7615_s0 + $0xd8] sm:$0xff] }
 0xaf8   :  { %5766 = vmatprep.subr.mxu0 %v1558_v15 }
 0xaf9   :  { %5767 = vmatpush3.msra.mxu0 %v1558_v15  ;;  %v5199_v15 = vld [vmem:[%s7615_s0 + $0xd0] sm:$0xff] }
 0xafa   :  { %5768 = vmatprep.subr.mxu0 %v1557_v16 }
 0xafb   :  { %5769 = vmatpush3.msra.mxu0 %v1557_v16  ;;  %v5198_v16 = vld [vmem:[%s7615_s0 + $0xc8] sm:$0xff] }
 0xafc   :  { %5770 = vmatprep.subr.mxu0 %v1556_v63 }
 0xafd   :  { %5771 = vmatpush3.msra.mxu0 %v1556_v63  ;;  %v5197_v63 = vld [vmem:[%s7615_s0 + $0xc0] sm:$0xff] }
 0xafe   :  { %5772 = vmatprep.subr.mxu0 %v1555_v20 }
 0xaff   :  { %5773 = vmatpush3.msra.mxu0 %v1555_v20  ;;  %v5196_v20 = vld [vmem:[%s7615_s0 + $0xb8] sm:$0xff] }
 0xb00   :  { %5774 = vmatprep.subr.mxu0 %v1554_v21 }
 0xb01   :  { %5775 = vmatpush3.msra.mxu0 %v1554_v21  ;;  %v5195_v21 = vld [vmem:[%s7615_s0 + $0xb0] sm:$0xff] }
 0xb02   :  { %5776 = vmatprep.subr.mxu0 %v1553_v22 }
 0xb03   :  { %5777 = vmatpush3.msra.mxu0 %v1553_v22  ;;  %v5194_v22 = vld [vmem:[%s7615_s0 + $0xa8] sm:$0xff] }
 0xb04   :  { %5778 = vmatprep.subr.mxu0 %v1552_v23 }
 0xb05   :  { %5779 = vmatpush3.msra.mxu0 %v1552_v23  ;;  %v5193_v23 = vld [vmem:[%s7615_s0 + $0xa0] sm:$0xff] }
 0xb06   :  { %5780 = vmatprep.subr.mxu0 %v1551_v24 }
 0xb07   :  { %5781 = vmatpush3.msra.mxu0 %v1551_v24  ;;  %v5192_v24 = vld [vmem:[%s7615_s0 + $0x98] sm:$0xff] }
 0xb08   :  { %5782 = vmatprep.subr.mxu0 %v1550_v25 }
 0xb09   :  { %5783 = vmatpush3.msra.mxu0 %v1550_v25  ;;  %v5191_v25 = vld [vmem:[%s7615_s0 + $0x90] sm:$0xff] }
 0xbb4   :  { %v5742_v31 = vpop.f32.mrf.mxu0 }
 0xbb5   :  { %v1375_v33 = vadd.f32 %v5742_v31, %v1088_v26  ;;  %v1549_v26 = vld [vmem:[%s7575_s12 + $0x20] sm:$0xff] }
 0xbb6   :  { %v1365_v34 = vpop.f32.mrf.mxu0  ;;  %5784 = vmatprep.subr.mxu0 %v1549_v26  ;;  %v5183_v31 = vld [vmem:[%s7576_s11] ss:$0 sm:$0xff] }
 0xbb7   :  { %v1384_v17 = vadd.f32 %v5180_v32, %v1375_v33  ;;  %v1374_v35 = vadd.f32 %v1365_v34, %v1087_v28  ;;  %5785 = vmatpush3.msra.mxu0 %v1549_v26  ;;  %v1547_v28 = vld [vmem:[%s7575_s12 + $0x10] sm:$0xff]  ;;  %v5190_v26 = vld [vmem:[%s7615_s0 + $0x88] sm:$0xff] }
 0xbb8   :  { %5786 = vmatprep.subr.mxu0 %v1548_v27 }
 0xbb9   :  { %v1383_v36 = vadd.f32 %v5180_v32, %v1374_v35  ;;  %v1386_v18 = vadd.f32 %v1384_v17, %v6482_v46  ;;  %5787 = vmatpush3.msra.mxu0 %v1548_v27  ;;  %v5189_v27 = vld [vmem:[%s7615_s0 + $0x80] sm:$0xff] }
 0xbba   :  { %5788 = vmatprep.subr.mxu0 %v1547_v28 }
 0xbbb   :  { %v1392_v37 = vsel %vm74_vm0, %v1386_v18, 0.0  ;;  %v1385_v38 = vadd.f32 %v1383_v36, %v6477_v43  ;;  %v1438_v43 = vld [vmem:[%s7572_s10 + $0x38] sm:$0xff]  ;;  %5789 = vmatpush3.msra.mxu0 %v1547_v28 }
 0xbbc   :  { %1393 = vadd.xlane.f32.xlu0 %v1392_v37  ;;  %5743 = vmatprep.subr.mxu1 %v1438_v43 }
 0xbbd   :  { %v1389_v39 = vsel %vm74_vm0, %v1385_v38, 0.0  ;;  %5744 = vmatpush3.msra.mxu1 %v1438_v43  ;;  %5790 = vmatprep.subr.mxu0 %v1546_v29 }
 0xbbe   :  { %1390 = vadd.xlane.f32.xlu1 %v1389_v39  ;;  %5745 = vmatprep.subr.mxu1 %v1437_v51 }
 0xbbf   :  { %5746 = vmatpush3.msra.mxu1 %v1437_v51  ;;  %5791 = vmatpush3.msra.mxu0 %v1546_v29 }
 0xbc0   :  { %5747 = vmatprep.subr.mxu1 %v1436_v52  ;;  %5792 = vmatprep.subr.mxu0 %v1545_v30 }
 0xbc1   :  { %5748 = vmatpush3.msra.mxu1 %v1436_v52  ;;  %5793 = vmatpush3.msra.mxu0 %v1545_v30  ;;  %v5186_v52 = vld [vmem:[%s7577_s13] ss:$0 sm:$0xff] }
 0xbc2   :  { %5749 = vmatprep.subr.mxu1 %v1435_v54 }
 0xbc3   :  { %5750 = vmatpush3.msra.mxu1 %v1435_v54 }
 0xbc4   :  { %5751 = vmatprep.subr.mxu1 %v1434_v55 }
 0xbc5   :  { %5752 = vmatpush3.msra.mxu1 %v1434_v55 }
 0xbc6   :  { %5753 = vmatprep.subr.mxu1 %v1433_v58 }
 0xbc7   :  { %5754 = vmatpush3.msra.mxu1 %v1433_v58 }
 0xbc8   :  { %5755 = vmatprep.subr.mxu1 %v1432_v59 }
 0xbc9   :  { %5756 = vmatpush3.msra.mxu1 %v1432_v59 }
 0xbca   :  { %5757 = vmatprep.subr.mxu1 %v1431_v1 }
 0xbcb   :  { %5758 = vmatpush3.msra.mxu1 %v1431_v1 }
 0xc45   :  { %v1394_v40 = vpop.xlane.xlu0 %1393 }
 0xc46   :  { %v1396_v41 = vmul.f32 0.015625, %v1394_v40 }
 0xc47   :  { %v1391_v42 = vpop.xlane.xlu1 %1390 }
 0xc48   :  { %v1398_v4 = vsub.f32 %v1386_v18, %v1396_v41  ;;  %v1395_v44 = vmul.f32 0.015625, %v1391_v42 }
 0xc4a   :  { %v1397_v45 = vsub.f32 %v1385_v38, %v1395_v44  ;;  %v1400_v47 = vmul.f32 %v1398_v4, %v1398_v4 }
 0xc4c   :  { %v1404_v48 = vsel %vm74_vm0, %v1400_v47, 0.0  ;;  %v1399_v50 = vmul.f32 %v1397_v45, %v1397_v45 }
 0xc4d   :  { %1405 = vadd.xlane.f32.xlu1 %v1404_v48 }
 0xc4e   :  { %v1401_v46 = vsel %vm74_vm0, %v1399_v50, 0.0 }
 0xc4f   :  { %1402 = vadd.xlane.f32.xlu0 %v1401_v46 }
 0xcd6   :  { %v1406_v60 = vpop.xlane.xlu1 %1405 }
 0xcd7   :  { %v1408_v61 = vmul.f32 0.015625, %v1406_v60 }
 0xcd8   :  { %v1403_v0 = vpop.xlane.xlu0 %1402 }
 0xcd9   :  { %v1410_v2 = vadd.f32 1e-12, %v1408_v61  ;;  %v1407_v62 = vmul.f32 0.015625, %v1403_v0 }
 0xcdb   :  { %6190 = vrsqrt.f32 %v1410_v2  ;;  %v1409_v3 = vadd.f32 1e-12, %v1407_v62 }
 0xcdd   :  { %6192 = vrsqrt.f32 %v1409_v3 }
 0xce8   :  { %v6191_v5 = vpop.eup %6190 }
 0xce9   :  { %v1414_v56 = vmul.f32 %v6191_v5, %v1398_v4 }
 0xcea   :  { %v6193_v7 = vpop.eup %6192 }
 0xceb   :  { %v1413_v53 = vmul.f32 %v6193_v7, %v1397_v45  ;;  %v1422_v8 = vmul.f32 %v5181_v6, %v1414_v56 }
 0xced   :  { %v1421_v10 = vmul.f32 %v5181_v6, %v1413_v53  ;;  %v6700_v12 = vadd.f32 %v5182_v9, %v1422_v8 }
 0xcef   :  { %v6698_v11 = vadd.f32 %v5182_v9, %v1421_v10  ;;  %v5204_v10 = vld [vmem:[%s7615_s0 + $0xf8] sm:$0xff] }
 0xcf0   :  { %1741 = vmatprep.subr.mxu1 %v5204_v10 }
 0xcf1   :  { %5759 = vmatprep.mubr.msk.f32.mxu1 %vm74_vm0, %v6698_v11 }
 0xcf2   :  { %5760 = vmatmul.mubr.msk.f32.vlgmr.msra.gmra.mxu1 %vm74_vm0, %v6700_v12 }
 0xcf3   :  { %1789 = vmatprep.mubr.f32.mxu1 %v6294_v19 }
 0xdb2   :  { %v5761_v32 = vpop.f32.mrf.mxu1 }
 0xdb3   :  { %v1524_v33 = vadd.f32 %v5761_v32, %v5183_v31 }
 0xdb4   :  { %v1518_v34 = vpop.f32.mrf.mxu1 }
 0xdb5   :  { %v1528_v17 = vmul.f32 %v1524_v33, %v1524_v33  ;;  %v1519_v35 = vadd.f32 %v5183_v31, %v1518_v34 }
 0xdb7   :  { %v1530_v36 = vmul.f32 %v1528_v17, %v1524_v33  ;;  %v1527_v18 = vmul.f32 %v1519_v35, %v1519_v35 }
 0xdb9   :  { %v1532_v37 = vmul.f32 0.044715, %v1530_v36  ;;  %v1529_v38 = vmul.f32 %v1527_v18, %v1519_v35  ;;  %v5187_v18 = vld [vmem:[%s7578_s14] ss:$0 sm:$0xff] }
 0xdbb   :  { %v1534_v39 = vadd.f32 %v1532_v37, %v1524_v33  ;;  %v1531_v40 = vmul.f32 0.044715, %v1529_v38  ;;  %v5188_v38 = vld [vmem:[%s7579_s15] ss:$0 sm:$0xff] }
 0xdbd   :  { %v1536_v41 = vmul.f32 0.7978846, %v1534_v39  ;;  %v1533_v42 = vadd.f32 %v1531_v40, %v1519_v35 }
 0xdbf   :  { %6194 = vtanh.f32 %v1536_v41  ;;  %v1535_v4 = vmul.f32 0.7978846, %v1533_v42  ;;  %v5205_v42 = vld [vmem:[%s7618_s27 + $0x2] sm:$0x3] }
 0xdc1   :  { %6196 = vtanh.f32 %v1535_v4  ;;  %v1712_v4 = vrot.slane %v5205_v42, %v6486_v49 }
 0xdcc   :  { %v6195_v44 = vpop.eup %6194 }
 0xdcd   :  { %v1540_v45 = vadd.f32 1.0, %v6195_v44 }
 0xdce   :  { %v6197_v47 = vpop.eup %6196 }
 0xdcf   :  { %v1539_v48 = vadd.f32 1.0, %v6197_v47  ;;  %v1542_v50 = vmul.f32 0.5, %v1540_v45 }
 0xdd1   :  { %v1541_v46 = vmul.f32 0.5, %v1539_v48  ;;  %v1544_v51 = vmul.f32 %v1542_v50, %v1524_v33  ;;  %v1716_v50 = vrot.slane %v5205_v42, %v6502_v57 }
 0xdd3   :  { %v1543_v43 = vmul.f32 %v1541_v46, %v1519_v35 }
 0xdd5   :  { %5794 = vmatprep.mubr.f32.mxu0 %v1543_v43 }
 0xdd6   :  { %5795 = vmatmul.mubr.f32.vlgmr.msra.gmra.mxu0 %v1544_v51 }
 0xe96   :  { %v5796_v54 = vpop.f32.mrf.mxu0 }
 0xe97   :  { %v1640_v55 = vadd.f32 %v5796_v54, %v5186_v52 }
 0xe98   :  { %v1634_v58 = vpop.f32.mrf.mxu0 }
 0xe99   :  { %v1635_v59 = vadd.f32 %v5186_v52, %v1634_v58  ;;  %v1644_v1 = vadd.f32 %v1640_v55, %v6700_v12  ;;  %v5202_v12 = vld [vmem:[%s7615_s0 + $0xe8] sm:$0xff] }
 0xe9b   :  { %v1650_v60 = vsel %vm74_vm0, %v1644_v1, 0.0  ;;  %v1643_v61 = vadd.f32 %v1635_v59, %v6698_v11  ;;  %v5203_v11 = vld [vmem:[%s7615_s0 + $0xf0] sm:$0xff] }
 0xe9c   :  { %1651 = vadd.xlane.f32.xlu1 %v1650_v60  ;;  %1742 = vmatpush1.msra.mxu1 %v5203_v11 }
 0xe9d   :  { %v1647_v0 = vsel %vm74_vm0, %v1643_v61, 0.0  ;;  %1743 = vmatprep.subr.mxu1 %v5202_v12 }
 0xe9e   :  { %1648 = vadd.xlane.f32.xlu0 %v1647_v0  ;;  %1744 = vmatpush1.msra.mxu1 %v5201_v13 }
 0xe9f   :  { %1745 = vmatprep.subr.mxu1 %v5200_v14 }
 0xea0   :  { %1746 = vmatpush1.msra.mxu1 %v5199_v15 }
 0xea1   :  { %1747 = vmatprep.subr.mxu1 %v5198_v16 }
 0xea2   :  { %1748 = vmatpush1.msra.mxu1 %v5197_v63 }
 0xea3   :  { %1749 = vmatprep.subr.mxu1 %v5196_v20 }
 0xea4   :  { %1750 = vmatpush1.msra.mxu1 %v5195_v21 }
 0xea5   :  { %1751 = vmatprep.subr.mxu1 %v5194_v22 }
 0xea6   :  { %1752 = vmatpush1.msra.mxu1 %v5193_v23 }
 0xea7   :  { %1753 = vmatprep.subr.mxu1 %v5192_v24 }
 0xea8   :  { %1754 = vmatpush1.msra.mxu1 %v5191_v25 }
 0xea9   :  { %1755 = vmatprep.subr.mxu1 %v5190_v26 }
 0xeaa   :  { %1756 = vmatpush1.msra.mxu1 %v5189_v27 }
 0xf25   :  { %v1652_v2 = vpop.xlane.xlu1 %1651 }
 0xf26   :  { %v1654_v62 = vmul.f32 0.015625, %v1652_v2 }
 0xf27   :  { %v1649_v3 = vpop.xlane.xlu0 %1648 }
 0xf28   :  { %v1656_v5 = vsub.f32 %v1644_v1, %v1654_v62  ;;  %v1653_v6 = vmul.f32 0.015625, %v1649_v3 }
 0xf2a   :  { %v1655_v56 = vsub.f32 %v1643_v61, %v1653_v6  ;;  %v1658_v7 = vmul.f32 %v1656_v5, %v1656_v5  ;;  %v6876_v6 = vld [vmem:[%s7619_s5 + $0x8] sm:$0xff] }
 0xf2c   :  { %v1662_v53 = vsel %vm74_vm0, %v1658_v7, 0.0  ;;  %v1657_v8 = vmul.f32 %v1655_v56, %v1655_v56 }
 0xf2d   :  { %1663 = vadd.xlane.f32.xlu1 %v1662_v53  ;;  %v6883_v53 = vld [vmem:[%s7619_s5] sm:$0xff] }
 0xf2e   :  { %v1659_v9 = vsel %vm74_vm0, %v1657_v8, 0.0 }
 0xf2f   :  { %1660 = vadd.xlane.f32.xlu0 %v1659_v9 }
 0xfb6   :  { %v1664_v28 = vpop.xlane.xlu1 %1663 }
 0xfb7   :  { %v1666_v29 = vmul.f32 0.015625, %v1664_v28 }
 0xfb8   :  { %v1661_v30 = vpop.xlane.xlu0 %1660 }
 0xfb9   :  { %v1668_v31 = vadd.f32 1e-12, %v1666_v29  ;;  %v1665_v32 = vmul.f32 0.015625, %v1661_v30 }
 0xfbb   :  { %6198 = vrsqrt.f32 %v1668_v31  ;;  %v1667_v33 = vadd.f32 1e-12, %v1665_v32  ;;  %v5211_v32 = vld [vmem:[%s7570_s6 + $0x58] sm:$0xff] }
 0xfbd   :  { %6200 = vrsqrt.f32 %v1667_v33 }
 0xfc8   :  { %v6199_v34 = vpop.eup %6198 }
 0xfc9   :  { %v1672_v36 = vmul.f32 %v6199_v34, %v1656_v5 }
 0xfca   :  { %v6201_v17 = vpop.eup %6200 }
 0xfcb   :  { %v1671_v35 = vmul.f32 %v6201_v17, %v1655_v56  ;;  %v1680_v40 = vmul.f32 %v5187_v18, %v1672_v36  ;;  %v5210_v36 = vld [vmem:[%s7570_s6 + $0x50] sm:$0xff] }
 0xfcd   :  { %v1679_v37 = vmul.f32 %v5187_v18, %v1671_v35  ;;  %v6826_v41 = vadd.f32 %v5188_v38, %v1680_v40 }
 0xfcf   :  { %v6821_v39 = vadd.f32 %v5188_v38, %v1679_v37 }
 0xfd1   :  { %5206 = vmatmul.mubr.msk.f32.vlgmr.msra.gmra.mxu1 %vm74_vm0, %v6821_v39 }
 0xfd2   :  { %1795 = vmatprep.mubr.f32.mxu1 %v6294_v19 }
 0xfd5   :  { %5207 = vmatmul.mubr.msk.f32.gmra.mxu1 %vm74_vm0, %v6826_v41 }
0x1091   :  { %v1791_v44 = vpop.f32.mrf.mxu1 }
0x1092   :  { %v6834_v45 = vadd.f32 %v1791_v44, %v1712_v4 }
0x1093   :  { %v1793_v47 = vpop.f32.mrf.mxu1 }
0x1094   :  { %1813 = vrot.lane.b32.xlu1 %v6834_v45, %s7602_s3  ;;  %5801 = vmatprep.mubr.msk.f32.mxu1 %vm243_vm1, %v6834_v45  ;;  %v6849_v52 = vadd.f32 %v1793_v47, %v1716_v50 }
0x1095   :  { %v1797_v48 = vpop.f32.mrf.mxu1 }
0x1096   :  { %v6841_v46 = vadd.f32 %v1797_v48, %v1712_v4 }
0x1097   :  { %v1799_v43 = vpop.f32.mrf.mxu1 }
0x1098   :  { %v6843_v51 = vadd.f32 %v1799_v43, %v1716_v50  ;;  %1815 = vrot.lane.b32.xlu0 %v6841_v46, %s7602_s3  ;;  %2013 = vrot.lane.b32.xlu1 %v6841_v46, %s7600_s22  ;;  %s7625_s3 = smov 64  }
0x109a   :  { %5804 = vmatprep.subr.mxu0 %v6843_v51 }
0x109b   :  { %5805 = vmatpush3.msra.mxu0 %v6843_v51 }
0x109c   :  { %5806 = vmatprep.subr.mxu0 %v6849_v52  ;;  %2007 = vrot.lane.b32.xlu0 %v6834_v45, %s7620_s23 }
0x109d   :  { %2011 = vrot.lane.b32.xlu1 %v6834_v45, %s7600_s22  ;;  %5807 = vmatpush3.msra.mxu0 %v6849_v52 }
0x10a1   :  { %2009 = vrot.lane.b32.xlu1 %v6841_v46, %s7620_s23 }
0x1106   :  { %v1814_v54 = vpop.permute.xlu1 %1813 }
0x110a   :  { %v1816_v55 = vpop.permute.xlu0 %1815  ;;  %v2014_v58 = vpop.permute.xlu1 %2013 }
0x110b   :  { %5797 = vmatprep.subr.msk.mxu1 %vm243_vm1, %v1816_v55 }
0x110c   :  { %5798 = vmatpush3.xpose.msk.msra.mxu1 %vm243_vm1, %v1816_v55 }
0x110d   :  { %5799 = vmatprep.subr.msk.mxu1 %vm243_vm1, %v1814_v54 }
0x110e   :  { %v2008_v59 = vpop.permute.xlu0 %2007 }
0x110f   :  { %v2012_v1 = vpop.permute.xlu1 %2011 }
0x1110   :  { %5800 = vmatpush3.xpose.msk.msra.mxu1 %vm243_vm1, %v1814_v54 }
0x1111   :  { %5811 = vmatprep.subr.msk.mxu1 %vm243_vm1, %v2014_v58 }
0x1113   :  { %5802 = vmatmul.mubr.msk.f32.vlgmr.msra.gmra.mxu1 %vm243_vm1, %v6841_v46  ;;  %v2010_v60 = vpop.permute.xlu1 %2009 }
0x1114   :  { %5812 = vmatpush3.xpose.msk.msra.mxu1 %vm243_vm1, %v2014_v58  ;;  %5815 = vmatprep.mubr.msk.f32.mxu1 %vm243_vm1, %v2008_v59 }
0x1115   :  { %5813 = vmatprep.subr.msk.mxu1 %vm243_vm1, %v2012_v1 }
0x1118   :  { %5814 = vmatpush3.xpose.msk.msra.mxu1 %vm243_vm1, %v2012_v1 }
0x111b   :  { %5816 = vmatmul.mubr.msk.f32.vlgmr.msra.gmra.mxu1 %vm243_vm1, %v2010_v60 }
0x11d3   :  { %v5803_v61 = vpop.f32.mrf.mxu1 }
0x11d4   :  { %v1901_v10 = vmul.f32 0.25, %v5803_v61 }
0x11d5   :  { %v1891_v0 = vpop.f32.mrf.mxu1 }
0x11d6   :  { %v1903_v11 = vadd.f32 %v6876_v6, %v1901_v10  ;;  %v1900_v25 = vmul.f32 0.25, %v1891_v0 }
0x11d8   :  { %v1907_v12 = vsel %vm243_vm1, %v1903_v11, -inf  ;;  %v1902_v26 = vadd.f32 %v6883_v53, %v1900_v25 }
0x11da   :  { %v1904_v27 = vsel %vm243_vm1, %v1902_v26, -inf }
0x11db   :  { %v5817_v2 = vpop.f32.mrf.mxu1 }
0x11dc   :  { %v2099_v62 = vmul.f32 0.25, %v5817_v2 }
0x11dd   :  { %v2089_v3 = vpop.f32.mrf.mxu1 }
0x11de   :  { %v2098_v5 = vmul.f32 0.25, %v2089_v3  ;;  %v2101_v56 = vadd.f32 %v6876_v6, %v2099_v62 }
0x11e0   :  { %v2105_v7 = vsel %vm243_vm1, %v2101_v56, -inf  ;;  %v2100_v8 = vadd.f32 %v6883_v53, %v2098_v5 }
0x11e1   :  { %2106 = vmax.xlane.f32.xlu1 %v2105_v7  ;;  %v5209_v7 = vld [vmem:[%s7570_s6 + $0x48] sm:$0xff] }
0x11e2   :  { %v2102_v9 = vsel %vm243_vm1, %v2100_v8, -inf  ;;  %5832 = vmatprep.subr.mxu0 %v5209_v7 }
0x11e3   :  { %2103 = vmax.xlane.f32.xlu0 %v2102_v9 }
0x11f2   :  { %2126 = vrot.lane.b32.xlu1 %v6849_v52, %s7620_s23 }
0x11f6   :  { %2381 = vrot.lane.b32.xlu1 %v6841_v46, %s7621_s24 }
0x11fa   :  { %2379 = vrot.lane.b32.xlu1 %v6834_v45, %s7621_s24 }
0x11fe   :  { %2377 = vrot.lane.b32.xlu1 %v6841_v46, %s7622_s30 }
0x1222   :  { %1908 = vmax.xlane.f32.xlu1 %v1907_v12 }
0x1233   :  { %2666 = vrot.lane.b32.xlu1 %v6834_v45, %s7623_s2 }
0x1237   :  { %2662 = vrot.lane.b32.xlu1 %v6834_v45, %s7624_s28 }
0x123b   :  { %2664 = vrot.lane.b32.xlu1 %v6841_v46, %s7624_s28 }
0x126a   :  { %v2107_v13 = vpop.xlane.xlu1 %2106 }
0x126b   :  { %v2109_v14 = vsub.f32 %v2101_v56, %v2107_v13 }
0x126c   :  { %v2104_v15 = vpop.xlane.xlu0 %2103 }
0x126d   :  { %v2112_v16 = vmul.f32 1.442695, %v2109_v14  ;;  %v2108_v63 = vsub.f32 %v2100_v8, %v2104_v15  ;;  %v5208_v8 = vld [vmem:[%s7570_s6 + $0x40] sm:$0xff] }
0x126e   :  { %v2127_v31 = vpop.permute.xlu1 %2126 }
0x126f   :  { %6202 = vpow2.f32 %v2112_v16  ;;  %v2110_v20 = vmul.f32 1.442695, %v2108_v63 }
0x1271   :  { %6204 = vpow2.f32 %v2110_v20 }
0x1272   :  { %v2382_v18 = vpop.permute.xlu1 %2381 }
0x1276   :  { %v2380_v37 = vpop.permute.xlu1 %2379 }
0x127a   :  { %v2378_v38 = vpop.permute.xlu1 %2377 }
0x127c   :  { %v6203_v21 = vpop.eup %6202 }
0x127d   :  { %v2117_v22 = vsel %vm243_vm1, %v6203_v21, 0.0 }
0x127e   :  { %v6205_v23 = vpop.eup %6204  ;;  %2118 = vadd.xlane.f32.xlu0 %v2117_v22 }
0x127f   :  { %v2114_v24 = vsel %vm243_vm1, %v6205_v23, 0.0 }
0x1282   :  { %2115 = vadd.xlane.f32.xlu0 %v2114_v24 }
0x1298   :  { %2128 = vrot.lane.b32.xlu0 %v6843_v51, %s7620_s23 }
0x129c   :  { %2375 = vrot.lane.b32.xlu0 %v6834_v45, %s7622_s30 }
0x12ab   :  { %v1909_v40 = vpop.xlane.xlu1 %1908 }
0x12ac   :  { %v1911_v4 = vsub.f32 %v1903_v11, %v1909_v40 }
0x12ae   :  { %v1914_v47 = vmul.f32 1.442695, %v1911_v4 }
0x12af   :  { %v2667_v60 = vpop.permute.xlu1 %2666 }
0x12bb   :  { %1905 = vmax.xlane.f32.xlu0 %v1904_v27 }
0x1307   :  { %v2119_v28 = vpop.xlane.xlu0 %2118 }
0x1308   :  { %6206 = vrcp.f32 %v2119_v28 }
0x130b   :  { %v2116_v29 = vpop.xlane.xlu0 %2115 }
0x130c   :  { %6208 = vrcp.f32 %v2116_v29 }
0x130f   :  { %v2129_v30 = vpop.permute.xlu0 %2128 }
0x1310   :  { %5818 = vmatprep.subr.mxu1 %v2129_v30 }
0x1311   :  { %5819 = vmatpush3.msra.mxu1 %v2129_v30 }
0x1312   :  { %5820 = vmatprep.subr.mxu1 %v2127_v31 }
0x1313   :  { %5821 = vmatpush3.msra.mxu1 %v2127_v31  ;;  %v2376_v42 = vpop.permute.xlu0 %2375 }
0x1314   :  { %5825 = vmatprep.subr.mxu1 %v5211_v32 }
0x1315   :  { %v6207_v33 = vpop.eup %6206 }
0x1316   :  { %v2123_v35 = vmul.f32 %v6207_v33, %v6203_v21 }
0x1319   :  { %v6209_v34 = vpop.eup %6208 }
0x131a   :  { %v2122_v17 = vmul.f32 %v6209_v34, %v6205_v23 }
0x131c   :  { %5822 = vmatprep.mubr.msk.f32.mxu1 %vm243_vm1, %v2122_v17 }
0x131d   :  { %5823 = vmatmul.mubr.msk.f32.vlgmr.msra.gmra.mxu1 %vm243_vm1, %v2123_v35 }
0x131e   :  { %5826 = vmatpush3.msra.mxu1 %v5211_v32 }
0x131f   :  { %5827 = vmatprep.subr.mxu1 %v5210_v36 }
0x1320   :  { %5828 = vmatpush3.msra.mxu1 %v5210_v36 }
0x1321   :  { %5839 = vmatprep.subr.msk.mxu1 %vm243_vm1, %v2382_v18 }
0x1344   :  { %v1906_v44 = vpop.xlane.xlu0 %1905 }
0x1345   :  { %v1910_v45 = vsub.f32 %v1902_v26, %v1906_v44 }
0x1347   :  { %v1912_v48 = vmul.f32 1.442695, %v1910_v45 }
0x1349   :  { %6210 = vpow2.f32 %v1912_v48 }
0x134a   :  { %6212 = vpow2.f32 %v1914_v47 }
0x1356   :  { %v6211_v50 = vpop.eup %6210 }
0x1357   :  { %v1916_v43 = vsel %vm243_vm1, %v6211_v50, 0.0  ;;  %v6213_v54 = vpop.eup %6212 }
0x1358   :  { %1917 = vadd.xlane.f32.xlu0 %v1916_v43  ;;  %v1919_v55 = vsel %vm243_vm1, %v6213_v54, 0.0 }
0x135c   :  { %1920 = vadd.xlane.f32.xlu0 %v1919_v55 }
0x1372   :  { %2668 = vrot.lane.b32.xlu0 %v6841_v46, %s7623_s2  ;;  %v2663_v46 = vpop.permute.xlu1 %2662 }
0x1376   :  { %v2665_v3 = vpop.permute.xlu1 %2664 }
0x13dd   :  { %v5824_v58 = vpop.f32.mrf.mxu1 }
0x13df   :  { %v2204_v59 = vpop.f32.mrf.mxu1 }
0x13e0   :  { %5829 = vmatprep.mubr.msk.f32.mxu1 %vm243_vm1, %v2204_v59 }
0x13e1   :  { %5830 = vmatmul.mubr.msk.f32.vlgmr.msra.gmra.mxu1 %vm243_vm1, %v5824_v58  ;;  %v1918_v1 = vpop.xlane.xlu0 %1917 }
0x13e2   :  { %5840 = vmatpush3.xpose.msk.msra.mxu1 %vm243_vm1, %v2382_v18  ;;  %6214 = vrcp.f32 %v1918_v1  ;;  %5843 = vmatprep.mubr.msk.f32.mxu1 %vm243_vm1, %v2376_v42 }
0x13e3   :  { %5841 = vmatprep.subr.msk.mxu1 %vm243_vm1, %v2380_v37 }
0x13e5   :  { %v1921_v61 = vpop.xlane.xlu0 %1920 }
0x13e6   :  { %5842 = vmatpush3.xpose.msk.msra.mxu1 %vm243_vm1, %v2380_v37  ;;  %6216 = vrcp.f32 %v1921_v61 }
0x13e9   :  { %5844 = vmatmul.mubr.msk.f32.vlgmr.msra.gmra.mxu1 %vm243_vm1, %v2378_v38  ;;  %v2669_v0 = vpop.permute.xlu0 %2668 }
0x13ea   :  { %5864 = vmatprep.mubr.msk.f32.mxu1 %vm243_vm1, %v2663_v46  ;;  %5860 = vmatprep.subr.msk.mxu1 %vm243_vm1, %v2669_v0 }
0x13eb   :  { %5861 = vmatpush3.xpose.msk.msra.mxu1 %vm243_vm1, %v2669_v0 }
0x13ec   :  { %5862 = vmatprep.subr.msk.mxu1 %vm243_vm1, %v2667_v60 }
0x13ef   :  { %v6215_v2 = vpop.eup %6214  ;;  %5863 = vmatpush3.xpose.msk.msra.mxu1 %vm243_vm1, %v2667_v60 }
0x13f0   :  { %v1924_v62 = vmul.f32 %v6215_v2, %v6211_v50 }
0x13f2   :  { %5808 = vmatprep.mubr.msk.f32.mxu0 %vm243_vm1, %v1924_v62  ;;  %5865 = vmatmul.mubr.msk.f32.vlgmr.msra.gmra.mxu1 %vm243_vm1, %v2665_v3 }
0x13f3   :  { %v6217_v5 = vpop.eup %6216 }
0x13f4   :  { %v1925_v56 = vmul.f32 %v6217_v5, %v6213_v54  ;;  %v5213_v54 = vld [vmem:[%s7570_s6 + $0x68] sm:$0xff] }
0x13f6   :  { %5809 = vmatmul.mubr.msk.f32.vlgmr.msra.gmra.mxu0 %vm243_vm1, %v1925_v56 }
0x13f7   :  { %5833 = vmatpush3.msra.mxu0 %v5209_v7 }
0x13f8   :  { %5834 = vmatprep.subr.mxu0 %v5208_v8 }
0x13f9   :  { %5835 = vmatpush3.msra.mxu0 %v5208_v8 }
0x14a1   :  { %v6945_v9 = vpop.f32.mrf.mxu1 }
0x14a3   :  { %v6947_v10 = vpop.f32.mrf.mxu1 }
0x14a9   :  { %v5845_v11 = vpop.f32.mrf.mxu1 }
0x14aa   :  { %v2467_v12 = vmul.f32 0.25, %v5845_v11 }
0x14ab   :  { %v2457_v13 = vpop.f32.mrf.mxu1 }
0x14ac   :  { %v2466_v14 = vmul.f32 0.25, %v2457_v13  ;;  %v2469_v15 = vadd.f32 %v6876_v6, %v2467_v12 }
0x14ae   :  { %v2473_v16 = vsel %vm243_vm1, %v2469_v15, -inf  ;;  %v2468_v63 = vadd.f32 %v6883_v53, %v2466_v14 }
0x14af   :  { %2474 = vmax.xlane.f32.xlu1 %v2473_v16  ;;  %v5215_v16 = vld [vmem:[%s7570_s6 + $0x78] sm:$0xff] }
0x14b0   :  { %v2470_v20 = vsel %vm243_vm1, %v2468_v63, -inf }
0x14b1   :  { %2471 = vmax.xlane.f32.xlu0 %v2470_v20 }
0x14b2   :  { %v5866_v23 = vpop.f32.mrf.mxu1 }
0x14b3   :  { %v2754_v42 = vmul.f32 0.25, %v5866_v23 }
0x14b4   :  { %v2744_v24 = vpop.f32.mrf.mxu1 }
0x14b5   :  { %v2753_v25 = vmul.f32 0.25, %v2744_v24  ;;  %v2756_v4 = vadd.f32 %v6876_v6, %v2754_v42 }
0x14b6   :  { %v5810_v21 = vpop.f32.mrf.mxu0 }
0x14b7   :  { %v2755_v26 = vadd.f32 %v6883_v53, %v2753_v25  ;;  %v2760_v44 = vsel %vm243_vm1, %v2756_v4, -inf }
0x14b8   :  { %v1998_v22 = vpop.f32.mrf.mxu0 }
0x14b9   :  { %5836 = vmatprep.mubr.msk.f32.mxu0 %vm243_vm1, %v1998_v22  ;;  %v2757_v27 = vsel %vm243_vm1, %v2755_v26, -inf }
0x14ba   :  { %5837 = vmatmul.mubr.msk.f32.vlgmr.msra.gmra.mxu0 %vm243_vm1, %v5810_v21 }
0x14c0   :  { %2492 = vrot.lane.b32.xlu1 %v6849_v52, %s7622_s30 }
0x14e4   :  { %2758 = vmax.xlane.f32.xlu1 %v2757_v27 }
0x1538   :  { %v2475_v28 = vpop.xlane.xlu1 %2474 }
0x1539   :  { %v2477_v29 = vsub.f32 %v2469_v15, %v2475_v28  ;;  %v5249_v28 = vld [vmem:[%s7571_s7 + $0x1] ss:$0 sm:$0xff] }
0x153a   :  { %v2472_v30 = vpop.xlane.xlu0 %2471 }
0x153b   :  { %v2480_v31 = vmul.f32 1.442695, %v2477_v29  ;;  %v2476_v32 = vsub.f32 %v2468_v63, %v2472_v30  ;;  %v5214_v63 = vld [vmem:[%s7570_s6 + $0x70] sm:$0xff] }
0x153c   :  { %v2493_v18 = vpop.permute.xlu1 %2492 }
0x153d   :  { %6218 = vpow2.f32 %v2480_v31  ;;  %v2478_v33 = vmul.f32 1.442695, %v2476_v32 }
0x153f   :  { %6220 = vpow2.f32 %v2478_v33 }
0x154a   :  { %v6219_v34 = vpop.eup %6218 }
0x154b   :  { %v2485_v17 = vsel %vm243_vm1, %v6219_v34, 0.0 }
0x154c   :  { %v6221_v35 = vpop.eup %6220  ;;  %2486 = vadd.xlane.f32.xlu0 %v2485_v17 }
0x154d   :  { %v2482_v36 = vsel %vm243_vm1, %v6221_v35, 0.0 }
0x1550   :  { %2483 = vadd.xlane.f32.xlu0 %v2482_v36 }
0x1566   :  { %2494 = vrot.lane.b32.xlu0 %v6843_v51, %s7622_s30 }
0x156d   :  { %v2759_v37 = vpop.xlane.xlu1 %2758 }
0x156e   :  { %v2763_v38 = vsub.f32 %v2755_v26, %v2759_v37 }
0x1570   :  { %v2765_v40 = vmul.f32 1.442695, %v2763_v38 }
0x1572   :  { %6222 = vpow2.f32 %v2765_v40 }
0x157a   :  { %v5838_v5 = vpop.f32.mrf.mxu0 }
0x157b   :  { %v2372_v20 = vadd.f32 %v5838_v5, %v6945_v9 }
0x157c   :  { %v2366_v56 = vpop.f32.mrf.mxu0 }
0x157d   :  { %v2367_v26 = vadd.f32 %v2366_v56, %v6947_v10 }
0x157f   :  { %v6223_v45 = vpop.eup %6222 }
0x1580   :  { %v2769_v47 = vsel %vm243_vm1, %v6223_v45, 0.0 }
0x1585   :  { %2761 = vmax.xlane.f32.xlu0 %v2760_v44 }
0x1589   :  { %2770 = vadd.xlane.f32.xlu0 %v2769_v47 }
0x159f   :  { %2781 = vrot.lane.b32.xlu0 %v6843_v51, %s7624_s28  ;;  %v5212_v51 = vld [vmem:[%s7570_s6 + $0x60] sm:$0xff] }
0x15d5   :  { %v2487_v48 = vpop.xlane.xlu0 %2486 }
0x15d6   :  { %6224 = vrcp.f32 %v2487_v48  ;;  %v5261_v48 = vld [vmem:[%s7572_s10 + $0x78] sm:$0xff] }
0x15d7   :  { %5881 = vmatprep.subr.mxu1 %v5261_v48 }
0x15d8   :  { %5882 = vmatpush3.msra.mxu1 %v5261_v48 }
0x15d9   :  { %v2484_v50 = vpop.xlane.xlu0 %2483 }
0x15da   :  { %6226 = vrcp.f32 %v2484_v50  ;;  %v5260_v50 = vld [vmem:[%s7572_s10 + $0x70] sm:$0xff] }
0x15db   :  { %5883 = vmatprep.subr.mxu1 %v5260_v50 }
0x15dc   :  { %5884 = vmatpush3.msra.mxu1 %v5260_v50 }
0x15dd   :  { %v2495_v43 = vpop.permute.xlu0 %2494 }
0x15de   :  { %5846 = vmatprep.subr.mxu0 %v2495_v43 }
0x15df   :  { %5847 = vmatpush3.msra.mxu0 %v2495_v43  ;;  %v5259_v43 = vld [vmem:[%s7572_s10 + $0x68] sm:$0xff] }
0x15e0   :  { %5848 = vmatprep.subr.mxu0 %v2493_v18  ;;  %5885 = vmatprep.subr.mxu1 %v5259_v43 }
0x15e1   :  { %5849 = vmatpush3.msra.mxu0 %v2493_v18  ;;  %5886 = vmatpush3.msra.mxu1 %v5259_v43 }
0x15e2   :  { %5853 = vmatprep.subr.mxu0 %v5213_v54 }
0x15e3   :  { %v6225_v55 = vpop.eup %6224 }
0x15e4   :  { %v2491_v1 = vmul.f32 %v6225_v55, %v6219_v34  ;;  %v5257_v55 = vld [vmem:[%s7572_s10 + $0x58] sm:$0xff] }
0x15e7   :  { %v6227_v58 = vpop.eup %6226 }
0x15e8   :  { %v2490_v59 = vmul.f32 %v6227_v58, %v6221_v35  ;;  %v5256_v58 = vld [vmem:[%s7572_s10 + $0x50] sm:$0xff] }
0x15ea   :  { %5850 = vmatprep.mubr.msk.f32.mxu0 %vm243_vm1, %v2490_v59  ;;  %v5255_v59 = vld [vmem:[%s7572_s10 + $0x48] sm:$0xff] }
0x15eb   :  { %5851 = vmatmul.mubr.msk.f32.vlgmr.msra.gmra.mxu0 %vm243_vm1, %v2491_v1  ;;  %v5254_v1 = vld [vmem:[%s7572_s10 + $0x40] sm:$0xff] }
0x15ec   :  { %5854 = vmatpush3.msra.mxu0 %v5213_v54  ;;  %v5258_v54 = vld [vmem:[%s7572_s10 + $0x60] sm:$0xff] }
0x15ed   :  { %5855 = vmatprep.subr.mxu0 %v5212_v51  ;;  %5887 = vmatprep.subr.mxu1 %v5258_v54 }
0x15ee   :  { %5856 = vmatpush3.msra.mxu0 %v5212_v51  ;;  %5888 = vmatpush3.msra.mxu1 %v5258_v54 }
0x15ef   :  { %5889 = vmatprep.subr.mxu1 %v5257_v55 }
0x15f0   :  { %5890 = vmatpush3.msra.mxu1 %v5257_v55 }
0x15f1   :  { %5891 = vmatprep.subr.mxu1 %v5256_v58 }
0x15f2   :  { %5892 = vmatpush3.msra.mxu1 %v5256_v58 }
0x15f3   :  { %5893 = vmatprep.subr.mxu1 %v5255_v59 }
0x15f4   :  { %5894 = vmatpush3.msra.mxu1 %v5255_v59  ;;  %v5283_v59 = vld [vmem:[%s7577_s13 + $0x1] ss:$0 sm:$0xff] }
0x15f5   :  { %5895 = vmatprep.subr.mxu1 %v5254_v1 }
0x15f6   :  { %5896 = vmatpush3.msra.mxu1 %v5254_v1 }
0x160e   :  { %v2762_v60 = vpop.xlane.xlu0 %2761 }
0x160f   :  { %v2764_v61 = vsub.f32 %v2756_v4, %v2762_v60 }
0x1611   :  { %v2767_v46 = vmul.f32 1.442695, %v2764_v61 }
0x1612   :  { %v2771_v0 = vpop.xlane.xlu0 %2770 }
0x1613   :  { %6228 = vpow2.f32 %v2767_v46 }
0x1614   :  { %6230 = vrcp.f32 %v2771_v0 }
0x1616   :  { %v2782_v2 = vpop.permute.xlu0 %2781 }
0x1617   :  { %5867 = vmatprep.subr.mxu0 %v2782_v2 }
0x1620   :  { %v6229_v62 = vpop.eup %6228 }
0x1621   :  { %v2772_v3 = vsel %vm243_vm1, %v6229_v62, 0.0  ;;  %v6231_v7 = vpop.eup %6230 }
0x1622   :  { %2773 = vadd.xlane.f32.xlu1 %v2772_v3  ;;  %v2777_v13 = vmul.f32 %v6231_v7, %v6223_v45  ;;  %v5252_v3 = vld [vmem:[%s7573_s8 + $0x1] ss:$0 sm:$0xff] }
0x1633   :  { %2779 = vrot.lane.b32.xlu1 %v6849_v52, %s7624_s28 }
0x16ab   :  { %v5852_v8 = vpop.f32.mrf.mxu0  ;;  %v2774_v11 = vpop.xlane.xlu1 %2773 }
0x16ac   :  { %6232 = vrcp.f32 %v2774_v11  ;;  %v5253_v11 = vld [vmem:[%s7574_s9 + $0x1] ss:$0 sm:$0xff] }
0x16ad   :  { %v2570_v12 = vpop.f32.mrf.mxu0 }
0x16ae   :  { %5857 = vmatprep.mubr.msk.f32.mxu0 %vm243_vm1, %v2570_v12 }
0x16af   :  { %5858 = vmatmul.mubr.msk.f32.vlgmr.msra.gmra.mxu0 %vm243_vm1, %v5852_v8  ;;  %v2780_v14 = vpop.permute.xlu1 %2779 }
0x16b0   :  { %5868 = vmatpush3.msra.mxu0 %v2782_v2  ;;  %5871 = vmatprep.mubr.msk.f32.mxu0 %vm243_vm1, %v2777_v13 }
0x16b1   :  { %5869 = vmatprep.subr.mxu0 %v2780_v14 }
0x16b2   :  { %5870 = vmatpush3.msra.mxu0 %v2780_v14 }
0x16b3   :  { %5874 = vmatprep.subr.mxu0 %v5215_v16 }
0x16b9   :  { %v6233_v52 = vpop.eup %6232 }
0x16ba   :  { %v2778_v15 = vmul.f32 %v6233_v52, %v6229_v62  ;;  %v5281_v52 = vld [vmem:[%s7575_s12 + $0xf8] sm:$0xff] }
0x16bc   :  { %5872 = vmatmul.mubr.msk.f32.vlgmr.msra.gmra.mxu0 %vm243_vm1, %v2778_v15  ;;  %v5280_v15 = vld [vmem:[%s7575_s12 + $0xf0] sm:$0xff] }
0x16bd   :  { %5875 = vmatpush3.msra.mxu0 %v5215_v16  ;;  %v5279_v16 = vld [vmem:[%s7575_s12 + $0xe8] sm:$0xff] }
0x16be   :  { %5876 = vmatprep.subr.mxu0 %v5214_v63 }
0x16bf   :  { %5877 = vmatpush3.msra.mxu0 %v5214_v63  ;;  %v5278_v63 = vld [vmem:[%s7575_s12 + $0xe0] sm:$0xff] }
0x16c0   :  { %5900 = vmatprep.subr.mxu0 %v5281_v52 }
0x176f   :  { %v5859_v21 = vpop.f32.mrf.mxu0 }
0x1770   :  { %v2661_v22 = vadd.f32 %v5859_v21, %v2372_v20  ;;  %v5277_v20 = vld [vmem:[%s7575_s12 + $0xd8] sm:$0xff]  ;;  %v5276_v21 = vld [vmem:[%s7575_s12 + $0xd0] sm:$0xff] }
0x1771   :  { %v2651_v23 = vpop.f32.mrf.mxu0 }
0x1772   :  { %v2660_v29 = vadd.f32 %v2651_v23, %v2367_v26  ;;  %v5274_v23 = vld [vmem:[%s7575_s12 + $0xc0] sm:$0xff]  ;;  %v5271_v26 = vld [vmem:[%s7575_s12 + $0xa8] sm:$0xff] }
0x177c   :  { %v5873_v24 = vpop.f32.mrf.mxu0 }
0x177e   :  { %v2857_v25 = vpop.f32.mrf.mxu0 }
0x177f   :  { %5878 = vmatprep.mubr.msk.f32.mxu0 %vm243_vm1, %v2857_v25  ;;  %v5272_v25 = vld [vmem:[%s7575_s12 + $0xb0] sm:$0xff] }
0x1780   :  { %5879 = vmatmul.mubr.msk.f32.vlgmr.msra.gmra.mxu0 %vm243_vm1, %v5873_v24  ;;  %v5273_v24 = vld [vmem:[%s7575_s12 + $0xb8] sm:$0xff] }
0x1781   :  { %5901 = vmatpush3.msra.mxu0 %v5281_v52 }
0x1782   :  { %5902 = vmatprep.subr.mxu0 %v5280_v15 }
0x1783   :  { %5903 = vmatpush3.msra.mxu0 %v5280_v15 }
0x1784   :  { %5904 = vmatprep.subr.mxu0 %v5279_v16 }
0x1785   :  { %5905 = vmatpush3.msra.mxu0 %v5279_v16  ;;  %v5302_v16 = vld [vmem:[%s7615_s0 + $0x170] sm:$0xff] }
0x1786   :  { %5906 = vmatprep.subr.mxu0 %v5278_v63 }
0x1787   :  { %5907 = vmatpush3.msra.mxu0 %v5278_v63  ;;  %v5301_v63 = vld [vmem:[%s7615_s0 + $0x168] sm:$0xff] }
0x1788   :  { %5908 = vmatprep.subr.mxu0 %v5277_v20 }
0x1789   :  { %5909 = vmatpush3.msra.mxu0 %v5277_v20  ;;  %v5300_v20 = vld [vmem:[%s7615_s0 + $0x160] sm:$0xff] }
0x178a   :  { %5910 = vmatprep.subr.mxu0 %v5276_v21 }
0x178b   :  { %5911 = vmatpush3.msra.mxu0 %v5276_v21  ;;  %v5299_v21 = vld [vmem:[%s7615_s0 + $0x158] sm:$0xff] }
0x1840   :  { %v5880_v27 = vpop.f32.mrf.mxu0 }
0x1841   :  { %v2948_v30 = vadd.f32 %v5880_v27, %v2661_v22  ;;  %v5275_v22 = vld [vmem:[%s7575_s12 + $0xc8] sm:$0xff]  ;;  %v5270_v27 = vld [vmem:[%s7575_s12 + $0xa0] sm:$0xff] }
0x1842   :  { %v2938_v31 = vpop.f32.mrf.mxu0  ;;  %5912 = vmatprep.subr.mxu0 %v5275_v22 }
0x1843   :  { %v2958_v9 = vadd.f32 %v5249_v28, %v2948_v30  ;;  %v2947_v32 = vadd.f32 %v2938_v31, %v2660_v29  ;;  %5913 = vmatpush3.msra.mxu0 %v5275_v22  ;;  %v5268_v29 = vld [vmem:[%s7575_s12 + $0x90] sm:$0xff]  ;;  %v5267_v30 = vld [vmem:[%s7575_s12 + $0x88] sm:$0xff]  ;;  %v5266_v31 = vld [vmem:[%s7575_s12 + $0x80] sm:$0xff] }
0x1844   :  { %5914 = vmatprep.subr.mxu0 %v5274_v23  ;;  %v5298_v22 = vld [vmem:[%s7615_s0 + $0x150] sm:$0xff] }
0x1845   :  { %v2957_v33 = vadd.f32 %v5249_v28, %v2947_v32  ;;  %v2960_v34 = vadd.f32 %v2958_v9, %v6826_v41  ;;  %5915 = vmatpush3.msra.mxu0 %v5274_v23  ;;  %v5269_v28 = vld [vmem:[%s7575_s12 + $0x98] sm:$0xff]  ;;  %v5263_v9 = vld [vmem:[%s7576_s11 + $0x1] ss:$0 sm:$0xff]  ;;  %v5297_v23 = vld [vmem:[%s7615_s0 + $0x148] sm:$0xff] }
0x1846   :  { %5916 = vmatprep.subr.mxu0 %v5273_v24 }
0x1847   :  { %v2968_v17 = vsel %vm74_vm0, %v2960_v34, 0.0  ;;  %v2959_v35 = vadd.f32 %v2957_v33, %v6821_v39  ;;  %5917 = vmatpush3.msra.mxu0 %v5273_v24  ;;  %v5296_v24 = vld [vmem:[%s7615_s0 + $0x140] sm:$0xff] }
0x1848   :  { %2969 = vadd.xlane.f32.xlu0 %v2968_v17  ;;  %5918 = vmatprep.subr.mxu0 %v5272_v25 }
0x1849   :  { %v2965_v10 = vsel %vm74_vm0, %v2959_v35, 0.0  ;;  %5919 = vmatpush3.msra.mxu0 %v5272_v25  ;;  %v5295_v25 = vld [vmem:[%s7615_s0 + $0x138] sm:$0xff] }
0x184a   :  { %2966 = vadd.xlane.f32.xlu1 %v2965_v10  ;;  %5920 = vmatprep.subr.mxu0 %v5271_v26 }
0x184b   :  { %5921 = vmatpush3.msra.mxu0 %v5271_v26  ;;  %v5294_v26 = vld [vmem:[%s7615_s0 + $0x130] sm:$0xff] }
0x184c   :  { %5922 = vmatprep.subr.mxu0 %v5270_v27 }
0x184d   :  { %5923 = vmatpush3.msra.mxu0 %v5270_v27  ;;  %v5293_v27 = vld [vmem:[%s7615_s0 + $0x128] sm:$0xff] }
0x184e   :  { %5924 = vmatprep.subr.mxu0 %v5269_v28 }
0x184f   :  { %5925 = vmatpush3.msra.mxu0 %v5269_v28  ;;  %v5292_v28 = vld [vmem:[%s7615_s0 + $0x120] sm:$0xff] }
0x1850   :  { %5926 = vmatprep.subr.mxu0 %v5268_v29 }
0x1851   :  { %5927 = vmatpush3.msra.mxu0 %v5268_v29  ;;  %v5291_v29 = vld [vmem:[%s7615_s0 + $0x118] sm:$0xff] }
0x1852   :  { %5928 = vmatprep.subr.mxu0 %v5267_v30 }
0x1853   :  { %5929 = vmatpush3.msra.mxu0 %v5267_v30  ;;  %v5290_v30 = vld [vmem:[%s7615_s0 + $0x110] sm:$0xff] }
0x1854   :  { %5930 = vmatprep.subr.mxu0 %v5266_v31 }
0x1855   :  { %5931 = vmatpush3.msra.mxu0 %v5266_v31  ;;  %v5289_v31 = vld [vmem:[%s7615_s0 + $0x108] sm:$0xff] }
0x18d1   :  { %v2970_v36 = vpop.xlane.xlu0 %2969 }
0x18d2   :  { %v2972_v18 = vmul.f32 0.015625, %v2970_v36 }
0x18d3   :  { %v2967_v37 = vpop.xlane.xlu1 %2966 }
0x18d4   :  { %v2974_v38 = vsub.f32 %v2960_v34, %v2972_v18  ;;  %v2971_v40 = vmul.f32 0.015625, %v2967_v37 }
0x18d6   :  { %v2973_v42 = vsub.f32 %v2959_v35, %v2971_v40  ;;  %v2976_v4 = vmul.f32 %v2974_v38, %v2974_v38 }
0x18d8   :  { %v2980_v44 = vsel %vm74_vm0, %v2976_v4, 0.0  ;;  %v2975_v45 = vmul.f32 %v2973_v42, %v2973_v42 }
0x18d9   :  { %2981 = vadd.xlane.f32.xlu1 %v2980_v44 }
0x18da   :  { %v2977_v47 = vsel %vm74_vm0, %v2975_v45, 0.0 }
0x18db   :  { %2978 = vadd.xlane.f32.xlu0 %v2977_v47 }
0x1962   :  { %v2982_v51 = vpop.xlane.xlu1 %2981 }
0x1963   :  { %v2984_v60 = vmul.f32 0.015625, %v2982_v51 }
0x1964   :  { %v2979_v61 = vpop.xlane.xlu0 %2978 }
0x1965   :  { %v2986_v46 = vadd.f32 1e-12, %v2984_v60  ;;  %v2983_v0 = vmul.f32 0.015625, %v2979_v61 }
0x1967   :  { %6234 = vrsqrt.f32 %v2986_v46  ;;  %v2985_v2 = vadd.f32 1e-12, %v2983_v0 }
0x1969   :  { %6236 = vrsqrt.f32 %v2985_v2 }
0x1974   :  { %v6235_v62 = vpop.eup %6234 }
0x1975   :  { %v2990_v5 = vmul.f32 %v6235_v62, %v2974_v38 }
0x1976   :  { %v6237_v56 = vpop.eup %6236 }
0x1977   :  { %v2989_v7 = vmul.f32 %v6237_v56, %v2973_v42  ;;  %v2998_v8 = vmul.f32 %v5252_v3, %v2990_v5 }
0x1979   :  { %v2997_v12 = vmul.f32 %v5252_v3, %v2989_v7  ;;  %v7034_v14 = vadd.f32 %v5253_v11, %v2998_v8 }
0x197b   :  { %v7032_v13 = vadd.f32 %v5253_v11, %v2997_v12 }
0x197d   :  { %5897 = vmatprep.mubr.msk.f32.mxu1 %vm74_vm0, %v7032_v13 }
0x197e   :  { %5898 = vmatmul.mubr.msk.f32.vlgmr.msra.gmra.mxu1 %vm74_vm0, %v7034_v14 }
0x197f   :  { %3371 = vmatprep.mubr.f32.mxu1 %v6294_v19 }
0x1a3e   :  { %v5899_v32 = vpop.f32.mrf.mxu1 }
0x1a3f   :  { %v3102_v33 = vadd.f32 %v5899_v32, %v5263_v9 }
0x1a40   :  { %v3096_v34 = vpop.f32.mrf.mxu1 }
0x1a41   :  { %v3106_v17 = vmul.f32 %v3102_v33, %v3102_v33  ;;  %v3097_v35 = vadd.f32 %v5263_v9, %v3096_v34  ;;  %v5288_v9 = vld [vmem:[%s7615_s0 + $0x100] sm:$0xff] }
0x1a43   :  { %v3108_v10 = vmul.f32 %v3106_v17, %v3102_v33  ;;  %v3105_v36 = vmul.f32 %v3097_v35, %v3097_v35 }
0x1a45   :  { %v3110_v18 = vmul.f32 0.044715, %v3108_v10  ;;  %v3107_v37 = vmul.f32 %v3105_v36, %v3097_v35 }
0x1a47   :  { %v3112_v38 = vadd.f32 %v3110_v18, %v3102_v33  ;;  %v3109_v40 = vmul.f32 0.044715, %v3107_v37 }
0x1a49   :  { %v3114_v42 = vmul.f32 0.7978846, %v3112_v38  ;;  %v3111_v4 = vadd.f32 %v3109_v40, %v3097_v35  ;;  %v5286_v40 = vld [vmem:[%s7578_s14 + $0x1] ss:$0 sm:$0xff] }
0x1a4b   :  { %6238 = vtanh.f32 %v3114_v42  ;;  %v3113_v44 = vmul.f32 0.7978846, %v3111_v4  ;;  %v5287_v4 = vld [vmem:[%s7579_s15 + $0x1] ss:$0 sm:$0xff] }
0x1a4d   :  { %6240 = vtanh.f32 %v3113_v44 }
0x1a58   :  { %v6239_v45 = vpop.eup %6238 }
0x1a59   :  { %v3118_v47 = vadd.f32 1.0, %v6239_v45 }
0x1a5a   :  { %v6241_v48 = vpop.eup %6240 }
0x1a5b   :  { %v3117_v50 = vadd.f32 1.0, %v6241_v48  ;;  %v3120_v43 = vmul.f32 0.5, %v3118_v47  ;;  %v5304_v48 = vld [vmem:[%s7618_s27 + $0x4] sm:$0x3]  ;;  %s7626_s27 = smov 48  }
0x1a5d   :  { %v3119_v54 = vmul.f32 0.5, %v3117_v50  ;;  %v3122_v58 = vmul.f32 %v3120_v43, %v3102_v33  ;;  %v3294_v50 = vrot.slane %v5304_v48, %v6486_v49 }
0x1a5f   :  { %v3121_v55 = vmul.f32 %v3119_v54, %v3097_v35 }
0x1a61   :  { %5932 = vmatprep.mubr.f32.mxu0 %v3121_v55 }
0x1a62   :  { %5933 = vmatmul.mubr.f32.vlgmr.msra.gmra.mxu0 %v3122_v58  ;;  %v3298_v58 = vrot.slane %v5304_v48, %v6502_v57 }
0x1b22   :  { %v5934_v1 = vpop.f32.mrf.mxu0 }
0x1b23   :  { %v3220_v51 = vadd.f32 %v5934_v1, %v5283_v59 }
0x1b24   :  { %v3214_v60 = vpop.f32.mrf.mxu0 }
0x1b25   :  { %v3215_v61 = vadd.f32 %v5283_v59, %v3214_v60  ;;  %v3224_v46 = vadd.f32 %v3220_v51, %v7034_v14 }
0x1b27   :  { %v3232_v0 = vsel %vm74_vm0, %v3224_v46, 0.0  ;;  %v3223_v2 = vadd.f32 %v3215_v61, %v7032_v13  ;;  %v5303_v13 = vld [vmem:[%s7615_s0 + $0x178] sm:$0xff] }
0x1b28   :  { %3233 = vadd.xlane.f32.xlu1 %v3232_v0  ;;  %3323 = vmatprep.subr.mxu1 %v5303_v13 }
0x1b29   :  { %v3229_v62 = vsel %vm74_vm0, %v3223_v2, 0.0  ;;  %3324 = vmatpush1.msra.mxu1 %v5302_v16 }
0x1b2a   :  { %3230 = vadd.xlane.f32.xlu0 %v3229_v62  ;;  %3325 = vmatprep.subr.mxu1 %v5301_v63 }
0x1b2b   :  { %3326 = vmatpush1.msra.mxu1 %v5300_v20 }
0x1b2c   :  { %3327 = vmatprep.subr.mxu1 %v5299_v21 }
0x1b2d   :  { %3328 = vmatpush1.msra.mxu1 %v5298_v22 }
0x1b2e   :  { %3329 = vmatprep.subr.mxu1 %v5297_v23 }
0x1b2f   :  { %3330 = vmatpush1.msra.mxu1 %v5296_v24 }
0x1b30   :  { %3331 = vmatprep.subr.mxu1 %v5295_v25 }
0x1b31   :  { %3332 = vmatpush1.msra.mxu1 %v5294_v26 }
0x1b32   :  { %3333 = vmatprep.subr.mxu1 %v5293_v27 }
0x1b33   :  { %3334 = vmatpush1.msra.mxu1 %v5292_v28  ;;  %v5308_v28 = vld [vmem:[%s7570_s6 + $0x88] sm:$0xff] }
0x1b34   :  { %3335 = vmatprep.subr.mxu1 %v5291_v29  ;;  %v5307_v29 = vld [vmem:[%s7570_s6 + $0x80] sm:$0xff] }
0x1b35   :  { %3336 = vmatpush1.msra.mxu1 %v5290_v30 }
0x1b36   :  { %3337 = vmatprep.subr.mxu1 %v5289_v31 }
0x1b37   :  { %3338 = vmatpush1.msra.mxu1 %v5288_v9 }
0x1bb1   :  { %v3234_v3 = vpop.xlane.xlu1 %3233 }
0x1bb2   :  { %v3236_v5 = vmul.f32 0.015625, %v3234_v3 }
0x1bb3   :  { %v3231_v56 = vpop.xlane.xlu0 %3230 }
0x1bb4   :  { %v3238_v7 = vsub.f32 %v3224_v46, %v3236_v5  ;;  %v3235_v8 = vmul.f32 0.015625, %v3231_v56 }
0x1bb6   :  { %v3237_v11 = vsub.f32 %v3223_v2, %v3235_v8  ;;  %v3240_v12 = vmul.f32 %v3238_v7, %v3238_v7 }
0x1bb8   :  { %v3244_v52 = vsel %vm74_vm0, %v3240_v12, 0.0  ;;  %v3239_v15 = vmul.f32 %v3237_v11, %v3237_v11 }
0x1bb9   :  { %3245 = vadd.xlane.f32.xlu1 %v3244_v52 }
0x1bba   :  { %v3241_v14 = vsel %vm74_vm0, %v3239_v15, 0.0 }
0x1bbb   :  { %3242 = vadd.xlane.f32.xlu0 %v3241_v14 }
0x1c42   :  { %v3246_v32 = vpop.xlane.xlu1 %3245 }
0x1c43   :  { %v3248_v33 = vmul.f32 0.015625, %v3246_v32 }
0x1c44   :  { %v3243_v34 = vpop.xlane.xlu0 %3242 }
0x1c45   :  { %v3250_v17 = vadd.f32 1e-12, %v3248_v33  ;;  %v3247_v35 = vmul.f32 0.015625, %v3243_v34  ;;  %v7226_v34 = vld [vmem:[%s7619_s5 + $0x8] sm:$0xff] }
0x1c47   :  { %6242 = vrsqrt.f32 %v3250_v17  ;;  %v3249_v10 = vadd.f32 1e-12, %v3247_v35 }
0x1c49   :  { %6244 = vrsqrt.f32 %v3249_v10  ;;  %v7232_v10 = vld [vmem:[%s7619_s5] sm:$0xff] }
0x1c54   :  { %v6243_v36 = vpop.eup %6242 }
0x1c55   :  { %v3254_v38 = vmul.f32 %v6243_v36, %v3238_v7 }
0x1c56   :  { %v6245_v18 = vpop.eup %6244 }
0x1c57   :  { %v3253_v37 = vmul.f32 %v6245_v18, %v3237_v11  ;;  %v3262_v45 = vmul.f32 %v5286_v40, %v3254_v38 }
0x1c59   :  { %v3261_v42 = vmul.f32 %v5286_v40, %v3253_v37  ;;  %v7160_v47 = vadd.f32 %v5287_v4, %v3262_v45 }
0x1c5b   :  { %v7155_v44 = vadd.f32 %v5287_v4, %v3261_v42 }
0x1c5d   :  { %5305 = vmatmul.mubr.msk.f32.vlgmr.msra.gmra.mxu1 %vm74_vm0, %v7155_v44 }
0x1c5e   :  { %3377 = vmatprep.mubr.f32.mxu1 %v6294_v19 }
0x1c61   :  { %5306 = vmatmul.mubr.msk.f32.gmra.mxu1 %vm74_vm0, %v7160_v47 }
0x1d1d   :  { %v3373_v43 = vpop.f32.mrf.mxu1 }
0x1d1e   :  { %v7168_v54 = vadd.f32 %v3373_v43, %v3294_v50 }
0x1d1f   :  { %v3375_v55 = vpop.f32.mrf.mxu1 }
0x1d20   :  { %3395 = vrot.lane.b32.xlu1 %v7168_v54, %s7625_s3  ;;  %5939 = vmatprep.mubr.msk.f32.mxu1 %vm243_vm1, %v7168_v54  ;;  %v7181_v49 = vadd.f32 %v3375_v55, %v3298_v58 }
0x1d21   :  { %v3379_v19 = vpop.f32.mrf.mxu1 }
0x1d22   :  { %v7175_v59 = vadd.f32 %v3379_v19, %v3294_v50 }
0x1d23   :  { %v3381_v1 = vpop.f32.mrf.mxu1 }
0x1d24   :  { %v7177_v51 = vadd.f32 %v3381_v1, %v3298_v58  ;;  %3397 = vrot.lane.b32.xlu0 %v7175_v59, %s7625_s3 }
0x1d26   :  { %5942 = vmatprep.subr.mxu0 %v7177_v51 }
0x1d27   :  { %5943 = vmatpush3.msra.mxu0 %v7177_v51 }
0x1d28   :  { %5944 = vmatprep.subr.mxu0 %v7181_v49 }
0x1d29   :  { %5945 = vmatpush3.msra.mxu0 %v7181_v49 }
0x1d92   :  { %v3396_v57 = vpop.permute.xlu1 %3395 }
0x1d96   :  { %v3398_v60 = vpop.permute.xlu0 %3397 }
0x1d97   :  { %5935 = vmatprep.subr.msk.mxu1 %vm243_vm1, %v3398_v60 }
0x1d98   :  { %5936 = vmatpush3.xpose.msk.msra.mxu1 %vm243_vm1, %v3398_v60 }
0x1d99   :  { %5937 = vmatprep.subr.msk.mxu1 %vm243_vm1, %v3396_v57 }
0x1d9c   :  { %5938 = vmatpush3.xpose.msk.msra.mxu1 %vm243_vm1, %v3396_v57 }
0x1d9f   :  { %5940 = vmatmul.mubr.msk.f32.vlgmr.msra.gmra.mxu1 %vm243_vm1, %v7175_v59 }
0x1e5f   :  { %v5941_v61 = vpop.f32.mrf.mxu1 }
0x1e60   :  { %v3483_v46 = vmul.f32 0.25, %v5941_v61  ;;  %v5310_v61 = vld [vmem:[%s7570_s6 + $0x98] sm:$0xff] }
0x1e61   :  { %v3473_v0 = vpop.f32.mrf.mxu1 }
0x1e62   :  { %v3482_v2 = vmul.f32 0.25, %v3473_v0  ;;  %v3485_v62 = vadd.f32 %v6876_v6, %v3483_v46 }
0x1e64   :  { %v3489_v3 = vsel %vm243_vm1, %v3485_v62, -inf  ;;  %v3484_v5 = vadd.f32 %v6883_v53, %v3482_v2 }
0x1e65   :  { %3490 = vmax.xlane.f32.xlu0 %v3489_v3 }
0x1e66   :  { %v3486_v56 = vsel %vm243_vm1, %v3484_v5, -inf }
0x1e67   :  { %3487 = vmax.xlane.f32.xlu1 %v3486_v56 }
0x1eee   :  { %v3491_v7 = vpop.xlane.xlu0 %3490 }
0x1eef   :  { %v3493_v8 = vsub.f32 %v3485_v62, %v3491_v7 }
0x1ef0   :  { %v3488_v11 = vpop.xlane.xlu1 %3487 }
0x1ef1   :  { %v3496_v12 = vmul.f32 1.442695, %v3493_v8  ;;  %v3492_v52 = vsub.f32 %v3484_v5, %v3488_v11 }
0x1ef3   :  { %6246 = vpow2.f32 %v3496_v12  ;;  %v3494_v15 = vmul.f32 1.442695, %v3492_v52 }
0x1ef5   :  { %6248 = vpow2.f32 %v3494_v15 }
0x1f00   :  { %v6247_v14 = vpop.eup %6246 }
0x1f01   :  { %v3501_v13 = vsel %vm243_vm1, %v6247_v14, 0.0 }
0x1f02   :  { %v6249_v6 = vpop.eup %6248  ;;  %3502 = vadd.xlane.f32.xlu1 %v3501_v13 }
0x1f03   :  { %v3498_v16 = vsel %vm243_vm1, %v6249_v6, 0.0 }
0x1f04   :  { %3499 = vadd.xlane.f32.xlu0 %v3498_v16 }
0x1f13   :  { %3593 = vrot.lane.b32.xlu1 %v7168_v54, %s7626_s27 }
0x1f17   :  { %3589 = vrot.lane.b32.xlu1 %v7168_v54, %s7620_s23 }
0x1f1a   :  { %3595 = vrot.lane.b32.xlu0 %v7175_v59, %s7626_s27 }
0x1f1b   :  { %3591 = vrot.lane.b32.xlu1 %v7175_v59, %s7620_s23 }
0x1f8b   :  { %v3503_v53 = vpop.xlane.xlu1 %3502 }
0x1f8c   :  { %6250 = vrcp.f32 %v3503_v53 }
0x1f8d   :  { %v3500_v63 = vpop.xlane.xlu0 %3499 }
0x1f8e   :  { %6252 = vrcp.f32 %v3500_v63 }
0x1f8f   :  { %v3594_v21 = vpop.permute.xlu1 %3593 }
0x1f91   :  { %v3596_v20 = vpop.permute.xlu0 %3595 }
0x1f92   :  { %5949 = vmatprep.subr.msk.mxu0 %vm243_vm1, %v3596_v20 }
0x1f93   :  { %v3590_v26 = vpop.permute.xlu1 %3589 }
0x1f97   :  { %v3592_v27 = vpop.permute.xlu1 %3591 }
0x1f99   :  { %v6251_v22 = vpop.eup %6250 }
0x1f9a   :  { %v3507_v25 = vmul.f32 %v6251_v22, %v6247_v14 }
0x1f9b   :  { %v6253_v23 = vpop.eup %6252 }
0x1f9c   :  { %v3506_v24 = vmul.f32 %v6253_v23, %v6249_v6 }
0x1f9e   :  { %5946 = vmatprep.mubr.msk.f32.mxu0 %vm243_vm1, %v3506_v24 }
0x1f9f   :  { %5947 = vmatmul.mubr.msk.f32.vlgmr.msra.gmra.mxu0 %vm243_vm1, %v3507_v25 }
0x1fa0   :  { %5950 = vmatpush3.xpose.msk.msra.mxu0 %vm243_vm1, %v3596_v20  ;;  %5953 = vmatprep.mubr.msk.f32.mxu0 %vm243_vm1, %v3590_v26 }
0x1fa1   :  { %5951 = vmatprep.subr.msk.mxu0 %vm243_vm1, %v3594_v21 }
0x1fa4   :  { %5952 = vmatpush3.xpose.msk.msra.mxu0 %vm243_vm1, %v3594_v21 }
0x1fa5   :  { %5970 = vmatprep.subr.mxu0 %v5308_v28 }
0x1fa7   :  { %5954 = vmatmul.mubr.msk.f32.vlgmr.msra.gmra.mxu0 %vm243_vm1, %v3592_v27 }
0x1fa8   :  { %5971 = vmatpush3.msra.mxu0 %v5308_v28 }
0x1fa9   :  { %5972 = vmatprep.subr.mxu0 %v5307_v29 }
0x1faa   :  { %5973 = vmatpush3.msra.mxu0 %v5307_v29 }
0x205f   :  { %v5948_v30 = vpop.f32.mrf.mxu0 }
0x2061   :  { %v3580_v31 = vpop.f32.mrf.mxu0 }
0x2062   :  { %5974 = vmatprep.mubr.msk.f32.mxu0 %vm243_vm1, %v3580_v31 }
0x2063   :  { %5975 = vmatmul.mubr.msk.f32.vlgmr.msra.gmra.mxu0 %vm243_vm1, %v5948_v30 }
0x2067   :  { %v5955_v9 = vpop.f32.mrf.mxu0 }
0x2068   :  { %v3681_v32 = vmul.f32 0.25, %v5955_v9 }
0x2069   :  { %v3671_v33 = vpop.f32.mrf.mxu0 }
0x206a   :  { %v3683_v17 = vadd.f32 %v7226_v34, %v3681_v32  ;;  %v3680_v35 = vmul.f32 0.25, %v3671_v33 }
0x206c   :  { %v3682_v36 = vadd.f32 %v7232_v10, %v3680_v35  ;;  %v3687_v18 = vsel %vm243_vm1, %v3683_v17, -inf }
0x206d   :  { %3688 = vmax.xlane.f32.xlu1 %v3687_v18 }
0x206e   :  { %v3684_v37 = vsel %vm243_vm1, %v3682_v36, -inf }
0x206f   :  { %3685 = vmax.xlane.f32.xlu0 %v3684_v37 }
0x207e   :  { %3708 = vrot.lane.b32.xlu1 %v7181_v49, %s7620_s23 }
0x2082   :  { %3963 = vrot.lane.b32.xlu1 %v7175_v59, %s7621_s24 }
0x2086   :  { %3961 = vrot.lane.b32.xlu1 %v7168_v54, %s7621_s24 }
0x208a   :  { %3959 = vrot.lane.b32.xlu1 %v7175_v59, %s7622_s30 }
0x208e   :  { %4248 = vrot.lane.b32.xlu1 %v7168_v54, %s7623_s2 }
0x2092   :  { %4246 = vrot.lane.b32.xlu1 %v7175_v59, %s7624_s28 }
0x20f6   :  { %v3689_v38 = vpop.xlane.xlu1 %3688 }
0x20f7   :  { %v3691_v40 = vsub.f32 %v3683_v17, %v3689_v38 }
0x20f8   :  { %v3686_v42 = vpop.xlane.xlu0 %3685 }
0x20f9   :  { %v3694_v4 = vmul.f32 1.442695, %v3691_v40  ;;  %v3690_v45 = vsub.f32 %v3682_v36, %v3686_v42 }
0x20fa   :  { %v3709_v57 = vpop.permute.xlu1 %3708 }
0x20fb   :  { %6254 = vpow2.f32 %v3694_v4  ;;  %v3692_v48 = vmul.f32 1.442695, %v3690_v45 }
0x20fd   :  { %6256 = vpow2.f32 %v3692_v48 }
0x20fe   :  { %v3964_v62 = vpop.permute.xlu1 %3963 }
0x2102   :  { %v3962_v56 = vpop.permute.xlu1 %3961 }
0x2106   :  { %v3960_v11 = vpop.permute.xlu1 %3959 }
0x2108   :  { %v6255_v50 = vpop.eup %6254 }
0x2109   :  { %v3699_v43 = vsel %vm243_vm1, %v6255_v50, 0.0 }
0x210a   :  { %v6257_v55 = vpop.eup %6256  ;;  %3700 = vadd.xlane.f32.xlu0 %v3699_v43  ;;  %v4249_v52 = vpop.permute.xlu1 %4248 }
0x210b   :  { %v3696_v19 = vsel %vm243_vm1, %v6257_v55, 0.0 }
0x210e   :  { %3697 = vadd.xlane.f32.xlu0 %v3696_v19  ;;  %v4247_v15 = vpop.permute.xlu1 %4246 }
0x2124   :  { %3710 = vrot.lane.b32.xlu0 %v7177_v51, %s7620_s23 }
0x2128   :  { %3957 = vrot.lane.b32.xlu0 %v7168_v54, %s7622_s30 }
0x212c   :  { %4250 = vrot.lane.b32.xlu0 %v7175_v59, %s7623_s2 }
0x2130   :  { %4244 = vrot.lane.b32.xlu0 %v7168_v54, %s7624_s28  ;;  %v5309_v54 = vld [vmem:[%s7570_s6 + $0x90] sm:$0xff] }
0x2193   :  { %v3701_v58 = vpop.xlane.xlu0 %3700 }
0x2194   :  { %6258 = vrcp.f32 %v3701_v58 }
0x2197   :  { %v3698_v1 = vpop.xlane.xlu0 %3697 }
0x2198   :  { %6260 = vrcp.f32 %v3698_v1 }
0x219b   :  { %v3711_v60 = vpop.permute.xlu0 %3710 }
0x219c   :  { %5956 = vmatprep.subr.mxu1 %v3711_v60 }
0x219d   :  { %5957 = vmatpush3.msra.mxu1 %v3711_v60 }
0x219e   :  { %5958 = vmatprep.subr.mxu1 %v3709_v57 }
0x219f   :  { %5959 = vmatpush3.msra.mxu1 %v3709_v57  ;;  %v3958_v3 = vpop.permute.xlu0 %3957 }
0x21a0   :  { %5963 = vmatprep.subr.mxu1 %v5310_v61 }
0x21a1   :  { %v6259_v46 = vpop.eup %6258 }
0x21a2   :  { %v3705_v2 = vmul.f32 %v6259_v46, %v6255_v50 }
0x21a3   :  { %v4251_v8 = vpop.permute.xlu0 %4250 }
0x21a5   :  { %v6261_v59 = vpop.eup %6260 }
0x21a6   :  { %v3704_v0 = vmul.f32 %v6261_v59, %v6257_v55 }
0x21a7   :  { %v4245_v12 = vpop.permute.xlu0 %4244 }
0x21a8   :  { %5960 = vmatprep.mubr.msk.f32.mxu1 %vm243_vm1, %v3704_v0 }
0x21a9   :  { %5961 = vmatmul.mubr.msk.f32.vlgmr.msra.gmra.mxu1 %vm243_vm1, %v3705_v2 }
0x21aa   :  { %5964 = vmatpush3.msra.mxu1 %v5310_v61 }
0x21ab   :  { %5965 = vmatprep.subr.mxu1 %v5309_v54 }
0x21ac   :  { %5966 = vmatpush3.msra.mxu1 %v5309_v54 }
0x21ad   :  { %5977 = vmatprep.subr.msk.mxu1 %vm243_vm1, %v3964_v62 }
0x2269   :  { %v5962_v5 = vpop.f32.mrf.mxu1 }
0x226b   :  { %v3786_v7 = vpop.f32.mrf.mxu1 }
0x226c   :  { %5967 = vmatprep.mubr.msk.f32.mxu1 %vm243_vm1, %v3786_v7 }
0x226d   :  { %5968 = vmatmul.mubr.msk.f32.vlgmr.msra.gmra.mxu1 %vm243_vm1, %v5962_v5 }
0x226e   :  { %5978 = vmatpush3.xpose.msk.msra.mxu1 %vm243_vm1, %v3964_v62  ;;  %5981 = vmatprep.mubr.msk.f32.mxu1 %vm243_vm1, %v3958_v3  ;;  %v5976_v3 = vpop.f32.mrf.mxu0 }
0x226f   :  { %5979 = vmatprep.subr.msk.mxu1 %vm243_vm1, %v3962_v56 }
0x2270   :  { %v3948_v5 = vpop.f32.mrf.mxu0 }
0x2272   :  { %5980 = vmatpush3.xpose.msk.msra.mxu1 %vm243_vm1, %v3962_v56 }
0x2273   :  { %5998 = vmatprep.subr.msk.mxu1 %vm243_vm1, %v4251_v8 }
0x2275   :  { %5982 = vmatmul.mubr.msk.f32.vlgmr.msra.gmra.mxu1 %vm243_vm1, %v3960_v11 }
0x2276   :  { %5999 = vmatpush3.xpose.msk.msra.mxu1 %vm243_vm1, %v4251_v8  ;;  %6002 = vmatprep.mubr.msk.f32.mxu1 %vm243_vm1, %v4245_v12 }
0x2277   :  { %6000 = vmatprep.subr.msk.mxu1 %vm243_vm1, %v4249_v52 }
0x227a   :  { %6001 = vmatpush3.xpose.msk.msra.mxu1 %vm243_vm1, %v4249_v52 }
0x227d   :  { %6003 = vmatmul.mubr.msk.f32.vlgmr.msra.gmra.mxu1 %vm243_vm1, %v4247_v15 }
0x232d   :  { %v7281_v14 = vpop.f32.mrf.mxu1 }
0x232f   :  { %v7283_v13 = vpop.f32.mrf.mxu1 }
0x2335   :  { %v5983_v6 = vpop.f32.mrf.mxu1 }
0x2336   :  { %v4049_v16 = vmul.f32 0.25, %v5983_v6  ;;  %v5314_v6 = vld [vmem:[%s7570_s6 + $0xb8] sm:$0xff] }
0x2337   :  { %v4039_v53 = vpop.f32.mrf.mxu1 }
0x2338   :  { %v4051_v63 = vadd.f32 %v7226_v34, %v4049_v16  ;;  %v4048_v20 = vmul.f32 0.25, %v4039_v53  ;;  %v5313_v16 = vld [vmem:[%s7570_s6 + $0xb0] sm:$0xff]  ;;  %v3954_v53 = vadd.f32 %v5976_v3, %v7281_v14  ;;  %v5352_v3 = vld [vmem:[%s7574_s9 + $0x2] ss:$0 sm:$0xff] }
0x233a   :  { %v4050_v21 = vadd.f32 %v7232_v10, %v4048_v20  ;;  %v4055_v22 = vsel %vm243_vm1, %v4051_v63, -inf  ;;  %v3949_v20 = vadd.f32 %v3948_v5, %v7283_v13 }
0x233b   :  { %4056 = vmax.xlane.f32.xlu1 %v4055_v22 }
0x233c   :  { %v4052_v23 = vsel %vm243_vm1, %v4050_v21, -inf }
0x233d   :  { %4053 = vmax.xlane.f32.xlu0 %v4052_v23  ;;  %v6004_v24 = vpop.f32.mrf.mxu1 }
0x233e   :  { %v4336_v42 = vmul.f32 0.25, %v6004_v24 }
0x233f   :  { %v4326_v25 = vpop.f32.mrf.mxu1 }
0x2340   :  { %v4335_v26 = vmul.f32 0.25, %v4326_v25  ;;  %v4338_v4 = vadd.f32 %v7226_v34, %v4336_v42  ;;  %v5312_v34 = vld [vmem:[%s7570_s6 + $0xa8] sm:$0xff] }
0x2342   :  { %v4337_v27 = vadd.f32 %v7232_v10, %v4335_v26  ;;  %v4342_v45 = vsel %vm243_vm1, %v4338_v4, -inf }
0x2344   :  { %v4339_v28 = vsel %vm243_vm1, %v4337_v27, -inf }
0x234c   :  { %4074 = vrot.lane.b32.xlu1 %v7181_v49, %s7622_s30 }
0x2370   :  { %4340 = vmax.xlane.f32.xlu1 %v4339_v28 }
0x23c4   :  { %v4057_v29 = vpop.xlane.xlu1 %4056 }
0x23c5   :  { %v4059_v30 = vsub.f32 %v4051_v63, %v4057_v29 }
0x23c6   :  { %v4054_v31 = vpop.xlane.xlu0 %4053 }
0x23c7   :  { %v4062_v9 = vmul.f32 1.442695, %v4059_v30  ;;  %v4058_v32 = vsub.f32 %v4050_v21, %v4054_v31 }
0x23c8   :  { %v4075_v10 = vpop.permute.xlu1 %4074 }
0x23c9   :  { %6262 = vpow2.f32 %v4062_v9  ;;  %v4060_v33 = vmul.f32 1.442695, %v4058_v32 }
0x23cb   :  { %6264 = vpow2.f32 %v4060_v33 }
0x23d6   :  { %v6263_v17 = vpop.eup %6262 }
0x23d7   :  { %v4067_v35 = vsel %vm243_vm1, %v6263_v17, 0.0 }
0x23d8   :  { %v6265_v36 = vpop.eup %6264  ;;  %4068 = vadd.xlane.f32.xlu0 %v4067_v35 }
0x23d9   :  { %v4064_v18 = vsel %vm243_vm1, %v6265_v36, 0.0 }
0x23dc   :  { %4065 = vadd.xlane.f32.xlu0 %v4064_v18 }
0x23f2   :  { %4076 = vrot.lane.b32.xlu0 %v7177_v51, %s7622_s30 }
0x23f9   :  { %v4341_v37 = vpop.xlane.xlu1 %4340 }
0x23fa   :  { %v4345_v38 = vsub.f32 %v4337_v27, %v4341_v37  ;;  %v5348_v27 = vld [vmem:[%s7571_s7 + $0x2] ss:$0 sm:$0xff]  ;;  %s7629_s7 = sld [smem:[#allocation10_spill]] }
0x23fc   :  { %v4347_v40 = vmul.f32 1.442695, %v4345_v38 }
0x23fe   :  { %6266 = vpow2.f32 %v4347_v40 }
0x240b   :  { %v6267_v48 = vpop.eup %6266 }
0x240c   :  { %v4351_v50 = vsel %vm243_vm1, %v6267_v48, 0.0 }
0x2411   :  { %4343 = vmax.xlane.f32.xlu0 %v4342_v45  ;;  %v5358_v45 = vld [vmem:[%s7572_s10 + $0xa8] sm:$0xff] }
0x2415   :  { %4352 = vadd.xlane.f32.xlu0 %v4351_v50  ;;  %v5356_v50 = vld [vmem:[%s7572_s10 + $0x98] sm:$0xff] }
0x242b   :  { %4363 = vrot.lane.b32.xlu0 %v7177_v51, %s7624_s28  ;;  %v5311_v51 = vld [vmem:[%s7570_s6 + $0xa0] sm:$0xff] }
0x2461   :  { %v4069_v43 = vpop.xlane.xlu0 %4068 }
0x2462   :  { %6268 = vrcp.f32 %v4069_v43  ;;  %v5355_v43 = vld [vmem:[%s7572_s10 + $0x90] sm:$0xff] }
0x2465   :  { %v4066_v55 = vpop.xlane.xlu0 %4065 }
0x2466   :  { %6270 = vrcp.f32 %v4066_v55  ;;  %v5354_v55 = vld [vmem:[%s7572_s10 + $0x88] sm:$0xff] }
0x2469   :  { %v4077_v19 = vpop.permute.xlu0 %4076 }
0x246a   :  { %5984 = vmatprep.subr.mxu0 %v4077_v19 }
0x246b   :  { %5985 = vmatpush3.msra.mxu0 %v4077_v19  ;;  %v5353_v19 = vld [vmem:[%s7572_s10 + $0x80] sm:$0xff] }
0x246c   :  { %5986 = vmatprep.subr.mxu0 %v4075_v10 }
0x246d   :  { %5987 = vmatpush3.msra.mxu0 %v4075_v10 }
0x246e   :  { %5991 = vmatprep.subr.mxu0 %v5312_v34 }
0x246f   :  { %v6269_v58 = vpop.eup %6268 }
0x2470   :  { %v4073_v57 = vmul.f32 %v6269_v58, %v6263_v17 }
0x2473   :  { %v6271_v1 = vpop.eup %6270 }
0x2474   :  { %v4072_v60 = vmul.f32 %v6271_v1, %v6265_v36 }
0x2476   :  { %5988 = vmatprep.mubr.msk.f32.mxu0 %vm243_vm1, %v4072_v60 }
0x2477   :  { %5989 = vmatmul.mubr.msk.f32.vlgmr.msra.gmra.mxu0 %vm243_vm1, %v4073_v57 }
0x2478   :  { %5992 = vmatpush3.msra.mxu0 %v5312_v34  ;;  %v4868_v34 = vld [vmem:[%s7580_s17 + $0x38] sm:$0xff] }
0x2479   :  { %5993 = vmatprep.subr.mxu0 %v5311_v51 }
0x247a   :  { %5994 = vmatpush3.msra.mxu0 %v5311_v51 }
0x249a   :  { %v4344_v61 = vpop.xlane.xlu0 %4343 }
0x249b   :  { %v4346_v46 = vsub.f32 %v4338_v4, %v4344_v61  ;;  %v5359_v4 = vld [vmem:[%s7572_s10 + $0xb0] sm:$0xff] }
0x249d   :  { %v4349_v59 = vmul.f32 1.442695, %v4346_v46 }
0x249e   :  { %v4353_v0 = vpop.xlane.xlu0 %4352 }
0x249f   :  { %6272 = vpow2.f32 %v4349_v59  ;;  %v5351_v59 = vld [vmem:[%s7573_s8 + $0x2] ss:$0 sm:$0xff] }
0x24a0   :  { %6274 = vrcp.f32 %v4353_v0 }
0x24a2   :  { %v4364_v2 = vpop.permute.xlu0 %4363 }
0x24a3   :  { %6005 = vmatprep.subr.mxu0 %v4364_v2 }
0x24ac   :  { %v6273_v54 = vpop.eup %6272 }
0x24ad   :  { %v4354_v62 = vsel %vm243_vm1, %v6273_v54, 0.0  ;;  %v6275_v56 = vpop.eup %6274 }
0x24ae   :  { %4355 = vadd.xlane.f32.xlu1 %v4354_v62  ;;  %v4359_v12 = vmul.f32 %v6275_v56, %v6267_v48  ;;  %v5357_v48 = vld [vmem:[%s7572_s10 + $0xa0] sm:$0xff] }
0x24bf   :  { %4361 = vrot.lane.b32.xlu1 %v7181_v49, %s7624_s28 }
0x2537   :  { %v5990_v7 = vpop.f32.mrf.mxu0  ;;  %v4356_v8 = vpop.xlane.xlu1 %4355 }
0x2538   :  { %6276 = vrcp.f32 %v4356_v8  ;;  %v4867_v8 = vld [vmem:[%s7580_s17 + $0x30] sm:$0xff] }
0x2539   :  { %v4152_v11 = vpop.f32.mrf.mxu0 }
0x253a   :  { %5995 = vmatprep.mubr.msk.f32.mxu0 %vm243_vm1, %v4152_v11  ;;  %v4866_v11 = vld [vmem:[%s7580_s17 + $0x28] sm:$0xff] }
0x253b   :  { %5996 = vmatmul.mubr.msk.f32.vlgmr.msra.gmra.mxu0 %vm243_vm1, %v5990_v7  ;;  %v4362_v52 = vpop.permute.xlu1 %4361 }
0x253c   :  { %6006 = vmatpush3.msra.mxu0 %v4364_v2  ;;  %6009 = vmatprep.mubr.msk.f32.mxu0 %vm243_vm1, %v4359_v12  ;;  %v4865_v12 = vld [vmem:[%s7580_s17 + $0x20] sm:$0xff] }
0x253d   :  { %6007 = vmatprep.subr.mxu0 %v4362_v52 }
0x253e   :  { %6008 = vmatpush3.msra.mxu0 %v4362_v52  ;;  %v4864_v52 = vld [vmem:[%s7580_s17 + $0x18] sm:$0xff] }
0x253f   :  { %6012 = vmatprep.subr.mxu0 %v5314_v6 }
0x2545   :  { %v6277_v49 = vpop.eup %6276 }
0x2546   :  { %v4360_v15 = vmul.f32 %v6277_v49, %v6273_v54  ;;  %v4862_v49 = vld [vmem:[%s7580_s17 + $0x8] sm:$0xff] }
0x2548   :  { %6010 = vmatmul.mubr.msk.f32.vlgmr.msra.gmra.mxu0 %vm243_vm1, %v4360_v15  ;;  %v4861_v15 = vld [vmem:[%s7580_s17] sm:$0xff] }
0x2549   :  { %6013 = vmatpush3.msra.mxu0 %v5314_v6  ;;  %v5380_v6 = vld [vmem:[%s7575_s12 + $0x178] sm:$0xff] }
0x254a   :  { %6014 = vmatprep.subr.mxu0 %v5313_v16 }
0x254b   :  { %6015 = vmatpush3.msra.mxu0 %v5313_v16  ;;  %v5379_v16 = vld [vmem:[%s7575_s12 + $0x170] sm:$0xff] }
0x254c   :  { %6038 = vmatprep.subr.mxu0 %v5380_v6 }
0x25fb   :  { %v5997_v63 = vpop.f32.mrf.mxu0 }
0x25fc   :  { %v4243_v21 = vadd.f32 %v5997_v63, %v3954_v53  ;;  %v5378_v53 = vld [vmem:[%s7575_s12 + $0x168] sm:$0xff]  ;;  %v5376_v63 = vld [vmem:[%s7575_s12 + $0x158] sm:$0xff] }
0x25fd   :  { %v4233_v22 = vpop.f32.mrf.mxu0 }
0x25fe   :  { %v4242_v23 = vadd.f32 %v4233_v22, %v3949_v20  ;;  %v5375_v20 = vld [vmem:[%s7575_s12 + $0x150] sm:$0xff]  ;;  %v5373_v22 = vld [vmem:[%s7575_s12 + $0x140] sm:$0xff] }
0x2608   :  { %v6011_v24 = vpop.f32.mrf.mxu0 }
0x260a   :  { %v4439_v25 = vpop.f32.mrf.mxu0 }
0x260b   :  { %6016 = vmatprep.mubr.msk.f32.mxu0 %vm243_vm1, %v4439_v25  ;;  %v5370_v25 = vld [vmem:[%s7575_s12 + $0x128] sm:$0xff] }
0x260c   :  { %6017 = vmatmul.mubr.msk.f32.vlgmr.msra.gmra.mxu0 %vm243_vm1, %v6011_v24  ;;  %v5371_v24 = vld [vmem:[%s7575_s12 + $0x130] sm:$0xff] }
0x260d   :  { %6039 = vmatpush3.msra.mxu0 %v5380_v6  ;;  %v4854_v6 = vld [vmem:[%s7581_s16 + $0x8] sm:$0xff] }
0x260e   :  { %6040 = vmatprep.subr.mxu0 %v5379_v16 }
0x260f   :  { %6041 = vmatpush3.msra.mxu0 %v5379_v16  ;;  %v4853_v16 = vld [vmem:[%s7581_s16] sm:$0xff] }
0x2610   :  { %6042 = vmatprep.subr.mxu0 %v5378_v53 }
0x2611   :  { %6043 = vmatpush3.msra.mxu0 %v5378_v53  ;;  %v5055_v53 = vld [vmem:[%s7582_s19 + $0x78] sm:$0xff] }
0x26cc   :  { %v6018_v26 = vpop.f32.mrf.mxu0 }
0x26cd   :  { %v4530_v28 = vadd.f32 %v6018_v26, %v4243_v21  ;;  %v5374_v21 = vld [vmem:[%s7575_s12 + $0x148] sm:$0xff]  ;;  %v5369_v26 = vld [vmem:[%s7575_s12 + $0x120] sm:$0xff] }
0x26ce   :  { %v4520_v29 = vpop.f32.mrf.mxu0 }
0x26cf   :  { %v4540_v14 = vadd.f32 %v5348_v27, %v4530_v28  ;;  %v4529_v30 = vadd.f32 %v4520_v29, %v4242_v23  ;;  %v5372_v23 = vld [vmem:[%s7575_s12 + $0x138] sm:$0xff]  ;;  %v5367_v28 = vld [vmem:[%s7575_s12 + $0x110] sm:$0xff]  ;;  %v5366_v29 = vld [vmem:[%s7575_s12 + $0x108] sm:$0xff] }
0x26d1   :  { %v4539_v31 = vadd.f32 %v5348_v27, %v4529_v30  ;;  %v4542_v13 = vadd.f32 %v4540_v14, %v7160_v47  ;;  %v5368_v27 = vld [vmem:[%s7575_s12 + $0x118] sm:$0xff]  ;;  %v5365_v14 = vld [vmem:[%s7575_s12 + $0x100] sm:$0xff] }
0x26d2   :  { %v5362_v30 = vld [vmem:[%s7576_s11 + $0x2] ss:$0 sm:$0xff]  ;;  %s7628_s11 = sld [smem:[#allocation9_spill]] }
0x26d3   :  { %v4550_v9 = vsel %vm74_vm0, %v4542_v13, 0.0  ;;  %v4541_v32 = vadd.f32 %v4539_v31, %v7155_v44  ;;  %v5360_v44 = vld [vmem:[%s7572_s10 + $0xb8] sm:$0xff] }
0x26d4   :  { %4551 = vadd.xlane.f32.xlu0 %v4550_v9  ;;  %6019 = vmatprep.subr.mxu1 %v5360_v44 }
0x26d5   :  { %v4547_v33 = vsel %vm74_vm0, %v4541_v32, 0.0  ;;  %6020 = vmatpush3.msra.mxu1 %v5360_v44 }
0x26d6   :  { %4548 = vadd.xlane.f32.xlu1 %v4547_v33  ;;  %6021 = vmatprep.subr.mxu1 %v5359_v4 }
0x26d7   :  { %6022 = vmatpush3.msra.mxu1 %v5359_v4 }
0x26d8   :  { %6023 = vmatprep.subr.mxu1 %v5358_v45 }
0x26d9   :  { %6024 = vmatpush3.msra.mxu1 %v5358_v45 }
0x26da   :  { %6025 = vmatprep.subr.mxu1 %v5357_v48 }
0x26db   :  { %6026 = vmatpush3.msra.mxu1 %v5357_v48 }
0x26dc   :  { %6027 = vmatprep.subr.mxu1 %v5356_v50 }
0x26dd   :  { %6028 = vmatpush3.msra.mxu1 %v5356_v50 }
0x26de   :  { %6029 = vmatprep.subr.mxu1 %v5355_v43 }
0x26df   :  { %6030 = vmatpush3.msra.mxu1 %v5355_v43 }
0x26e0   :  { %6031 = vmatprep.subr.mxu1 %v5354_v55 }
0x26e1   :  { %6032 = vmatpush3.msra.mxu1 %v5354_v55 }
0x26e2   :  { %6033 = vmatprep.subr.mxu1 %v5353_v19 }
0x26e3   :  { %6034 = vmatpush3.msra.mxu1 %v5353_v19  ;;  %v5382_v19 = vld [vmem:[%s7577_s13 + $0x2] ss:$0 sm:$0xff] }
0x26e4   :  { %6073 = vmatprep.subr.mxu1 %v4868_v34 }
0x275d   :  { %v4552_v17 = vpop.xlane.xlu0 %4551 }
0x275e   :  { %v4554_v35 = vmul.f32 0.015625, %v4552_v17 }
0x275f   :  { %v4549_v36 = vpop.xlane.xlu1 %4548 }
0x2760   :  { %v4556_v18 = vsub.f32 %v4542_v13, %v4554_v35  ;;  %v4553_v10 = vmul.f32 0.015625, %v4549_v36 }
0x2762   :  { %v4555_v37 = vsub.f32 %v4541_v32, %v4553_v10  ;;  %v4558_v38 = vmul.f32 %v4556_v18, %v4556_v18 }
0x2764   :  { %v4562_v40 = vsel %vm74_vm0, %v4558_v38, 0.0  ;;  %v4557_v42 = vmul.f32 %v4555_v37, %v4555_v37 }
0x2765   :  { %4563 = vadd.xlane.f32.xlu1 %v4562_v40 }
0x2766   :  { %v4559_v47 = vsel %vm74_vm0, %v4557_v42, 0.0 }
0x2767   :  { %4560 = vadd.xlane.f32.xlu0 %v4559_v47 }
0x27ee   :  { %v4564_v58 = vpop.xlane.xlu1 %4563 }
0x27ef   :  { %v4566_v1 = vmul.f32 0.015625, %v4564_v58 }
0x27f0   :  { %v4561_v60 = vpop.xlane.xlu0 %4560 }
0x27f1   :  { %v4568_v57 = vadd.f32 1e-12, %v4566_v1  ;;  %v4565_v51 = vmul.f32 0.015625, %v4561_v60 }
0x27f3   :  { %6278 = vrsqrt.f32 %v4568_v57  ;;  %v4567_v61 = vadd.f32 1e-12, %v4565_v51 }
0x27f5   :  { %6280 = vrsqrt.f32 %v4567_v61 }
0x2800   :  { %v6279_v46 = vpop.eup %6278 }
0x2801   :  { %v4572_v0 = vmul.f32 %v6279_v46, %v4556_v18 }
0x2802   :  { %v6281_v2 = vpop.eup %6280 }
0x2803   :  { %v4571_v54 = vmul.f32 %v6281_v2, %v4555_v37  ;;  %v4580_v62 = vmul.f32 %v5351_v59, %v4572_v0 }
0x2805   :  { %v4579_v5 = vmul.f32 %v5351_v59, %v4571_v54  ;;  %v7371_v7 = vadd.f32 %v5352_v3, %v4580_v62 }
0x2807   :  { %v7369_v56 = vadd.f32 %v5352_v3, %v4579_v5 }
0x2809   :  { %6035 = vmatprep.mubr.msk.f32.mxu1 %vm74_vm0, %v7369_v56 }
0x280a   :  { %6036 = vmatmul.mubr.msk.f32.vlgmr.msra.gmra.mxu1 %vm74_vm0, %v7371_v7 }
0x280b   :  { %6074 = vmatpush3.msra.mxu1 %v4868_v34  ;;  %6089 = vmatprep.mubr.msk.f32.mxu1 %vm74_vm0, %v6821_v39  ;;  %v4863_v39 = vld [vmem:[%s7580_s17 + $0x10] sm:$0xff] }
0x280c   :  { %6075 = vmatprep.subr.mxu1 %v4867_v8 }
0x280d   :  { %6076 = vmatpush3.msra.mxu1 %v4867_v8 }
0x280e   :  { %6077 = vmatprep.subr.mxu1 %v4866_v11 }
0x280f   :  { %6078 = vmatpush3.msra.mxu1 %v4866_v11  ;;  %v4860_v11 = vld [vmem:[%s7581_s16 + $0x38] sm:$0xff] }
0x2810   :  { %6079 = vmatprep.subr.mxu1 %v4865_v12 }
0x2811   :  { %6080 = vmatpush3.msra.mxu1 %v4865_v12  ;;  %v4859_v12 = vld [vmem:[%s7581_s16 + $0x30] sm:$0xff] }
0x2812   :  { %6081 = vmatprep.subr.mxu1 %v4864_v52 }
0x2813   :  { %6082 = vmatpush3.msra.mxu1 %v4864_v52  ;;  %v4858_v52 = vld [vmem:[%s7581_s16 + $0x28] sm:$0xff] }
0x2814   :  { %6083 = vmatprep.subr.mxu1 %v4863_v39 }
0x2815   :  { %6084 = vmatpush3.msra.mxu1 %v4863_v39  ;;  %v4857_v39 = vld [vmem:[%s7581_s16 + $0x20] sm:$0xff] }
0x2816   :  { %6085 = vmatprep.subr.mxu1 %v4862_v49 }
0x2817   :  { %6086 = vmatpush3.msra.mxu1 %v4862_v49  ;;  %v4856_v49 = vld [vmem:[%s7581_s16 + $0x18] sm:$0xff] }
0x2818   :  { %6087 = vmatprep.subr.mxu1 %v4861_v15 }
0x2819   :  { %6088 = vmatpush3.msra.mxu1 %v4861_v15  ;;  %v4855_v15 = vld [vmem:[%s7581_s16 + $0x10] sm:$0xff] }
0x281a   :  { %6090 = vmatmul.mubr.msk.f32.vlgmr.msra.gmra.mxu1 %vm74_vm0, %v6826_v41  ;;  %v5377_v41 = vld [vmem:[%s7575_s12 + $0x160] sm:$0xff]  ;;  %6092 = vmatprep.subr.mxu1 %v4860_v11 }
0x281b   :  { %6044 = vmatprep.subr.mxu0 %v5377_v41  ;;  %6093 = vmatpush3.msra.mxu1 %v4860_v11 }
0x281c   :  { %6045 = vmatpush3.msra.mxu0 %v5377_v41  ;;  %6094 = vmatprep.subr.mxu1 %v4859_v12  ;;  %v5054_v41 = vld [vmem:[%s7582_s19 + $0x70] sm:$0xff] }
0x281d   :  { %6046 = vmatprep.subr.mxu0 %v5376_v63  ;;  %6095 = vmatpush3.msra.mxu1 %v4859_v12 }
0x281e   :  { %6047 = vmatpush3.msra.mxu0 %v5376_v63  ;;  %6096 = vmatprep.subr.mxu1 %v4858_v52  ;;  %v5053_v63 = vld [vmem:[%s7582_s19 + $0x68] sm:$0xff] }
0x281f   :  { %6048 = vmatprep.subr.mxu0 %v5375_v20  ;;  %6097 = vmatpush3.msra.mxu1 %v4858_v52 }
0x2820   :  { %6049 = vmatpush3.msra.mxu0 %v5375_v20  ;;  %6098 = vmatprep.subr.mxu1 %v4857_v39  ;;  %v5052_v20 = vld [vmem:[%s7582_s19 + $0x60] sm:$0xff] }
0x2821   :  { %6050 = vmatprep.subr.mxu0 %v5374_v21  ;;  %6099 = vmatpush3.msra.mxu1 %v4857_v39 }
0x2822   :  { %6051 = vmatpush3.msra.mxu0 %v5374_v21  ;;  %6100 = vmatprep.subr.mxu1 %v4856_v49  ;;  %v5051_v21 = vld [vmem:[%s7582_s19 + $0x58] sm:$0xff] }
0x2823   :  { %6052 = vmatprep.subr.mxu0 %v5373_v22  ;;  %6101 = vmatpush3.msra.mxu1 %v4856_v49 }
0x2824   :  { %6053 = vmatpush3.msra.mxu0 %v5373_v22  ;;  %6102 = vmatprep.subr.mxu1 %v4855_v15  ;;  %v5050_v22 = vld [vmem:[%s7582_s19 + $0x50] sm:$0xff] }
0x2825   :  { %6054 = vmatprep.subr.mxu0 %v5372_v23  ;;  %6103 = vmatpush3.msra.mxu1 %v4855_v15 }
0x2826   :  { %6055 = vmatpush3.msra.mxu0 %v5372_v23  ;;  %6104 = vmatprep.subr.mxu1 %v4854_v6  ;;  %v5049_v23 = vld [vmem:[%s7582_s19 + $0x48] sm:$0xff] }
0x2827   :  { %6056 = vmatprep.subr.mxu0 %v5371_v24  ;;  %6105 = vmatpush3.msra.mxu1 %v4854_v6 }
0x2828   :  { %6057 = vmatpush3.msra.mxu0 %v5371_v24  ;;  %6106 = vmatprep.subr.mxu1 %v4853_v16  ;;  %v5048_v24 = vld [vmem:[%s7582_s19 + $0x40] sm:$0xff] }
0x2829   :  { %6058 = vmatprep.subr.mxu0 %v5370_v25  ;;  %6107 = vmatpush3.msra.mxu1 %v4853_v16 }
0x282a   :  { %6059 = vmatpush3.msra.mxu0 %v5370_v25  ;;  %v5047_v25 = vld [vmem:[%s7582_s19 + $0x38] sm:$0xff] }
0x282b   :  { %6060 = vmatprep.subr.mxu0 %v5369_v26 }
0x282c   :  { %6061 = vmatpush3.msra.mxu0 %v5369_v26  ;;  %v5046_v26 = vld [vmem:[%s7582_s19 + $0x30] sm:$0xff] }
0x282d   :  { %6062 = vmatprep.subr.mxu0 %v5368_v27 }
0x282e   :  { %6063 = vmatpush3.msra.mxu0 %v5368_v27  ;;  %v5045_v27 = vld [vmem:[%s7582_s19 + $0x28] sm:$0xff] }
0x282f   :  { %6064 = vmatprep.subr.mxu0 %v5367_v28 }
0x2830   :  { %6065 = vmatpush3.msra.mxu0 %v5367_v28 }
0x2831   :  { %6066 = vmatprep.subr.mxu0 %v5366_v29 }
0x2832   :  { %6067 = vmatpush3.msra.mxu0 %v5366_v29 }
0x2833   :  { %6068 = vmatprep.subr.mxu0 %v5365_v14 }
0x2834   :  { %6069 = vmatpush3.msra.mxu0 %v5365_v14 }
0x2835   :  { %6111 = vmatprep.subr.mxu0 %v5055_v53 }
0x28ca   :  { %v6037_v31 = vpop.f32.mrf.mxu1 }
0x28cb   :  { %v4684_v13 = vadd.f32 %v6037_v31, %v5362_v30 }
0x28cc   :  { %v4678_v9 = vpop.f32.mrf.mxu1 }
0x28cd   :  { %v4688_v32 = vmul.f32 %v4684_v13, %v4684_v13  ;;  %v4679_v33 = vadd.f32 %v5362_v30, %v4678_v9 }
0x28cf   :  { %v4690_v17 = vmul.f32 %v4688_v32, %v4684_v13  ;;  %v4687_v35 = vmul.f32 %v4679_v33, %v4679_v33  ;;  %v5385_v32 = vld [vmem:[%s7578_s14 + $0x2] ss:$0 sm:$0xff] }
0x28d1   :  { %v4692_v36 = vmul.f32 0.044715, %v4690_v17  ;;  %v4689_v18 = vmul.f32 %v4687_v35, %v4679_v33 }
0x28d3   :  { %v4694_v10 = vadd.f32 %v4692_v36, %v4684_v13  ;;  %v4691_v37 = vmul.f32 0.044715, %v4689_v18  ;;  %v5386_v18 = vld [vmem:[%s7579_s15 + $0x2] ss:$0 sm:$0xff] }
0x28d5   :  { %v4696_v38 = vmul.f32 0.7978846, %v4694_v10  ;;  %v4693_v40 = vadd.f32 %v4691_v37, %v4679_v33 }
0x28d7   :  { %6282 = vtanh.f32 %v4696_v38  ;;  %v4695_v42 = vmul.f32 0.7978846, %v4693_v40  ;;  %v5044_v40 = vld [vmem:[%s7582_s19 + $0x20] sm:$0xff] }
0x28d9   :  { %6284 = vtanh.f32 %v4695_v42  ;;  %v5043_v42 = vld [vmem:[%s7582_s19 + $0x18] sm:$0xff] }
0x28e4   :  { %v6283_v47 = vpop.eup %6282 }
0x28e5   :  { %v4700_v44 = vadd.f32 1.0, %v6283_v47  ;;  %v5042_v47 = vld [vmem:[%s7582_s19 + $0x10] sm:$0xff] }
0x28e6   :  { %v6285_v4 = vpop.eup %6284 }
0x28e7   :  { %v4699_v45 = vadd.f32 1.0, %v6285_v4  ;;  %v4702_v48 = vmul.f32 0.5, %v4700_v44  ;;  %v5041_v44 = vld [vmem:[%s7582_s19 + $0x8] sm:$0xff]  ;;  %v5040_v4 = vld [vmem:[%s7582_s19] sm:$0xff] }
0x28e9   :  { %v4701_v50 = vmul.f32 0.5, %v4699_v45  ;;  %v4704_v55 = vmul.f32 %v4702_v48, %v4684_v13  ;;  %v6091_v45 = vpop.f32.mrf.mxu1 }
0x28eb   :  { %v4703_v43 = vmul.f32 %v4701_v50, %v4679_v33  ;;  %v4935_v48 = vpop.f32.mrf.mxu1 }
0x28ed   :  { %6070 = vmatprep.mubr.f32.mxu0 %v4703_v43  ;;  %v5391_v43 = vld [vmem:[%s7627_s4] ss:$0 sm:$0xff] }
0x28ee   :  { %6071 = vmatmul.mubr.f32.vlgmr.msra.gmra.mxu0 %v4704_v55 }
0x28ef   :  { %6112 = vmatpush3.msra.mxu0 %v5055_v53 }
0x28f0   :  { %6113 = vmatprep.subr.mxu0 %v5054_v41 }
0x28f1   :  { %6114 = vmatpush3.msra.mxu0 %v5054_v41 }
0x28f2   :  { %6115 = vmatprep.subr.mxu0 %v5053_v63 }
0x28f3   :  { %6116 = vmatpush3.msra.mxu0 %v5053_v63 }
0x28f4   :  { %6117 = vmatprep.subr.mxu0 %v5052_v20 }
0x28f5   :  { %6118 = vmatpush3.msra.mxu0 %v5052_v20 }
0x28f6   :  { %6119 = vmatprep.subr.mxu0 %v5051_v21 }
0x28f7   :  { %6120 = vmatpush3.msra.mxu0 %v5051_v21 }
0x28f8   :  { %6121 = vmatprep.subr.mxu0 %v5050_v22 }
0x28f9   :  { %6122 = vmatpush3.msra.mxu0 %v5050_v22 }
0x28fa   :  { %6123 = vmatprep.subr.mxu0 %v5049_v23 }
0x28fb   :  { %6124 = vmatpush3.msra.mxu0 %v5049_v23 }
0x28fc   :  { %6125 = vmatprep.subr.mxu0 %v5048_v24 }
0x28fd   :  { %6126 = vmatpush3.msra.mxu0 %v5048_v24 }
0x28fe   :  { %6127 = vmatprep.subr.mxu0 %v5047_v25 }
0x28ff   :  { %6128 = vmatpush3.msra.mxu0 %v5047_v25 }
0x2900   :  { %6129 = vmatprep.subr.mxu0 %v5046_v26 }
0x2901   :  { %6130 = vmatpush3.msra.mxu0 %v5046_v26 }
0x2902   :  { %6131 = vmatprep.subr.mxu0 %v5045_v27 }
0x2903   :  { %6132 = vmatpush3.msra.mxu0 %v5045_v27 }
0x2904   :  { %6133 = vmatprep.subr.mxu0 %v5044_v40 }
0x2905   :  { %6134 = vmatpush3.msra.mxu0 %v5044_v40 }
0x2906   :  { %6135 = vmatprep.subr.mxu0 %v5043_v42 }
0x2907   :  { %6136 = vmatpush3.msra.mxu0 %v5043_v42 }
0x2908   :  { %6137 = vmatprep.subr.mxu0 %v5042_v47 }
0x2909   :  { %6138 = vmatpush3.msra.mxu0 %v5042_v47 }
0x290a   :  { %6139 = vmatprep.subr.mxu0 %v5041_v44 }
0x290b   :  { %6140 = vmatpush3.msra.mxu0 %v5041_v44 }
0x290c   :  { %6141 = vmatprep.subr.mxu0 %v5040_v4 }
0x290d   :  { %6142 = vmatpush3.msra.mxu0 %v5040_v4 }
0x29ae   :  { %v6072_v34 = vpop.f32.mrf.mxu0 }
0x29af   :  { %v4802_v58 = vadd.f32 %v6072_v34, %v5382_v19 }
0x29b0   :  { %v4796_v1 = vpop.f32.mrf.mxu0 }
0x29b1   :  { %v4806_v60 = vadd.f32 %v4802_v58, %v7371_v7  ;;  %v4797_v57 = vadd.f32 %v5382_v19, %v4796_v1 }
0x29b3   :  { %v4805_v51 = vadd.f32 %v4797_v57, %v7369_v56  ;;  %v4814_v61 = vsel %vm74_vm0, %v4806_v60, 0.0 }
0x29b4   :  { %4815 = vadd.xlane.f32.xlu1 %v4814_v61 }
0x29b5   :  { %v4811_v46 = vsel %vm74_vm0, %v4805_v51, 0.0 }
0x29b6   :  { %4812 = vadd.xlane.f32.xlu0 %v4811_v46  ;;  %v5392_v46 = vld [vmem:[%s7628_s11] ss:$0 sm:$0xff] }
0x2a3d   :  { %v4816_v59 = vpop.xlane.xlu1 %4815 }
0x2a3e   :  { %v4818_v0 = vmul.f32 0.015625, %v4816_v59 }
0x2a3f   :  { %v4813_v2 = vpop.xlane.xlu0 %4812 }
0x2a40   :  { %v7460_v54 = vsub.f32 %v4806_v60, %v4818_v0  ;;  %v4817_v62 = vmul.f32 0.015625, %v4813_v2 }
0x2a42   :  { %v7462_v3 = vsub.f32 %v4805_v51, %v4817_v62  ;;  %v4822_v5 = vmul.f32 %v7460_v54, %v7460_v54 }
0x2a44   :  { %v4826_v7 = vsel %vm74_vm0, %v4822_v5, 0.0  ;;  %v4821_v56 = vmul.f32 %v7462_v3, %v7462_v3 }
0x2a45   :  { %4827 = vadd.xlane.f32.xlu1 %v4826_v7 }
0x2a46   :  { %v4823_v8 = vsel %vm74_vm0, %v4821_v56, 0.0 }
0x2a47   :  { %4824 = vadd.xlane.f32.xlu0 %v4823_v8 }
0x2ace   :  { %v4828_v28 = vpop.xlane.xlu1 %4827 }
0x2acf   :  { %v4830_v29 = vmul.f32 0.015625, %v4828_v28 }
0x2ad0   :  { %v4825_v14 = vpop.xlane.xlu0 %4824 }
0x2ad1   :  { %v4832_v30 = vadd.f32 1e-12, %v4830_v29  ;;  %v4829_v31 = vmul.f32 0.015625, %v4825_v14 }
0x2ad3   :  { %6286 = vrsqrt.f32 %v4832_v30  ;;  %v4831_v13 = vadd.f32 1e-12, %v4829_v31 }
0x2ad5   :  { %6288 = vrsqrt.f32 %v4831_v13 }
0x2ae0   :  { %v6287_v9 = vpop.eup %6286 }
0x2ae1   :  { %v4836_v33 = vmul.f32 %v6287_v9, %v7460_v54 }
0x2ae2   :  { %v6289_v17 = vpop.eup %6288 }
0x2ae3   :  { %v4835_v35 = vmul.f32 %v6289_v17, %v7462_v3  ;;  %v4844_v36 = vmul.f32 %v5385_v32, %v4836_v33 }
0x2ae5   :  { %v4843_v10 = vmul.f32 %v5385_v32, %v4835_v35  ;;  %v4852_v38 = vadd.f32 %v5386_v18, %v4844_v36 }
0x2ae7   :  { %v4851_v37 = vadd.f32 %v5386_v18, %v4843_v10 }
0x2ae9   :  { %6108 = vmatprep.mubr.msk.f32.mxu1 %vm74_vm0, %v4851_v37 }
0x2aea   :  { %6109 = vmatmul.mubr.msk.f32.vlgmr.msra.gmra.mxu1 %vm74_vm0, %v4852_v38 }
0x2baa   :  { %v6110_v50 = vpop.f32.mrf.mxu1 }
0x2bab   :  { %v5022_v55 = vadd.f32 %v6110_v50, %v6091_v45 }
0x2bac   :  { %v5016_v19 = vpop.f32.mrf.mxu1 }
0x2bad   :  { %v5033_v34 = vadd.f32 %v5391_v43, %v5022_v55  ;;  %v5017_v58 = vadd.f32 %v5016_v19, %v4935_v48 }
0x2baf   :  { %v5032_v1 = vadd.f32 %v5391_v43, %v5017_v58  ;;  %v5037_v60 = vmul.f32 0.01, %v5033_v34  ;;  %vm5035_vm3 = vcmp.gt.f32.partialorder %v5033_v34, 0.0 }
0x2bb1   :  { %vm5034_vm2 = vcmp.gt.f32.partialorder %v5032_v1, 0.0  ;;  %v5036_v57 = vmul.f32 0.01, %v5032_v1  ;;  %v5039_v61 = vsel %vm5035_vm3, %v5033_v34, %v5037_v60 }
0x2bb3   :  { %v5038_v51 = vsel %vm5034_vm2, %v5032_v1, %v5036_v57 }
0x2bb4   :  { %6143 = vmatprep.mubr.f32.mxu0 %v5038_v51 }
0x2bb5   :  { %6144 = vmatmul.mubr.f32.vlgmr.msra.gmra.mxu0 %v5039_v61 }
0x2c75   :  { %v6145_v59 = vpop.f32.mrf.mxu0 }
0x2c76   :  { %v5135_v0 = vadd.f32 %v6145_v59, %v5392_v46 }
0x2c77   :  { %v5129_v2 = vpop.f32.mrf.mxu0 }
0x2c78   :  { %5139 = vst [vmem:[%s7629_s7 + $0x8] sm:$0xff] %v5135_v0  ;;  %v5130_v54 = vadd.f32 %v5392_v46, %v5129_v2 }
0x2c7a   :  { %5138 = vst [vmem:[%s7629_s7] sm:$0xff] %v5130_v54 }

</bundles_post_ra>
